<compile_context>
chip_gen: v7x
topology: tpu7x:2x2x1
jax: 0.10.0
libtpu: 0.0.40
codegen_flags: <defaults>
</compile_context>

<pallas_src>
import re
import numpy as np
import jax
import jax.numpy as jnp
from jax import lax
from jax.experimental import pallas as pl
from jax.experimental.pallas import tpu as pltpu


# ----------------------------------------------------------------------------
# TPU generation probe (defensive; used only for dtype / VMEM-budget choices)
# ----------------------------------------------------------------------------
def _tpu_generation():
    try:
        kind = jax.devices()[0].device_kind.lower()
    except Exception:
        return 6
    m = re.search(r"(\d+)", kind)
    return int(m.group(1)) if m else 6


def _gen_config(gen):
    """(depthwise compute dtype, vmem_limit_bytes, picker budget_bytes, even_steps)."""
    if gen >= 7:          # v7x: 64 MiB VMEM per TC, 2 TCs share the grid
        return jnp.bfloat16, 48 * 1024 * 1024, 26 * 1024 * 1024, True
    if gen == 6:          # v6e: 128 MiB VMEM, bf16 VALU
        return jnp.bfloat16, 100 * 1024 * 1024, 56 * 1024 * 1024, False
    if gen == 5:          # v5e/v5p: 128 MiB VMEM, no bf16 VALU
        return jnp.float32, 100 * 1024 * 1024, 56 * 1024 * 1024, False
    return jnp.float32, 64 * 1024 * 1024, 32 * 1024 * 1024, False


# ----------------------------------------------------------------------------
# Pallas kernel factory: whole bottleneck for Nb batch elements per grid step.
# ----------------------------------------------------------------------------
def _make_kernel(is_last, dw_dtype):
    def kernel(x_ref, w1_ref, s1_ref, b1_ref,
               w2_ref, s2_ref, b2_ref,
               w3_ref, s3_ref, b3_ref, *rest):
        if is_last:
            out_ref, pre_ref, pad_ref = rest
        else:
            (out_ref, pad_ref), pre_ref = rest, None

        Nb, H, W, Cin = x_ref.shape
        Cpad = w1_ref.shape[1]           # mid channels, zero-padded to 128x
        Cout = w3_ref.shape[1]
        M = Nb * H * W

        x_bf = x_ref[...]                                   # bf16 activations
        x_flat_f32 = x_bf.reshape(M, Cin).astype(jnp.float32)

        # --- conv1: grouped 1x1 (block-diag dense, shuffle folded) + bn1 + relu
        t1 = jnp.dot(x_bf.reshape(M, Cin), w1_ref[...],
                     preferred_element_type=jnp.float32)    # (M, Cpad) f32
        t1 = jnp.maximum(t1 * s1_ref[0] + b1_ref[0], 0.0)

        # --- conv2: depthwise 3x3, stride 1, pad 1 (+ bn2 + relu)
        # H-padding is built in registers (outer-axis concat -> one aligned
        # interior store); only the two 1-wide W border columns need explicit
        # zero stores each step (per-step on purpose: scratch is per-core on
        # v7x megacore, so a program_id==0 guard would leave one core stale).
        t1d = t1.reshape(Nb, H, W, Cpad).astype(dw_dtype)
        zh = jnp.zeros((Nb, 1, W, Cpad), dw_dtype)
        zw = jnp.zeros((Nb, H + 2, 1, Cpad), dw_dtype)
        pad_ref[:, :, 1:W + 1, :] = jnp.concatenate([zh, t1d, zh], axis=1)
        pad_ref[:, :, 0:1, :] = zw
        pad_ref[:, :, W + 1:W + 2, :] = zw

        w2 = w2_ref[...].astype(dw_dtype)                    # (9, Cpad)
        acc = pad_ref[:, 0:H, 0:W, :] * w2[0]                # init with tap 0
        for k in range(1, 9):
            dh, dw = k // 3, k % 3
            acc = acc + pad_ref[:, dh:dh + H, dw:dw + W, :] * w2[k]
        t2 = acc.astype(jnp.float32).reshape(M, Cpad)
        t2 = jnp.maximum(t2 * s2_ref[0] + b2_ref[0], 0.0)

        # --- conv3: grouped 1x1 (block-diag dense) + bn3
        t3 = jnp.dot(t2.astype(jnp.bfloat16), w3_ref[...],
                     preferred_element_type=jnp.float32)     # (M, Cout)
        t3 = t3 * s3_ref[0] + b3_ref[0]

        # --- residual add (stride == 1 identity shortcut, Cin == Cout) + relu
        preact = t3 + x_flat_f32
        out_ref[...] = (jnp.maximum(preact, 0.0)
                        .reshape(Nb, H, W, Cout).astype(out_ref.dtype))
        if is_last:
            pre_ref[...] = preact.reshape(Nb, H, W, Cout).astype(pre_ref.dtype)

    return kernel


# ----------------------------------------------------------------------------
# One-time parameter preprocessing (host-side, hoisted out of the forward)
# ----------------------------------------------------------------------------
def _shuffle_perm(c, g):
    # channel shuffle: view (g, c//g) -> transpose -> flatten; perm[i] = src idx
    return np.arange(c).reshape(g, c // g).T.reshape(-1)


def _grouped_1x1_to_dense(w, groups):
    # w: (Cout, Cin//groups, 1, 1) PyTorch OIHW  ->  dense (Cin, Cout) block-diag
    # TODO(synk): for realistic groups/channels use per-group matmuls instead
    #             of feeding zero blocks to the MXU.
    w = np.asarray(w)
    cout, cin_g = w.shape[0], w.shape[1]
    cout_g = cout // groups
    cin = cin_g * groups
    dense = np.zeros((cin, cout), np.float32)
    for gi in range(groups):
        blk = w[gi * cout_g:(gi + 1) * cout_g, :, 0, 0]          # (cout_g, cin_g)
        dense[gi * cin_g:(gi + 1) * cin_g, gi * cout_g:(gi + 1) * cout_g] = blk.T
    return dense


def _bn_fold(bn, eps):
    gamma, beta, mean, var = (np.asarray(a) for a in bn)
    scale = gamma / np.sqrt(var + eps)
    shift = beta - mean * scale
    return scale.astype(np.float32), shift.astype(np.float32)


def _pad_last(a, n):
    a = np.asarray(a, np.float32)
    if a.shape[-1] == n:
        return a
    pad = np.zeros(a.shape[:-1] + (n - a.shape[-1],), np.float32)
    return np.concatenate([a, pad], axis=-1)


def prepare_params(params, in_planes, out_planes, groups, eps=1e-5):
    """Fold BN + shuffle into weights once, pad mid channels to 128, upload."""
    mid = out_planes // 4
    g1 = 1 if in_planes == 24 else groups
    cpad = ((mid + 127) // 128) * 128                 # lane-dense mid channels

    w1d = _grouped_1x1_to_dense(params["w1"], g1)     # (Cin, mid)
    s1, b1 = _bn_fold(params["bn1"], eps)
    perm = _shuffle_perm(mid, g1)                     # fold channel shuffle
    w1d, s1, b1 = w1d[:, perm], s1[perm], b1[perm]
    w1d = _pad_last(w1d, cpad)                        # (Cin, cpad), pad cols 0

    w2 = np.asarray(params["w2"])[:, 0, :, :]         # (mid, 3, 3)
    w2 = np.ascontiguousarray(w2.transpose(1, 2, 0)).reshape(9, mid)
    w2 = _pad_last(w2, cpad)                          # (9, cpad)
    s2, b2 = _bn_fold(params["bn2"], eps)

    w3d = _grouped_1x1_to_dense(params["w3"], groups)  # (mid, Cout)
    if cpad != mid:                                    # pad rows with zeros
        w3d = np.concatenate(
            [w3d, np.zeros((cpad - mid, w3d.shape[1]), np.float32)], axis=0)
    s3, b3 = _bn_fold(params["bn3"], eps)

    row = lambda v, n=None: jnp.asarray(
        _pad_last(v, n) if n is not None else np.asarray(v, np.float32),
        jnp.float32).reshape(1, -1)
    return {
        "w1": jnp.asarray(w1d, jnp.bfloat16),
        "s1": row(s1, cpad), "b1": row(b1, cpad),
        "w2": jnp.asarray(w2, jnp.float32),
        "s2": row(s2, cpad), "b2": row(b2, cpad),
        "w3": jnp.asarray(w3d, jnp.bfloat16),
        "s3": row(s3), "b3": row(b3),
    }


def make_params(key, in_planes, out_planes, groups):
    mid = out_planes // 4
    g1 = 1 if in_planes == 24 else groups
    ks = jax.random.split(key, 15)

    def conv_w(k, shape):
        return 0.2 * jax.random.normal(k, shape, jnp.float32)

    def bn_p(k0, k1, k2, k3, c):
        gamma = 1.0 + 0.1 * jax.random.normal(k0, (c,), jnp.float32)
        beta = 0.1 * jax.random.normal(k1, (c,), jnp.float32)
        mean = 0.1 * jax.random.normal(k2, (c,), jnp.float32)
        var = jnp.abs(jax.random.normal(k3, (c,), jnp.float32)) + 0.5
        return (gamma, beta, mean, var)

    return {
        "w1": conv_w(ks[0], (mid, in_planes // g1, 1, 1)),
        "w2": conv_w(ks[1], (mid, 1, 3, 3)),
        "w3": conv_w(ks[2], (out_planes, mid // groups, 1, 1)),
        "bn1": bn_p(ks[3], ks[4], ks[5], ks[6], mid),
        "bn2": bn_p(ks[7], ks[8], ks[9], ks[10], mid),
        "bn3": bn_p(ks[11], ks[12], ks[13], ks[14], out_planes),
    }


# ----------------------------------------------------------------------------
# Batch-tile picker: largest Nb dividing N whose VMEM footprint fits the budget.
# ----------------------------------------------------------------------------
def _pick_block_batch(N, H, W, Cin, Cpad, Cout, is_last, dw_bytes,
                      budget_bytes, min_steps=2, even_steps=False):
    def footprint(nb):
        in_b = 2 * nb * H * W * Cin * 2                     # bf16, double buf
        out_b = 2 * nb * H * W * Cout * 2 * (2 if is_last else 1)
        pad_b = nb * (H + 2) * (W + 2) * Cpad * dw_bytes    # scratch
        tmp_b = nb * H * W * (6 * Cpad + 3 * Cout) * 4      # live intermediates
        return in_b + out_b + pad_b + tmp_b

    cands = [nb for nb in range(1, N + 1)
             if N % nb == 0 and footprint(nb) <= budget_bytes]
    if not cands:
        return 1

    def ok(nb, need_even):
        steps = N // nb
        return steps >= min_steps and (not need_even or steps % 2 == 0)

    for need_even in ((True, False) if even_steps else (False,)):
        pref = [nb for nb in cands if ok(nb, need_even)]
        if pref:
            return max(pref)
    return max(cands)


# ----------------------------------------------------------------------------
# NHWC / bf16 entry point (preferred: chain layers without boundary transposes)
# ----------------------------------------------------------------------------
def bottleneck_forward_nhwc(x_nhwc, prepared, in_planes, out_planes, stride,
                            groups, is_last=False):
    if stride != 1:
        # TODO(synk): stride=2 path (AvgPool2d(3,2,1) shortcut + channel concat)
        raise NotImplementedError("only the stride=1 bottleneck is implemented")

    N, H, W, Cin = x_nhwc.shape
    Cout = out_planes
    Cpad = prepared["w1"].shape[1]
    assert Cin == in_planes and Cin == Cout, \
        "stride=1 bottleneck requires in_planes == out_planes"

    gen = _tpu_generation()
    dw_dtype, vmem_limit, budget, even_steps = _gen_config(gen)
    dw_bytes = 2 if dw_dtype == jnp.bfloat16 else 4
    Nb = _pick_block_batch(N, H, W, Cin, Cpad, Cout, is_last, dw_bytes,
                           budget, even_steps=even_steps)

    x = x_nhwc.astype(jnp.bfloat16)

    full2d = lambda shape: pl.BlockSpec(shape, lambda n: (0, 0))
    act_spec = pl.BlockSpec((Nb, H, W, Cin), lambda n: (n, 0, 0, 0))
    out_spec = pl.BlockSpec((Nb, H, W, Cout), lambda n: (n, 0, 0, 0))

    if is_last:
        out_shape = (jax.ShapeDtypeStruct((N, H, W, Cout), jnp.bfloat16),
                     jax.ShapeDtypeStruct((N, H, W, Cout), jnp.bfloat16))
        out_specs = (out_spec, out_spec)
    else:
        out_shape = jax.ShapeDtypeStruct((N, H, W, Cout), jnp.bfloat16)
        out_specs = out_spec

    return pl.pallas_call(
        _make_kernel(is_last, dw_dtype),
        out_shape=out_shape,
        grid=(N // Nb,),
        in_specs=[
            act_spec,
            full2d((Cin, Cpad)), full2d((1, Cpad)), full2d((1, Cpad)),
            full2d((9, Cpad)), full2d((1, Cpad)), full2d((1, Cpad)),
            full2d((Cpad, Cout)), full2d((1, Cout)), full2d((1, Cout)),
        ],
        out_specs=out_specs,
        scratch_shapes=[pltpu.VMEM((Nb, H + 2, W + 2, Cpad), dw_dtype)],
        compiler_params=pltpu.CompilerParams(
            dimension_semantics=("parallel",),        # batch steps independent
            vmem_limit_bytes=vmem_limit),
    )(x, prepared["w1"], prepared["s1"], prepared["b1"],
      prepared["w2"], prepared["s2"], prepared["b2"],
      prepared["w3"], prepared["s3"], prepared["b3"])


# ----------------------------------------------------------------------------
# PyTorch-compatible adapter (NCHW f32 in / NCHW f32 out)
# ----------------------------------------------------------------------------
def bottleneck_forward(x_nchw, prepared, in_planes, out_planes, stride, groups,
                       is_last=False):
    # TODO(synk): in a full network keep activations bf16 NHWC between layers
    #             (call bottleneck_forward_nhwc directly) to avoid this
    #             boundary transpose/cast round-trip.
    x = jnp.transpose(x_nchw.astype(jnp.bfloat16), (0, 2, 3, 1))
    res = bottleneck_forward_nhwc(x, prepared, in_planes, out_planes, stride,
                                  groups, is_last=is_last)
    if is_last:
        out, pre = res
        return (jnp.transpose(out, (0, 3, 1, 2)).astype(jnp.float32),
                jnp.transpose(pre, (0, 3, 1, 2)).astype(jnp.float32))
    return jnp.transpose(res, (0, 3, 1, 2)).astype(jnp.float32)


# ----------------------------------------------------------------------------
# Pure-JAX reference (mirrors the PyTorch forward, eval-mode BN, f32)
# ----------------------------------------------------------------------------
def reference_forward(x, p, in_planes, out_planes, stride, groups, eps=1e-5):
    g1 = 1 if in_planes == 24 else groups
    mid = out_planes // 4

    def bn(t, prm):
        g, b, m, v = prm
        inv = g / jnp.sqrt(v + eps)
        return t * inv[None, :, None, None] + (b - m * inv)[None, :, None, None]

    def conv(t, w, fg, stride=1, pad=0):
        return lax.conv_general_dilated(
            t, w, (stride, stride), [(pad, pad), (pad, pad)],
            dimension_numbers=("NCHW", "OIHW", "NCHW"),
            feature_group_count=fg, precision=lax.Precision.HIGHEST)

    out = jax.nn.relu(bn(conv(x, p["w1"], g1), p["bn1"]))
    N, C, H, W = out.shape
    out = out.reshape(N, g1, C // g1, H, W).transpose(0, 2, 1, 3, 4).reshape(N, C, H, W)
    out = jax.nn.relu(bn(conv(out, p["w2"], mid, stride=stride, pad=1), p["bn2"]))
    out = bn(conv(out, p["w3"], groups), p["bn3"])
    res = x  # stride == 1 -> identity shortcut
    preact = out + res
    return jax.nn.relu(preact), preact


if __name__ == "__main__":
    # small, shape-consistent config: stride=1 needs in_planes == out_planes
    N, H, W = 8, 8, 8
    in_planes = out_planes = 32
    stride, groups = 1, 4

    key = jax.random.PRNGKey(0)
    kx, kp = jax.random.split(key)
    x = jax.random.normal(kx, (N, in_planes, H, W), jnp.float32)
    params = make_params(kp, in_planes, out_planes, groups)
    prepared = prepare_params(params, in_planes, out_planes, groups)

    ref_out, ref_pre = reference_forward(x, params, in_planes, out_planes,
                                         stride, groups)

    # common path: is_last=False -> single output, no preact HBM traffic
    out = bottleneck_forward(x, prepared, in_planes, out_planes, stride, groups,
                             is_last=False)
    out = jax.block_until_ready(out)
    np.testing.assert_allclose(np.asarray(out), np.asarray(ref_out),
                               rtol=4e-2, atol=4e-2)   # bf16 I/O + MXU vs f32 ref

    # is_last=True path: (relu(preact), preact)
    out2, pre2 = bottleneck_forward(x, prepared, in_planes, out_planes, stride,
                                    groups, is_last=True)
    jax.block_until_ready((out2, pre2))
    np.testing.assert_allclose(np.asarray(out2), np.asarray(ref_out),
                               rtol=4e-2, atol=4e-2)
    np.testing.assert_allclose(np.asarray(pre2), np.asarray(ref_pre),
                               rtol=4e-2, atol=4e-2)

    print("KERNEL_OK")
</pallas_src>

<mosaic_0001>
module attributes {stable_mosaic.version = 11 : i64} {
  func.func @kernel(%arg0: i32, %arg1: memref<4x8x8x32xbf16, #tpu.memory_space<vmem>>, %arg2: memref<32x128xbf16, #tpu.memory_space<vmem>>, %arg3: memref<1x128xf32, #tpu.memory_space<vmem>>, %arg4: memref<1x128xf32, #tpu.memory_space<vmem>>, %arg5: memref<9x128xf32, #tpu.memory_space<vmem>>, %arg6: memref<1x128xf32, #tpu.memory_space<vmem>>, %arg7: memref<1x128xf32, #tpu.memory_space<vmem>>, %arg8: memref<128x32xbf16, #tpu.memory_space<vmem>>, %arg9: memref<1x32xf32, #tpu.memory_space<vmem>>, %arg10: memref<1x32xf32, #tpu.memory_space<vmem>>, %arg11: memref<4x8x8x32xbf16, #tpu.memory_space<vmem>>, %arg12: memref<4x10x10x128xbf16, #tpu.memory_space<vmem>>) attributes {dimension_semantics = [#tpu.dimension_semantics<parallel>], iteration_bounds = array<i64: 2>, scalar_prefetch = 0 : i64, scratch_operands = 1 : i64, tpu.core_type = #tpu.core_type<tc>, window_params = [{transform_indices = @transform_0, window_bounds = array<i64: 4, 8, 8, 32>}, {pipeline_mode = #tpu.pipeline_mode<synchronous>, transform_indices = @transform_1, window_bounds = array<i64: 32, 128>}, {pipeline_mode = #tpu.pipeline_mode<synchronous>, transform_indices = @transform_2, window_bounds = array<i64: 1, 128>}, {pipeline_mode = #tpu.pipeline_mode<synchronous>, transform_indices = @transform_3, window_bounds = array<i64: 1, 128>}, {pipeline_mode = #tpu.pipeline_mode<synchronous>, transform_indices = @transform_4, window_bounds = array<i64: 9, 128>}, {pipeline_mode = #tpu.pipeline_mode<synchronous>, transform_indices = @transform_5, window_bounds = array<i64: 1, 128>}, {pipeline_mode = #tpu.pipeline_mode<synchronous>, transform_indices = @transform_6, window_bounds = array<i64: 1, 128>}, {pipeline_mode = #tpu.pipeline_mode<synchronous>, transform_indices = @transform_7, window_bounds = array<i64: 128, 32>}, {pipeline_mode = #tpu.pipeline_mode<synchronous>, transform_indices = @transform_8, window_bounds = array<i64: 1, 32>}, {pipeline_mode = #tpu.pipeline_mode<synchronous>, transform_indices = @transform_9, window_bounds = array<i64: 1, 32>}, {transform_indices = @transform_10, window_bounds = array<i64: 4, 8, 8, 32>}]} {
    %c0 = arith.constant 0 : index
    %c0_0 = arith.constant 0 : index
    %c0_1 = arith.constant 0 : index
    %c0_2 = arith.constant 0 : index
    %0 = vector.load %arg1[%c0, %c0_0, %c0_1, %c0_2] : memref<4x8x8x32xbf16, #tpu.memory_space<vmem>>, vector<4x8x8x32xbf16>
    %1 = vector.shape_cast %0 : vector<4x8x8x32xbf16> to vector<256x32xbf16>
    %2 = arith.extf %1 : vector<256x32xbf16> to vector<256x32xf32>
    %3 = vector.shape_cast %0 : vector<4x8x8x32xbf16> to vector<256x32xbf16>
    %c0_3 = arith.constant 0 : index
    %c0_4 = arith.constant 0 : index
    %4 = vector.load %arg2[%c0_3, %c0_4] : memref<32x128xbf16, #tpu.memory_space<vmem>>, vector<32x128xbf16>
    %cst = arith.constant dense<0.000000e+00> : vector<256x128xf32>
    %5 = tpu.matmul %3, %4, %cst {dimension_numbers = #tpu.dot_dimension_numbers<[1], [0], [0], [1], [0, 0, 1, 1], [], []>} : vector<256x32xbf16>, vector<32x128xbf16>, vector<256x128xf32> -> vector<256x128xf32>
    %c0_5 = arith.constant 0 : index
    %c0_6 = arith.constant 0 : index
    %6 = vector.load %arg3[%c0_5, %c0_6] : memref<1x128xf32, #tpu.memory_space<vmem>>, vector<1x128xf32>
    %7 = vector.shape_cast %6 : vector<1x128xf32> to vector<128xf32>
    %8 = vector.shape_cast %7 : vector<128xf32> to vector<1x128xf32>
    %9 = vector.broadcast %8 : vector<1x128xf32> to vector<256x128xf32>
    %10 = arith.mulf %5, %9 : vector<256x128xf32>
    %c0_7 = arith.constant 0 : index
    %c0_8 = arith.constant 0 : index
    %11 = vector.load %arg4[%c0_7, %c0_8] : memref<1x128xf32, #tpu.memory_space<vmem>>, vector<1x128xf32>
    %12 = vector.shape_cast %11 : vector<1x128xf32> to vector<128xf32>
    %13 = vector.shape_cast %12 : vector<128xf32> to vector<1x128xf32>
    %14 = vector.broadcast %13 : vector<1x128xf32> to vector<256x128xf32>
    %15 = arith.addf %10, %14 : vector<256x128xf32>
    %cst_9 = arith.constant 0.000000e+00 : f32
    %16 = vector.broadcast %cst_9 : f32 to vector<256x128xf32>
    %17 = arith.maximumf %15, %16 : vector<256x128xf32>
    %18 = vector.shape_cast %17 : vector<256x128xf32> to vector<4x8x8x128xf32>
    %19 = arith.truncf %18 : vector<4x8x8x128xf32> to vector<4x8x8x128xbf16>
    %cst_10 = arith.constant 0.000000e+00 : bf16
    %20 = vector.broadcast %cst_10 : bf16 to vector<4x1x8x128xbf16>
    %cst_11 = arith.constant 0.000000e+00 : bf16
    %21 = vector.broadcast %cst_11 : bf16 to vector<4x10x1x128xbf16>
    %22 = tpu.concatenate %20, %19, %20 in 1 : vector<4x1x8x128xbf16>, vector<4x8x8x128xbf16>, vector<4x1x8x128xbf16> -> vector<4x10x8x128xbf16>
    %c0_12 = arith.constant 0 : index
    %c0_13 = arith.constant 0 : index
    %c1 = arith.constant 1 : index
    %c0_14 = arith.constant 0 : index
    %23 = vector.load %arg12[%c0_12, %c0_13, %c1, %c0_14] : memref<4x10x10x128xbf16, #tpu.memory_space<vmem>>, vector<4x10x8x128xbf16>
    tpu.vector_store %arg12[%c0_12, %c0_13, %c1, %c0_14], %22 {strides = array<i32>} : memref<4x10x10x128xbf16, #tpu.memory_space<vmem>>, vector<4x10x8x128xbf16>,
    %c0_15 = arith.constant 0 : index
    %c0_16 = arith.constant 0 : index
    %c0_17 = arith.constant 0 : index
    %c0_18 = arith.constant 0 : index
    %24 = vector.load %arg12[%c0_15, %c0_16, %c0_17, %c0_18] : memref<4x10x10x128xbf16, #tpu.memory_space<vmem>>, vector<4x10x1x128xbf16>
    tpu.vector_store %arg12[%c0_15, %c0_16, %c0_17, %c0_18], %21 {strides = array<i32>} : memref<4x10x10x128xbf16, #tpu.memory_space<vmem>>, vector<4x10x1x128xbf16>,
    %c0_19 = arith.constant 0 : index
    %c0_20 = arith.constant 0 : index
    %c9 = arith.constant 9 : index
    %c0_21 = arith.constant 0 : index
    %25 = vector.load %arg12[%c0_19, %c0_20, %c9, %c0_21] : memref<4x10x10x128xbf16, #tpu.memory_space<vmem>>, vector<4x10x1x128xbf16>
    tpu.vector_store %arg12[%c0_19, %c0_20, %c9, %c0_21], %21 {strides = array<i32>} : memref<4x10x10x128xbf16, #tpu.memory_space<vmem>>, vector<4x10x1x128xbf16>,
    %c0_22 = arith.constant 0 : index
    %c0_23 = arith.constant 0 : index
    %26 = vector.load %arg5[%c0_22, %c0_23] : memref<9x128xf32, #tpu.memory_space<vmem>>, vector<9x128xf32>
    %27 = arith.truncf %26 : vector<9x128xf32> to vector<9x128xbf16>
    %c0_24 = arith.constant 0 : index
    %c0_25 = arith.constant 0 : index
    %c0_26 = arith.constant 0 : index
    %c0_27 = arith.constant 0 : index
    %28 = vector.load %arg12[%c0_24, %c0_25, %c0_26, %c0_27] : memref<4x10x10x128xbf16, #tpu.memory_space<vmem>>, vector<4x8x8x128xbf16>
    %29 = vector.extract_strided_slice %27 {offsets = [0, 0], sizes = [1, 128], strides = [1, 1]} : vector<9x128xbf16> to vector<1x128xbf16>
    %30 = vector.shape_cast %29 : vector<1x128xbf16> to vector<128xbf16>
    %31 = vector.shape_cast %30 : vector<128xbf16> to vector<1x1x1x128xbf16>
    %32 = vector.broadcast %31 : vector<1x1x1x128xbf16> to vector<4x8x8x128xbf16>
    %33 = arith.mulf %28, %32 : vector<4x8x8x128xbf16>
    %c0_28 = arith.constant 0 : index
    %c0_29 = arith.constant 0 : index
    %c1_30 = arith.constant 1 : index
    %c0_31 = arith.constant 0 : index
    %34 = vector.load %arg12[%c0_28, %c0_29, %c1_30, %c0_31] : memref<4x10x10x128xbf16, #tpu.memory_space<vmem>>, vector<4x8x8x128xbf16>
    %35 = vector.extract_strided_slice %27 {offsets = [1, 0], sizes = [1, 128], strides = [1, 1]} : vector<9x128xbf16> to vector<1x128xbf16>
    %36 = vector.shape_cast %35 : vector<1x128xbf16> to vector<128xbf16>
    %37 = vector.shape_cast %36 : vector<128xbf16> to vector<1x1x1x128xbf16>
    %38 = vector.broadcast %37 : vector<1x1x1x128xbf16> to vector<4x8x8x128xbf16>
    %39 = arith.mulf %34, %38 : vector<4x8x8x128xbf16>
    %40 = arith.addf %33, %39 : vector<4x8x8x128xbf16>
    %c0_32 = arith.constant 0 : index
    %c0_33 = arith.constant 0 : index
    %c2 = arith.constant 2 : index
    %c0_34 = arith.constant 0 : index
    %41 = vector.load %arg12[%c0_32, %c0_33, %c2, %c0_34] : memref<4x10x10x128xbf16, #tpu.memory_space<vmem>>, vector<4x8x8x128xbf16>
    %42 = vector.extract_strided_slice %27 {offsets = [2, 0], sizes = [1, 128], strides = [1, 1]} : vector<9x128xbf16> to vector<1x128xbf16>
    %43 = vector.shape_cast %42 : vector<1x128xbf16> to vector<128xbf16>
    %44 = vector.shape_cast %43 : vector<128xbf16> to vector<1x1x1x128xbf16>
    %45 = vector.broadcast %44 : vector<1x1x1x128xbf16> to vector<4x8x8x128xbf16>
    %46 = arith.mulf %41, %45 : vector<4x8x8x128xbf16>
    %47 = arith.addf %40, %46 : vector<4x8x8x128xbf16>
    %c0_35 = arith.constant 0 : index
    %c1_36 = arith.constant 1 : index
    %c0_37 = arith.constant 0 : index
    %c0_38 = arith.constant 0 : index
    %48 = vector.load %arg12[%c0_35, %c1_36, %c0_37, %c0_38] : memref<4x10x10x128xbf16, #tpu.memory_space<vmem>>, vector<4x8x8x128xbf16>
    %49 = vector.extract_strided_slice %27 {offsets = [3, 0], sizes = [1, 128], strides = [1, 1]} : vector<9x128xbf16> to vector<1x128xbf16>
    %50 = vector.shape_cast %49 : vector<1x128xbf16> to vector<128xbf16>
    %51 = vector.shape_cast %50 : vector<128xbf16> to vector<1x1x1x128xbf16>
    %52 = vector.broadcast %51 : vector<1x1x1x128xbf16> to vector<4x8x8x128xbf16>
    %53 = arith.mulf %48, %52 : vector<4x8x8x128xbf16>
    %54 = arith.addf %47, %53 : vector<4x8x8x128xbf16>
    %c0_39 = arith.constant 0 : index
    %c1_40 = arith.constant 1 : index
    %c1_41 = arith.constant 1 : index
    %c0_42 = arith.constant 0 : index
    %55 = vector.load %arg12[%c0_39, %c1_40, %c1_41, %c0_42] : memref<4x10x10x128xbf16, #tpu.memory_space<vmem>>, vector<4x8x8x128xbf16>
    %56 = vector.extract_strided_slice %27 {offsets = [4, 0], sizes = [1, 128], strides = [1, 1]} : vector<9x128xbf16> to vector<1x128xbf16>
    %57 = vector.shape_cast %56 : vector<1x128xbf16> to vector<128xbf16>
    %58 = vector.shape_cast %57 : vector<128xbf16> to vector<1x1x1x128xbf16>
    %59 = vector.broadcast %58 : vector<1x1x1x128xbf16> to vector<4x8x8x128xbf16>
    %60 = arith.mulf %55, %59 : vector<4x8x8x128xbf16>
    %61 = arith.addf %54, %60 : vector<4x8x8x128xbf16>
    %c0_43 = arith.constant 0 : index
    %c1_44 = arith.constant 1 : index
    %c2_45 = arith.constant 2 : index
    %c0_46 = arith.constant 0 : index
    %62 = vector.load %arg12[%c0_43, %c1_44, %c2_45, %c0_46] : memref<4x10x10x128xbf16, #tpu.memory_space<vmem>>, vector<4x8x8x128xbf16>
    %63 = vector.extract_strided_slice %27 {offsets = [5, 0], sizes = [1, 128], strides = [1, 1]} : vector<9x128xbf16> to vector<1x128xbf16>
    %64 = vector.shape_cast %63 : vector<1x128xbf16> to vector<128xbf16>
    %65 = vector.shape_cast %64 : vector<128xbf16> to vector<1x1x1x128xbf16>
    %66 = vector.broadcast %65 : vector<1x1x1x128xbf16> to vector<4x8x8x128xbf16>
    %67 = arith.mulf %62, %66 : vector<4x8x8x128xbf16>
    %68 = arith.addf %61, %67 : vector<4x8x8x128xbf16>
    %c0_47 = arith.constant 0 : index
    %c2_48 = arith.constant 2 : index
    %c0_49 = arith.constant 0 : index
    %c0_50 = arith.constant 0 : index
    %69 = vector.load %arg12[%c0_47, %c2_48, %c0_49, %c0_50] : memref<4x10x10x128xbf16, #tpu.memory_space<vmem>>, vector<4x8x8x128xbf16>
    %70 = vector.extract_strided_slice %27 {offsets = [6, 0], sizes = [1, 128], strides = [1, 1]} : vector<9x128xbf16> to vector<1x128xbf16>
    %71 = vector.shape_cast %70 : vector<1x128xbf16> to vector<128xbf16>
    %72 = vector.shape_cast %71 : vector<128xbf16> to vector<1x1x1x128xbf16>
    %73 = vector.broadcast %72 : vector<1x1x1x128xbf16> to vector<4x8x8x128xbf16>
    %74 = arith.mulf %69, %73 : vector<4x8x8x128xbf16>
    %75 = arith.addf %68, %74 : vector<4x8x8x128xbf16>
    %c0_51 = arith.constant 0 : index
    %c2_52 = arith.constant 2 : index
    %c1_53 = arith.constant 1 : index
    %c0_54 = arith.constant 0 : index
    %76 = vector.load %arg12[%c0_51, %c2_52, %c1_53, %c0_54] : memref<4x10x10x128xbf16, #tpu.memory_space<vmem>>, vector<4x8x8x128xbf16>
    %77 = vector.extract_strided_slice %27 {offsets = [7, 0], sizes = [1, 128], strides = [1, 1]} : vector<9x128xbf16> to vector<1x128xbf16>
    %78 = vector.shape_cast %77 : vector<1x128xbf16> to vector<128xbf16>
    %79 = vector.shape_cast %78 : vector<128xbf16> to vector<1x1x1x128xbf16>
    %80 = vector.broadcast %79 : vector<1x1x1x128xbf16> to vector<4x8x8x128xbf16>
    %81 = arith.mulf %76, %80 : vector<4x8x8x128xbf16>
    %82 = arith.addf %75, %81 : vector<4x8x8x128xbf16>
    %c0_55 = arith.constant 0 : index
    %c2_56 = arith.constant 2 : index
    %c2_57 = arith.constant 2 : index
    %c0_58 = arith.constant 0 : index
    %83 = vector.load %arg12[%c0_55, %c2_56, %c2_57, %c0_58] : memref<4x10x10x128xbf16, #tpu.memory_space<vmem>>, vector<4x8x8x128xbf16>
    %84 = vector.extract_strided_slice %27 {offsets = [8, 0], sizes = [1, 128], strides = [1, 1]} : vector<9x128xbf16> to vector<1x128xbf16>
    %85 = vector.shape_cast %84 : vector<1x128xbf16> to vector<128xbf16>
    %86 = vector.shape_cast %85 : vector<128xbf16> to vector<1x1x1x128xbf16>
    %87 = vector.broadcast %86 : vector<1x1x1x128xbf16> to vector<4x8x8x128xbf16>
    %88 = arith.mulf %83, %87 : vector<4x8x8x128xbf16>
    %89 = arith.addf %82, %88 : vector<4x8x8x128xbf16>
    %90 = arith.extf %89 : vector<4x8x8x128xbf16> to vector<4x8x8x128xf32>
    %91 = vector.shape_cast %90 : vector<4x8x8x128xf32> to vector<256x128xf32>
    %c0_59 = arith.constant 0 : index
    %c0_60 = arith.constant 0 : index
    %92 = vector.load %arg6[%c0_59, %c0_60] : memref<1x128xf32, #tpu.memory_space<vmem>>, vector<1x128xf32>
    %93 = vector.shape_cast %92 : vector<1x128xf32> to vector<128xf32>
    %94 = vector.shape_cast %93 : vector<128xf32> to vector<1x128xf32>
    %95 = vector.broadcast %94 : vector<1x128xf32> to vector<256x128xf32>
    %96 = arith.mulf %91, %95 : vector<256x128xf32>
    %c0_61 = arith.constant 0 : index
    %c0_62 = arith.constant 0 : index
    %97 = vector.load %arg7[%c0_61, %c0_62] : memref<1x128xf32, #tpu.memory_space<vmem>>, vector<1x128xf32>
    %98 = vector.shape_cast %97 : vector<1x128xf32> to vector<128xf32>
    %99 = vector.shape_cast %98 : vector<128xf32> to vector<1x128xf32>
    %100 = vector.broadcast %99 : vector<1x128xf32> to vector<256x128xf32>
    %101 = arith.addf %96, %100 : vector<256x128xf32>
    %cst_63 = arith.constant 0.000000e+00 : f32
    %102 = vector.broadcast %cst_63 : f32 to vector<256x128xf32>
    %103 = arith.maximumf %101, %102 : vector<256x128xf32>
    %104 = arith.truncf %103 : vector<256x128xf32> to vector<256x128xbf16>
    %c0_64 = arith.constant 0 : index
    %c0_65 = arith.constant 0 : index
    %105 = vector.load %arg8[%c0_64, %c0_65] : memref<128x32xbf16, #tpu.memory_space<vmem>>, vector<128x32xbf16>
    %cst_66 = arith.constant dense<0.000000e+00> : vector<256x32xf32>
    %106 = tpu.matmul %104, %105, %cst_66 {dimension_numbers = #tpu.dot_dimension_numbers<[1], [0], [0], [1], [0, 0, 1, 1], [], []>} : vector<256x128xbf16>, vector<128x32xbf16>, vector<256x32xf32> -> vector<256x32xf32>
    %c0_67 = arith.constant 0 : index
    %c0_68 = arith.constant 0 : index
    %107 = vector.load %arg9[%c0_67, %c0_68] : memref<1x32xf32, #tpu.memory_space<vmem>>, vector<1x32xf32>
    %108 = vector.shape_cast %107 : vector<1x32xf32> to vector<32xf32>
    %109 = vector.shape_cast %108 : vector<32xf32> to vector<1x32xf32>
    %110 = vector.broadcast %109 : vector<1x32xf32> to vector<256x32xf32>
    %111 = arith.mulf %106, %110 : vector<256x32xf32>
    %c0_69 = arith.constant 0 : index
    %c0_70 = arith.constant 0 : index
    %112 = vector.load %arg10[%c0_69, %c0_70] : memref<1x32xf32, #tpu.memory_space<vmem>>, vector<1x32xf32>
    %113 = vector.shape_cast %112 : vector<1x32xf32> to vector<32xf32>
    %114 = vector.shape_cast %113 : vector<32xf32> to vector<1x32xf32>
    %115 = vector.broadcast %114 : vector<1x32xf32> to vector<256x32xf32>
    %116 = arith.addf %111, %115 : vector<256x32xf32>
    %117 = arith.addf %116, %2 : vector<256x32xf32>
    %cst_71 = arith.constant 0.000000e+00 : f32
    %118 = vector.broadcast %cst_71 : f32 to vector<256x32xf32>
    %119 = arith.maximumf %117, %118 : vector<256x32xf32>
    %120 = vector.shape_cast %119 : vector<256x32xf32> to vector<4x8x8x32xf32>
    %121 = arith.truncf %120 : vector<4x8x8x32xf32> to vector<4x8x8x32xbf16>
    %c0_72 = arith.constant 0 : index
    %c0_73 = arith.constant 0 : index
    %c0_74 = arith.constant 0 : index
    %c0_75 = arith.constant 0 : index
    %122 = vector.load %arg11[%c0_72, %c0_73, %c0_74, %c0_75] : memref<4x8x8x32xbf16, #tpu.memory_space<vmem>>, vector<4x8x8x32xbf16>
    tpu.vector_store %arg11[%c0_72, %c0_73, %c0_74, %c0_75], %121 {strides = array<i32>} : memref<4x8x8x32xbf16, #tpu.memory_space<vmem>>, vector<4x8x8x32xbf16>,
    return
  }
  func.func @transform_0(%arg0: i32) -> (i32, i32, i32, i32) {
    %c0_i32 = arith.constant 0 : i32
    %c0_i32_0 = arith.constant 0 : i32
    %c0_i32_1 = arith.constant 0 : i32
    %c0_i32_2 = arith.constant 0 : i32
    return %arg0, %c0_i32, %c0_i32_0, %c0_i32_1 : i32, i32, i32, i32
  }
  func.func @transform_1(%arg0: i32) -> (i32, i32) {
    %c0_i32 = arith.constant 0 : i32
    %c0_i32_0 = arith.constant 0 : i32
    %c0_i32_1 = arith.constant 0 : i32
    return %c0_i32, %c0_i32_0 : i32, i32
  }
  func.func @transform_2(%arg0: i32) -> (i32, i32) {
    %c0_i32 = arith.constant 0 : i32
    %c0_i32_0 = arith.constant 0 : i32
    %c0_i32_1 = arith.constant 0 : i32
    return %c0_i32, %c0_i32_0 : i32, i32
  }
  func.func @transform_3(%arg0: i32) -> (i32, i32) {
    %c0_i32 = arith.constant 0 : i32
    %c0_i32_0 = arith.constant 0 : i32
    %c0_i32_1 = arith.constant 0 : i32
    return %c0_i32, %c0_i32_0 : i32, i32
  }
  func.func @transform_4(%arg0: i32) -> (i32, i32) {
    %c0_i32 = arith.constant 0 : i32
    %c0_i32_0 = arith.constant 0 : i32
    %c0_i32_1 = arith.constant 0 : i32
    return %c0_i32, %c0_i32_0 : i32, i32
  }
  func.func @transform_5(%arg0: i32) -> (i32, i32) {
    %c0_i32 = arith.constant 0 : i32
    %c0_i32_0 = arith.constant 0 : i32
    %c0_i32_1 = arith.constant 0 : i32
    return %c0_i32, %c0_i32_0 : i32, i32
  }
  func.func @transform_6(%arg0: i32) -> (i32, i32) {
    %c0_i32 = arith.constant 0 : i32
    %c0_i32_0 = arith.constant 0 : i32
    %c0_i32_1 = arith.constant 0 : i32
    return %c0_i32, %c0_i32_0 : i32, i32
  }
  func.func @transform_7(%arg0: i32) -> (i32, i32) {
    %c0_i32 = arith.constant 0 : i32
    %c0_i32_0 = arith.constant 0 : i32
    %c0_i32_1 = arith.constant 0 : i32
    return %c0_i32, %c0_i32_0 : i32, i32
  }
  func.func @transform_8(%arg0: i32) -> (i32, i32) {
    %c0_i32 = arith.constant 0 : i32
    %c0_i32_0 = arith.constant 0 : i32
    %c0_i32_1 = arith.constant 0 : i32
    return %c0_i32, %c0_i32_0 : i32, i32
  }
  func.func @transform_9(%arg0: i32) -> (i32, i32) {
    %c0_i32 = arith.constant 0 : i32
    %c0_i32_0 = arith.constant 0 : i32
    %c0_i32_1 = arith.constant 0 : i32
    return %c0_i32, %c0_i32_0 : i32, i32
  }
  func.func @transform_10(%arg0: i32) -> (i32, i32, i32, i32) {
    %c0_i32 = arith.constant 0 : i32
    %c0_i32_0 = arith.constant 0 : i32
    %c0_i32_1 = arith.constant 0 : i32
    %c0_i32_2 = arith.constant 0 : i32
    return %arg0, %c0_i32, %c0_i32_0, %c0_i32_1 : i32, i32, i32, i32
  }
}

</mosaic_0001>

<bundles_post_ra>
// kernel: tpu_custom_call.1
= control target key start
LH: loop header
LB: loop body
LE: loop exit
PB: predicated region body
PF: predicated region fallthrough
CT: control target
= control target key end

     0   :  { %s9377_s0 = inlined_call_operand.hbm [shape: bf16[8,8,8,32], index: 0, kind: input, shape index: {}]   ;;  %s9378_s1 = inlined_call_operand.hbm [shape: bf16[32,128], index: 1, kind: input, shape index: {}]   ;;  %s9379_s2 = inlined_call_operand.hbm [shape: f32[1,128], index: 2, kind: input, shape index: {}]   ;;  %s9380_s3 = inlined_call_operand.hbm [shape: f32[1,128], index: 3, kind: input, shape index: {}]   ;;  %s9381_s4 = inlined_call_operand.hbm [shape: f32[9,128], index: 4, kind: input, shape index: {}]   ;;  %s9382_s5 = inlined_call_operand.hbm [shape: f32[1,128], index: 5, kind: input, shape index: {}]   ;;  %s9383_s6 = inlined_call_operand.hbm [shape: f32[1,128], index: 6, kind: input, shape index: {}]   ;;  %s9384_s7 = inlined_call_operand.hbm [shape: bf16[128,32], index: 7, kind: input, shape index: {}]   ;;  %s9385_s8 = inlined_call_operand.hbm [shape: f32[1,32], index: 8, kind: input, shape index: {}]   ;;  %s9386_s9 = inlined_call_operand.hbm [shape: f32[1,32], index: 9, kind: input, shape index: {}]   ;;  %s9387_s10 = inlined_call_operand.hbm [shape: bf16[8,8,8,32], index: 10, kind: output, shape index: {}]  }
   0x1   :  { %9396 = sst [smem:[#allocation31_spill]] %s9378_s1 }
   0x2   :  { %9397 = sst [smem:[#allocation32_spill]] %s9387_s10 }
   0x3   :  { %15 = vsyncpa [#allocation4], 0 }
   0x4   :  { %17 = vsyncpa [#allocation4 + $0x1], 0 }
   0x5   :  { %18 = vsyncpa [#allocation7], 0 }
   0x6   :  { %19 = vsyncpa [#allocation10], 0 }
   0x7   :  { %20 = vsyncpa [#allocation13], 0 }
   0x8   :  { %21 = vsyncpa [#allocation16], 0 }
   0x9   :  { %22 = vsyncpa [#allocation19], 0 }
   0xa   :  { %23 = vsyncpa [#allocation5], 0 }
   0xb   :  { %25 = vsyncpa [#allocation5 + $0x1], 0  ;;  %s6953_s13 = smov 0   ;;  %s6955_s14 = smov 0  }
   0xc   :  { %s6957_s15 = smov 0   ;;  %s6959_s16 = smov 0  }
   0xd LB: > { %s6880_s17 = smov [#allocation6]   ;;  %s6974_s19 = sadd.s32 4294967295, %s6878_s16   ;;  %s6878_s16 = sphi %s6959_s16, %s9446_s16   ;;  %s6874_s15 = sphi %s6957_s15, %s9445_s15   ;;  %s6870_s14 = sphi %s6955_s14, %s9444_s14   ;;  %s6866_s13 = sphi %s6953_s13, %s9443_s13  }
   0xe   : > { %s289_s18 = sshll.u32 %s6880_s17, 4  ;;  %p5907_p0 = scmp.ge.s32.totalorder %s6878_s16, 1  ;;  %s6979_s18 = int_to_ptr.vmem [resolvable:$true] %s289_s18 }
   0xf   : > { %p9392_p1 = scmp.eq.s32.totalorder %s6974_s19, 0  ;;  %p277_p2 = scmp.lt.s32.totalorder %s6878_s16, 3 }
  0x10   : > { %s6881_s21 = smov [#allocation9]   ;;  %s6882_s24 = smov [#allocation12]  }
  0x11   : > { %p6981_p3 = pnand %p5907_p0, %p277_p2  ;;  %s314_s22 = sshll.u32 %s6881_s21, 4  ;;  %s6994_s22 = int_to_ptr.vmem [resolvable:$true] %s314_s22 }
  0x12   : > { %s338_s25 = sshll.u32 %s6882_s24, 4  ;;  %s9401_s1 = sld [smem:[#allocation31_spill]]  ;;  %s6996_s25 = int_to_ptr.vmem [resolvable:$true] %s338_s25 }
  0x13   : > { %s9398_s20 = scalar_select %p6981_p3, 1, 0 }
  0x14   : > { %p6341_p5 = pneg %p6981_p3 }
  0x15   : > { %9399 = sst [smem:[#allocation28_spill]] %s9398_s20 }
  0x16   : > { %p6990_p6 = pnand %p6341_p5, %p9392_p1 }
  0x18   : > { %s6510_s28 = scalar_lea.hbm %s9401_s1, 256  ;;  %p7006_p8 = pneg %p6990_p6 }
  0x19   : > { %p6511_p7 = scmp.ne.s32.totalorder %s9401_s1, %s6510_s28  ;;  %p6517_p11 = scmp.lt.u32.totalorder %s6510_s28, %s9401_s1 }
  0x1b   : > { %p6513_p9 = pnand %p7006_p8, %p6511_p7 }
  0x1d   : > { %p6514_p10 = pneg %p6513_p9 }
  0x1f   : > { %p6519_p12 = pnand %p6517_p11, %p6514_p10 }
  0x21   : > { %6522 = shalt.err (!%p6519_p12)
}
  0x22   : > { %s6523_s21 = scalar_lea.vmem %s6979_s18, 256  ;;  %p6531_p5 = scmp.lt.s32.totalorder %s6979_s18, %s6979_s18 }
  0x23   : > { %p6524_p13 = scmp.ne.s32.totalorder %s6979_s18, %s6523_s21  ;;  %p6532_p4 = scmp.lt.s32.totalorder %s6523_s21, %s6523_s21 }
  0x25   : > { %p6526_p0 = pnand %p6524_p13, %p7006_p8  ;;  %p6533_p7 = por %p6532_p4, %p6531_p5 }
  0x27   : > { %p6527_p2 = pneg %p6526_p0 }
  0x29   : > { %p6534_p9 = pnand %p6533_p7, %p6527_p2 }
  0x2b   : > { %6537 = shalt.err (!%p6534_p9)
}
  0x2c   : > { %s9390_s24 = smov 64   ;;  %s9394_s26 = smov 4  }
  0x2d   : > { %6344 = dma.hbm_to_vmem [thread:$0]  (!%p6990_p6), %s9401_s1, 256, %s6979_s18, [#allocation7], %s9390_s24, %s9390_s24, %s9394_s26  }
  0x2e   : > { %s6538_s12 = scalar_lea.hbm %s9380_s3, 16 }
  0x2f   : > { %p6539_p4 = scmp.ne.s32.totalorder %s9380_s3, %s6538_s12  ;;  %p6545_p12 = scmp.lt.u32.totalorder %s6538_s12, %s9380_s3 }
  0x31   : > { %p6541_p10 = pnand %p6539_p4, %p7006_p8 }
  0x33   : > { %p6542_p11 = pneg %p6541_p10 }
  0x35   : > { %p6547_p13 = pnand %p6545_p12, %p6542_p11 }
  0x37   : > { %6550 = shalt.err (!%p6547_p13)
}
  0x38   : > { %s6551_s18 = scalar_lea.vmem %s6994_s22, 16  ;;  %s6558_s27 = scalar_lea.vmem %s6994_s22, 32 }
  0x39   : > { %p6552_p0 = scmp.ne.s32.totalorder %s6994_s22, %s6551_s18  ;;  %p6559_p7 = scmp.lt.s32.totalorder %s6994_s22, %s6994_s22 }
  0x3a   : > { %p6560_p9 = scmp.lt.s32.totalorder %s6558_s27, %s6551_s18 }
  0x3b   : > { %p6554_p2 = pnand %p6552_p0, %p7006_p8 }
  0x3c   : > { %p6561_p4 = por %p6560_p9, %p6559_p7 }
  0x3d   : > { %p6555_p5 = pneg %p6554_p2 }
  0x3f   : > { %p6562_p10 = pnand %p6561_p4, %p6555_p5 }
  0x41   : > { %6565 = shalt.err (!%p6562_p10)
}
  0x42   : > { %6350 = dma.hbm_to_vmem [thread:$0]  (!%p6990_p6), %s9380_s3, 16, %s6994_s22, [#allocation10]  }
  0x43   : > { %s6566_s30 = scalar_lea.hbm %s9382_s5, 16 }
  0x44   : > { %p6567_p11 = scmp.ne.s32.totalorder %s9382_s5, %s6566_s30  ;;  %p6573_p0 = scmp.lt.u32.totalorder %s6566_s30, %s9382_s5 }
  0x46   : > { %p6569_p12 = pnand %p6567_p11, %p7006_p8 }
  0x48   : > { %p6570_p13 = pneg %p6569_p12 }
  0x4a   : > { %p6575_p2 = pnand %p6573_p0, %p6570_p13 }
  0x4c   : > { %6578 = shalt.err (!%p6575_p2)
}
  0x4d   : > { %s6579_s22 = scalar_lea.vmem %s6996_s25, 16  ;;  %s6586_s27 = scalar_lea.vmem %s6996_s25, 32 }
  0x4e   : > { %p6580_p5 = scmp.ne.s32.totalorder %s6996_s25, %s6579_s22  ;;  %p6587_p4 = scmp.lt.s32.totalorder %s6996_s25, %s6996_s25 }
  0x4f   : > { %p6588_p10 = scmp.lt.s32.totalorder %s6586_s27, %s6579_s22 }
  0x50   : > { %p6582_p7 = pnand %p6580_p5, %p7006_p8 }
  0x51   : > { %p6589_p11 = por %p6588_p10, %p6587_p4 }
  0x52   : > { %p6583_p9 = pneg %p6582_p7 }
  0x54   : > { %p6590_p12 = pnand %p6589_p11, %p6583_p9 }
  0x56   : > { %6593 = shalt.err (!%p6590_p12)
}
  0x57   : > { %6356 = dma.hbm_to_vmem [thread:$0]  (!%p6990_p6), %s9382_s5, 16, %s6996_s25, [#allocation13]  }
  0x58   : > { %s6885_s28 = smov [#allocation15]   ;;  %s6886_s30 = smov [#allocation8]  }
  0x59   : > { %s359_s29 = sshll.u32 %s6885_s28, 4  ;;  %s303_s12 = sshll.u32 %s6886_s30, 4  ;;  %s360_s29 = int_to_ptr.vmem [resolvable:$true] %s359_s29  ;;  %s304_s12 = int_to_ptr.vmem [resolvable:$true] %s303_s12 }
  0x5a   : > { %s6594_s18 = scalar_lea.hbm %s9384_s7, 1024 }
  0x5b   : > { %p6595_p13 = scmp.ne.s32.totalorder %s9384_s7, %s6594_s18  ;;  %p6601_p5 = scmp.lt.u32.totalorder %s6594_s18, %s9384_s7 }
  0x5d   : > { %p6597_p0 = pnand %p6595_p13, %p7006_p8 }
  0x5f   : > { %p6598_p2 = pneg %p6597_p0 }
  0x61   : > { %p6603_p7 = pnand %p6601_p5, %p6598_p2 }
  0x63   : > { %6606 = shalt.err (!%p6603_p7)
}
  0x64   : > { %s6607_s25 = scalar_lea.vmem %s360_s29, 1024  ;;  %p6615_p11 = scmp.lt.s32.totalorder %s360_s29, %s360_s29 }
  0x65   : > { %p6608_p9 = scmp.ne.s32.totalorder %s360_s29, %s6607_s25  ;;  %p6616_p12 = scmp.lt.s32.totalorder %s6607_s25, %s6607_s25 }
  0x67   : > { %p6610_p4 = pnand %p6608_p9, %p7006_p8  ;;  %p6617_p1 = por %p6616_p12, %p6615_p11 }
  0x69   : > { %p6611_p10 = pneg %p6610_p4 }
  0x6b   : > { %p6618_p3 = pnand %p6617_p1, %p6611_p10 }
  0x6d   : > { %6621 = shalt.err (!%p6618_p3)
}
  0x6e   : > { %s9403_s20 = smov 64   ;;  %s6622_s21 = scalar_lea.hbm %s9379_s2, 16 }
  0x6f   : > { %6362 = dma.hbm_to_vmem [thread:$0]  (!%p6990_p6), %s9384_s7, 1024, %s360_s29, [#allocation16], %s9403_s20, %s9403_s20, %s9394_s26  }
  0x70   : > { %p6623_p1 = scmp.ne.s32.totalorder %s9379_s2, %s6622_s21  ;;  %p6629_p0 = scmp.lt.u32.totalorder %s6622_s21, %s9379_s2 }
  0x72   : > { %p6625_p3 = pnand %p6623_p1, %p7006_p8 }
  0x74   : > { %p6626_p13 = pneg %p6625_p3 }
  0x76   : > { %p6631_p2 = pnand %p6629_p0, %p6626_p13 }
  0x78   : > { %6634 = shalt.err (!%p6631_p2)
}
  0x79   : > { %s6635_s25 = scalar_lea.vmem %s304_s12, 16  ;;  %s6642_s29 = scalar_lea.vmem %s304_s12, 32 }
  0x7a   : > { %p6636_p5 = scmp.ne.s32.totalorder %s304_s12, %s6635_s25  ;;  %p6643_p4 = scmp.lt.s32.totalorder %s304_s12, %s304_s12 }
  0x7b   : > { %p6644_p10 = scmp.lt.s32.totalorder %s6642_s29, %s6635_s25 }
  0x7c   : > { %p6638_p7 = pnand %p6636_p5, %p7006_p8 }
  0x7d   : > { %p6645_p11 = por %p6644_p10, %p6643_p4 }
  0x7e   : > { %p6639_p9 = pneg %p6638_p7 }
  0x80   : > { %p6646_p12 = pnand %p6645_p11, %p6639_p9 }
  0x82   : > { %6649 = shalt.err (!%p6646_p12)
}
  0x83   : > { %6347 = dma.hbm_to_vmem [thread:$0]  (!%p6990_p6), %s9379_s2, 16, %s304_s12, [#allocation7]  }
  0x84   : > { %s6887_s30 = smov [#allocation11]   ;;  %s6650_s22 = scalar_lea.hbm %s9381_s4, 256 }
  0x85   : > { %s324_s17 = sshll.u32 %s6887_s30, 4  ;;  %p6651_p1 = scmp.ne.s32.totalorder %s9381_s4, %s6650_s22  ;;  %s325_s17 = int_to_ptr.vmem [resolvable:$true] %s324_s17 }
  0x86   : > { %p6657_p0 = scmp.lt.u32.totalorder %s6650_s22, %s9381_s4 }
  0x87   : > { %p6653_p3 = pnand %p6651_p1, %p7006_p8 }
  0x89   : > { %p6654_p13 = pneg %p6653_p3 }
  0x8b   : > { %p6659_p2 = pnand %p6657_p0, %p6654_p13 }
  0x8d   : > { %6662 = shalt.err (!%p6659_p2)
}
  0x8e   : > { %s6663_s12 = scalar_lea.vmem %s325_s17, 256  ;;  %p6671_p4 = scmp.lt.s32.totalorder %s325_s17, %s325_s17 }
  0x8f   : > { %p6664_p5 = scmp.ne.s32.totalorder %s325_s17, %s6663_s12  ;;  %p6672_p10 = scmp.lt.s32.totalorder %s6663_s12, %s6663_s12 }
  0x91   : > { %p6666_p7 = pnand %p6664_p5, %p7006_p8  ;;  %p6673_p11 = por %p6672_p10, %p6671_p4 }
  0x93   : > { %p6667_p9 = pneg %p6666_p7 }
  0x95   : > { %p6674_p12 = pnand %p6673_p11, %p6667_p9 }
  0x97   : > { %6677 = shalt.err (!%p6674_p12)
}
  0x98   : > { %s6888_s24 = smov 128   ;;  %s6889_s28 = smov 8  }
  0x99   : > { %6353 = dma.hbm_to_vmem [thread:$0]  (!%p6990_p6), %s9381_s4, 256, %s325_s17, [#allocation10], %s6888_s24, %s6888_s24, %s6889_s28  }
  0x9a   : > { %s6890_s18 = smov [#allocation14]   ;;  %s6891_s27 = smov [#allocation17]  }
  0x9b   : > { %s349_s22 = sshll.u32 %s6890_s18, 4  ;;  %s373_s10 = sshll.u32 %s6891_s27, 4  ;;  %s350_s22 = int_to_ptr.vmem [resolvable:$true] %s349_s22  ;;  %s7135_s10 = int_to_ptr.vmem [resolvable:$true] %s373_s10 }
  0x9c   : > { %s6678_s12 = scalar_lea.hbm %s9383_s6, 16 }
  0x9d   : > { %p6679_p1 = scmp.ne.s32.totalorder %s9383_s6, %s6678_s12  ;;  %p6685_p0 = scmp.lt.u32.totalorder %s6678_s12, %s9383_s6 }
  0x9f   : > { %p6681_p3 = pnand %p6679_p1, %p7006_p8 }
  0xa1   : > { %p6682_p13 = pneg %p6681_p3 }
  0xa3   : > { %p6687_p2 = pnand %p6685_p0, %p6682_p13 }
  0xa5   : > { %6690 = shalt.err (!%p6687_p2)
}
  0xa6   : > { %s6691_s24 = scalar_lea.vmem %s350_s22, 16  ;;  %s6698_s28 = scalar_lea.vmem %s350_s22, 32 }
  0xa7   : > { %p6692_p5 = scmp.ne.s32.totalorder %s350_s22, %s6691_s24  ;;  %p6699_p4 = scmp.lt.s32.totalorder %s350_s22, %s350_s22 }
  0xa8   : > { %p6700_p10 = scmp.lt.s32.totalorder %s6698_s28, %s6691_s24 }
  0xa9   : > { %p6694_p7 = pnand %p6692_p5, %p7006_p8 }
  0xaa   : > { %p6701_p11 = por %p6700_p10, %p6699_p4 }
  0xab   : > { %p6695_p9 = pneg %p6694_p7 }
  0xad   : > { %p6702_p12 = pnand %p6701_p11, %p6695_p9 }
  0xaf   : > { %6705 = shalt.err (!%p6702_p12)
}
  0xb0   : > { %6359 = dma.hbm_to_vmem [thread:$0]  (!%p6990_p6), %s9383_s6, 16, %s350_s22, [#allocation13]  }
  0xb1   : > { %s6706_s27 = scalar_lea.hbm %s9385_s8, 16 }
  0xb2   : > { %p6707_p1 = scmp.ne.s32.totalorder %s9385_s8, %s6706_s27  ;;  %p6713_p0 = scmp.lt.u32.totalorder %s6706_s27, %s9385_s8 }
  0xb4   : > { %p6709_p3 = pnand %p6707_p1, %p7006_p8 }
  0xb6   : > { %p6710_p13 = pneg %p6709_p3 }
  0xb8   : > { %p6715_p2 = pnand %p6713_p0, %p6710_p13 }
  0xba   : > { %6718 = shalt.err (!%p6715_p2)
}
  0xbb   : > { %s6719_s22 = scalar_lea.vmem %s7135_s10, 16  ;;  %s6726_s17 = scalar_lea.vmem %s7135_s10, 32 }
  0xbc   : > { %p6720_p5 = scmp.ne.s32.totalorder %s7135_s10, %s6719_s22  ;;  %p6727_p4 = scmp.lt.s32.totalorder %s7135_s10, %s7135_s10 }
  0xbd   : > { %p6728_p10 = scmp.lt.s32.totalorder %s6726_s17, %s6719_s22 }
  0xbe   : > { %p6722_p7 = pnand %p6720_p5, %p7006_p8 }
  0xbf   : > { %p6729_p11 = por %p6728_p10, %p6727_p4 }
  0xc0   : > { %p6723_p9 = pneg %p6722_p7 }
  0xc2   : > { %p6730_p12 = pnand %p6729_p11, %p6723_p9 }
  0xc4   : > { %6733 = shalt.err (!%p6730_p12)
}
  0xc5   : > { %6365 = dma.hbm_to_vmem [thread:$0]  (!%p6990_p6), %s9385_s8, 16, %s7135_s10, [#allocation16]  }
  0xc6   : > { %s6892_s1 = smov [#allocation18]   ;;  %s6734_s27 = scalar_lea.hbm %s9386_s9, 16 }
  0xc7   : > { %s384_s26 = sshll.u32 %s6892_s1, 4  ;;  %p6735_p1 = scmp.ne.s32.totalorder %s9386_s9, %s6734_s27  ;;  %s385_s26 = int_to_ptr.vmem [resolvable:$true] %s384_s26 }
  0xc8   : > { %p6741_p0 = scmp.lt.u32.totalorder %s6734_s27, %s9386_s9 }
  0xc9   : > { %p6737_p3 = pnand %p6735_p1, %p7006_p8 }
  0xcb   : > { %p6738_p13 = pneg %p6737_p3 }
  0xcd   : > { %p6743_p2 = pnand %p6741_p0, %p6738_p13 }
  0xcf   : > { %6746 = shalt.err (!%p6743_p2)
}
  0xd0   : > { %s6747_s10 = scalar_lea.vmem %s385_s26, 16  ;;  %s6754_s22 = scalar_lea.vmem %s385_s26, 32 }
  0xd1   : > { %p6748_p5 = scmp.ne.s32.totalorder %s385_s26, %s6747_s10  ;;  %p6755_p4 = scmp.lt.s32.totalorder %s385_s26, %s385_s26 }
  0xd2   : > { %p6756_p10 = scmp.lt.s32.totalorder %s6754_s22, %s6747_s10 }
  0xd3   : > { %p6750_p7 = pnand %p6748_p5, %p7006_p8 }
  0xd4   : > { %p6757_p11 = por %p6756_p10, %p6755_p4 }
  0xd5   : > { %p6751_p9 = pneg %p6750_p7 }
  0xd7   : > { %p6758_p12 = pnand %p6757_p11, %p6751_p9 }
  0xd9   : > { %6761 = shalt.err (!%p6758_p12)
}
  0xda   : > { %6368 = dma.hbm_to_vmem [thread:$0]  (!%p6990_p6), %s9386_s9, 16, %s385_s26, [#allocation19]  }
  0xdb   : > { %s5906_s11 = sadd.s32 4294967294, %s6878_s16   ;;  %s7199_s23 = sadd.s32 1, %s6878_s16  }
  0xdc   : > { %s38_s28 = sadd.s32 1, %s6874_s15  ;;  %s35_s1 = ssub.s32 %s6878_s16, %s7199_s23 }
  0xdd   : > { %p45_p8 = scmp.ne.s32.totalorder %s6874_s15, %s6870_s14  ;;  %p36_p1 = scmp.eq.s32.totalorder %s35_s1, 0 }
  0xde   : > { %p46_p3 = scmp.eq.s32.totalorder %s6878_s16, 0  ;;  %p51_p13 = scmp.ne.s32.totalorder %s6870_s14, %s6866_s13 }
  0xdf   : > { %p264_p0 = scmp.eq.s32.totalorder %s6974_s19, 1  ;;  %p9404_p5 = scmp.eq.s32.totalorder %s6974_s19, 0 }
  0xe0   : > { %s7211_s21 = scalar_select %p36_p1, %s6874_s15, %s38_s28  }
  0xe1   : > { %p47_p2 = por %p46_p3, %p45_p8  ;;  %p7215_p7 = por %p9404_p5, %p51_p13 }
  0xe2   : > { %p7219_p6 = por %p264_p0, %p45_p8  ;;  %p270_p9 = scmp.eq.s32.totalorder %s5906_s11, 1 }
  0xe3   : > { %p6386_p4 = scmp.lt.s32.totalorder %s6878_s16, 2  ;;  %s395_s27 = sand.u32 1, %s6874_s15  }
  0xe4   : > { %s9406_s26 = scalar_select %p7219_p6, 1, 0 }
  0xe5   : > { %p7225_p10 = por %p270_p9, %p51_p13  ;;  %s5918_s29 = sshll.u32 %s395_s27, 7 }
  0xe6   : > { %s6124_s12 = sshll.u32 %s6878_s16, 11  ;;  %s399_s17 = scalar_lea.vmem [#allocation3], %s5918_s29 }
  0xe7   : > { %s9407_s25 = scalar_select %p7225_p10, 1, 0 }
  0xe8   : > { %s7233_s22 = scalar_lea.hbm %s9377_s0, %s6124_s12  ;;  %s407_s24 = sshll.u32 %s399_s17, 4  ;;  %s7239_s24 = int_to_ptr.vmem [resolvable:$true] %s407_s24 }
  0xe9   : > { %p7235_p11 = pnand %p6386_p4, %p47_p2  ;;  %s7241_s28 = scalar_lea.sflag [#allocation4], %s395_s27 }
  0xea   : > { %s6762_s1 = scalar_lea.hbm %s7233_s22, 2048  ;;  %s6767_s30 = scalar_lea.hbm %s9377_s0, 4096 }
  0xeb   : > { %p6763_p12 = scmp.ne.s32.totalorder %s7233_s22, %s6762_s1  ;;  %p6764_p8 = pneg %p7235_p11 }
  0xec   : > { %p6768_p13 = scmp.lt.u32.totalorder %s7233_s22, %s9377_s0  ;;  %p6769_p0 = scmp.lt.u32.totalorder %s6767_s30, %s6762_s1 }
  0xed   : > { %p6765_p1 = pnand %p6764_p8, %p6763_p12  ;;  %p6771_p5 = scmp.lt.u32.totalorder %s6762_s1, %s7233_s22 }
  0xee   : > { %p6770_p2 = por %p6769_p0, %p6768_p13 }
  0xef   : > { %p6766_p3 = pneg %p6765_p1 }
  0xf0   : > { %p6772_p9 = por %p6771_p5, %p6770_p2 }
  0xf2   : > { %p6773_p4 = pnand %p6772_p9, %p6766_p3 }
  0xf4   : > { %6776 = shalt.err (!%p6773_p4)
}
  0xf5   : > { %s6777_s27 = scalar_lea.vmem %s7239_s24, 2048  ;;  %s6893_s29 = smov [#allocation3]  }
  0xf6   : > { %p6778_p12 = scmp.ne.s32.totalorder %s7239_s24, %s6777_s27  ;;  %s6782_s12 = sshll.u32 %s6893_s29, 4  ;;  %s6783_s12 = int_to_ptr.vmem [resolvable:$false] %s6782_s12 }
  0xf7   : > { %s6784_s10 = scalar_lea.vmem %s6783_s12, 4096  ;;  %p6785_p6 = scmp.lt.s32.totalorder %s7239_s24, %s6783_s12 }
  0xf8   : > { %p6780_p1 = pnand %p6778_p12, %p6764_p8  ;;  %p6786_p13 = scmp.lt.s32.totalorder %s6784_s10, %s6777_s27 }
  0xfa   : > { %p6781_p10 = pneg %p6780_p1  ;;  %p6787_p0 = por %p6786_p13, %p6785_p6 }
  0xfc   : > { %p6788_p2 = pnand %p6787_p0, %p6781_p10 }
  0xfe   : > { %6791 = shalt.err (!%p6788_p2)
}
  0xff   : > { %s9409_s1 = smov 4   ;;  %s9410_s30 = sld [smem:[#allocation28_spill]] }
 0x100   : > { %6372 = dma.hbm_to_vmem [thread:$0]  (!%p7235_p11), %s7233_s22, 2048, %s7239_s24, %s7241_s28, %s9403_s20, %s9403_s20, %s9409_s1  }
 0x105   : > { %p9411_p8 = scmp.ne.s32.totalorder %s9410_s30, 0 }
 0x107   : > { %419 = sbr.rel (%p9411_p8) target bundleno = 1409 (0x581), region = 60 }
 0x10e   : > { %s7275_s17 = sand.u32 1, %s6870_s14  }
 0x10f   : > { %s5923_s27 = sshll.u32 %s7275_s17, 7  ;;  %s422_s29 = scalar_lea.sflag [#allocation4], %s7275_s17 }
 0x110   : > { %s7281_s11 = scalar_lea.vmem [#allocation3], %s5923_s27 }
 0x111   : > { %6837 = dma.done.wait (%p7215_p7), %s422_s29, 2048  }
 0x112   : > { %6839 = vsyncadd (%p7215_p7), %s422_s29, 4294965248  ;;  %p9412_p6 = scmp.eq.s32.totalorder %s6974_s19, 0 }
 0x114   : > { %6841 = dma.done.wait (%p9412_p6), [#allocation7], 272   ;;  %p9413_p10 = pmov %p9412_p6 }
 0x115   : > { %p9414_p11 = pmov %p9412_p6 }
 0x116   : > { %6843 = vsyncadd (%p9413_p10), [#allocation7], 4294967024 }
 0x117   : > { %6845 = dma.done.wait (%p9414_p11), [#allocation10], 272   ;;  %p9415_p3 = pmov %p9412_p6 }
 0x119   : > { %6847 = vsyncadd (%p9415_p3), [#allocation10], 4294967024  ;;  %p9416_p5 = pmov %p9415_p3 }
 0x11a   : > { %p9417_p9 = pmov %p9415_p3 }
 0x11b   : > { %6849 = dma.done.wait (%p9416_p5), [#allocation13], 32  }
 0x11c   : > { %6851 = vsyncadd (%p9417_p9), [#allocation13], 4294967264  ;;  %p9418_p7 = pmov %p9415_p3 }
 0x11d   : > { %p9419_p4 = pmov %p9415_p3 }
 0x11e   : > { %6853 = dma.done.wait (%p9418_p7), [#allocation16], 1040  }
 0x11f   : > { %6855 = vsyncadd (%p9419_p4), [#allocation16], 4294966256  ;;  %p9420_p12 = pmov %p9415_p3 }
 0x120   : > { %p9421_p1 = pmov %p9415_p3 }
 0x121   : > { %6857 = dma.done.wait (%p9420_p12), [#allocation19], 16  }
 0x122   : > { %6859 = vsyncadd (%p9421_p1), [#allocation19], 4294967280  ;;  %v6445_v0 = vld [vmem:[#allocation6] sm:$0xff]   ;;  %v6446_v1 = vld [vmem:[#allocation6 + $0x8] sm:$0xff]   ;;  %vm661_vm0 = vcmask 261120   ;;  %v6894_v18 = vmov 0   ;;  %v1967_v43 = vlaneseq }
 0x123   : > { %6201 = vmatprep.subr.bf16.mxu0 %v6445_v0  ;;  %v7308_v2 = vld [vmem:[%s7281_s11] sm:$0xff]   ;;  %v503_v3 = vld [vmem:[%s7281_s11 + $0x8] sm:$0xff]   ;;  %v505_v4 = vld [vmem:[%s7281_s11 + $0x10] sm:$0xff]   ;;  %v5970_v19 = vcombine.low %v6894_v18, %v6894_v18  ;;  %vm1442_vm1 = vcmask 1043456   ;;  %vm1443_vm2 = vsmask.f32 7938 }
 0x124   : > { %6202 = vmatpush3.bf16.msra.mxu0 %v6445_v0  ;;  %6205 = vmatprep.mubr.msk.bf16.mxu0 %vm661_vm0, %v7308_v2  ;;  %v507_v5 = vld [vmem:[%s7281_s11 + $0x18] sm:$0xff]   ;;  %v509_v6 = vld [vmem:[%s7281_s11 + $0x20] sm:$0xff]   ;;  %v511_v7 = vld [vmem:[%s7281_s11 + $0x28] sm:$0xff]   ;;  %vm1448_vm4 = vcmask 1040384   ;;  %vm1449_vm5 = vsmask.f32 256 }
 0x125   : > { %6203 = vmatprep.subr.bf16.mxu0 %v6446_v1  ;;  %v513_v8 = vld [vmem:[%s7281_s11 + $0x30] sm:$0xff]   ;;  %v515_v9 = vld [vmem:[%s7281_s11 + $0x38] sm:$0xff]   ;;  %v517_v10 = vld [vmem:[%s7281_s11 + $0x40] sm:$0xff]   ;;  %v1113_v20 = vshrl.u32 %v5970_v19, 16  ;;  %v1116_v22 = vshll.u32 %v5970_v19, 16  ;;  %v7370_v45 = vshrl.u32 %v1967_v43, 7 }
 0x126   : > { %v519_v11 = vld [vmem:[%s7281_s11 + $0x48] sm:$0xff]   ;;  %v521_v12 = vld [vmem:[%s7281_s11 + $0x50] sm:$0xff]   ;;  %v523_v13 = vld [vmem:[%s7281_s11 + $0x58] sm:$0xff]   ;;  %vm2110_vm8 = vsmask.f32 3328  ;;  %vm2793_vm11 = vcmask 1042432  }
 0x127   : > { %v525_v14 = vld [vmem:[%s7281_s11 + $0x60] sm:$0xff]   ;;  %v527_v15 = vld [vmem:[%s7281_s11 + $0x68] sm:$0xff]   ;;  %v529_v16 = vld [vmem:[%s7281_s11 + $0x70] sm:$0xff]   ;;  %v1115_v21 = vrot.slane %v1113_v20, 7  ;;  %v1969_v47 = vsub.s32 0, %v7370_v45  ;;  %v2659_v60 = vsub.s32 1, %v7370_v45 }
 0x128   : > { %6204 = vmatpush3.bf16.msra.mxu0 %v6446_v1  ;;  %v531_v17 = vld [vmem:[%s7281_s11 + $0x78] sm:$0xff]   ;;  %vm7343_vm3 = vmand %vm1442_vm1, %vm1443_vm2  ;;  %v1445_v25 = vld [vmem:[#allocation2] sm:$0xf]  ;;  %vm2111_vm9 = vsmask.f32 7440  ;;  %vm2794_vm12 = vcmask 1046532  }
 0x129   : > { %v7347_v24 = vor.u32 %v1116_v22, %v1115_v21  ;;  %vm7352_vm6 = vmand %vm1448_vm4, %vm1449_vm5  ;;  %v7356_v28 = vrot.slane %v1115_v21, 4  ;;  %v1451_v29 = vld [vmem:[#allocation2 + $0x4] sm:$0x1]  ;;  %v6463_v36 = vld [vmem:[#allocation15] sm:$0xff]   ;;  %v4100_v21 = vsub.s32 3, %v7370_v45  ;;  %vm5699_vm14 = vcmask 257024  }
 0x12a   : > { %vm7364_vm7 = vmand %vm1448_vm4, %vm1443_vm2  ;;  %6237 = vmatprep.subr.bf16.mxu0 %v6463_v36  ;;  %6285 = vmatprep.subr.bf16.mxu1 %v6463_v36  ;;  %v6464_v37 = vld [vmem:[#allocation15 + $0x8] sm:$0xff]   ;;  %v6465_v38 = vld [vmem:[#allocation15 + $0x10] sm:$0xff]   ;;  %s9184_s20 = scalar_lea.vmem [#allocation20], %s5923_s27  ;;  %s6158_s18 = sshll.u32 %s6974_s19, 11 }
 0x12b   : > { %6206 = vmatmul.mubr.msk.bf16.vlgmr.msra.gmra.mrb[0].mxu0 %vm661_vm0, %v503_v3  ;;  %v1446_v26 = vsel %vm7343_vm3, %v7347_v24, %v1445_v25  ;;  %v1452_v30 = vsel %vm7352_vm6, %v7356_v28, %v1451_v29  ;;  %6293 = vmatpush3.bf16.msra.mxu1 %v6463_v36  ;;  %v1929_v39 = vld [vmem:[#allocation11] sm:$0xff]  ;;  %v1930_v40 = vld [vmem:[#allocation11 + $0x8] sm:$0x1]  ;;  %v6466_v41 = vld [vmem:[#allocation15 + $0x18] sm:$0xff]   ;;  %s5747_s22 = sshll.u32 %s9184_s20, 4  ;;  %s9439_s12 = sld [smem:[#allocation32_spill]]  ;;  %s9327_s22 = int_to_ptr.vmem [resolvable:$true] %s5747_s22 }
 0x12c   : > { %6209 = vmatprep.mubr.msk.bf16.mxu0 %vm661_vm0, %v505_v4  ;;  %1447 = vst [vmem:[#allocation2] sm:$0xf] %v1446_v26  ;;  %1453 = vst [vmem:[#allocation2 + $0x4] sm:$0x1] %v1452_v30  ;;  %6238 = vmatpush3.bf16.msra.mxu0 %v6463_v36  ;;  %v1931_v42 = vpack.c.bf16 %v1930_v40, %v1929_v39  ;;  %v6467_v44 = vld [vmem:[#allocation15 + $0x20] sm:$0xff]   ;;  %v6468_v50 = vld [vmem:[#allocation15 + $0x28] sm:$0xff]   ;;  %v9435_v26 = vunpack.c.l.bf16 %v7308_v2 }
 0x12d   : > { %6239 = vmatprep.subr.bf16.mxu0 %v6464_v37  ;;  %6286 = vmatprep.subr.bf16.mxu1 %v6464_v37  ;;  %v6469_v53 = vld [vmem:[#allocation15 + $0x30] sm:$0xff]   ;;  %v6470_v55 = vld [vmem:[#allocation15 + $0x38] sm:$0xff]   ;;  %vm7387_vm10 = vmor %vm2110_vm8, %vm2111_vm9  ;;  %s5733_s19 = scalar_lea.sflag [#allocation5], %s7275_s17  ;;  %s6792_s1 = scalar_lea.vmem %s9327_s22, 2048 }
 0x12e   : > { %v2035_v46 = vshrl.u32 %v1931_v42, 16  ;;  %v1965_v59 = vpack.i.b16 %v1931_v42, %v1931_v42  ;;  %vm7402_vm13 = vmor %vm2793_vm11, %vm2794_vm12  ;;  %p6793_p13 = scmp.ne.s32.totalorder %s9327_s22, %s6792_s1  ;;  %p9440_p0 = scmp.ne.s32.totalorder %s9406_s26, 0 }
 0x12f   : > { %6294 = vmatpush3.bf16.msra.mxu1 %v6464_v37  ;;  %s6895_s30 = smov [#allocation20]  }
 0x130   : > { %6240 = vmatpush3.bf16.msra.mxu0 %v6464_v37  ;;  %6287 = vmatprep.subr.bf16.mxu1 %v6465_v38  ;;  %v7373_v48 = vpack.i.b16 %v2035_v46, %v2035_v46  ;;  %v2660_v0 = vrot.slane %v1965_v59, %v2659_v60  ;;  %p6794_p2 = pnand %p6793_p13, %p9440_p0  ;;  %s6796_s27 = sshll.u32 %s6895_s30, 4  ;;  %s6797_s27 = int_to_ptr.vmem [resolvable:$false] %s6796_s27 }
 0x131   : > { %6241 = vmatprep.subr.bf16.mxu0 %v6465_v38  ;;  %s9325_s10 = scalar_lea.hbm %s9439_s12, %s6158_s18  ;;  %s6798_s29 = scalar_lea.vmem %s6797_s27, 4096 }
 0x132   : > { %v2041_v49 = vrot.slane %v7373_v48, %v1969_v47  ;;  %v4201_v43 = vrot.slane %v7373_v48, %v4100_v21  ;;  %p6795_p8 = pneg %p6794_p2  ;;  %p6799_p6 = scmp.lt.s32.totalorder %s9327_s22, %s6797_s27 }
 0x133   : > { %6210 = vmatmul.mubr.msk.bf16.gmra.mrb[4].mxu0 %vm661_vm0, %v507_v5  ;;  %v1688_v31 = vld [vmem:[#allocation2] sm:$0x1]  ;;  %v1809_v34 = vld [vmem:[#allocation2 + $0x4] sm:$0x1]  ;;  %6295 = vmatpush3.bf16.msra.mxu1 %v6465_v38  ;;  %v2625_v4 = vld [vmem:[#allocation2] sm:$0xe]  ;;  %v7381_v5 = vcombine.low %v2660_v0, %v2660_v0  ;;  %p6800_p10 = scmp.lt.s32.totalorder %s6798_s29, %s6792_s1 }
 0x134   : > { %6213 = vmatprep.mubr.msk.bf16.mxu0 %vm661_vm0, %v509_v6  ;;  %v1689_v32 = vsel %vm7352_vm6, 0, %v1688_v31  ;;  %v1810_v35 = vsel %vm7364_vm7, 0, %v1809_v34  ;;  %6242 = vmatpush3.bf16.msra.mxu0 %v6465_v38  ;;  %v7376_v51 = vcombine.low %v2041_v49, %v2041_v49  ;;  %v7383_v6 = vrot.slane %v1965_v59, %v1969_v47 }
 0x135   : > { %1690 = vst [vmem:[#allocation2] sm:$0x1] %v1689_v32  ;;  %1811 = vst [vmem:[#allocation2 + $0x4] sm:$0x1] %v1810_v35  ;;  %6243 = vmatprep.subr.bf16.mxu0 %v6466_v41  ;;  %6288 = vmatprep.subr.bf16.mxu1 %v6466_v41  ;;  %v7432_v0 = vcombine.low %v4201_v43, %v4201_v43  ;;  %p6801_p11 = por %p6800_p10, %p6799_p6 }
 0x137   : > { %6296 = vmatpush3.bf16.msra.mxu1 %v6466_v41  ;;  %p6802_p3 = pnand %p6801_p11, %p6795_p8 }
 0x138   : > { %6244 = vmatpush3.bf16.msra.mxu0 %v6466_v41  ;;  %6289 = vmatprep.subr.bf16.mxu1 %v6467_v44 }
 0x139   : > { %6245 = vmatprep.subr.bf16.mxu0 %v6467_v44 }
 0x13b   : > { %6214 = vmatmul.mubr.msk.bf16.gmra.mrb[8].mxu0 %vm661_vm0, %v511_v7  ;;  %6297 = vmatpush3.bf16.msra.mxu1 %v6467_v44 }
 0x13c   : > { %6217 = vmatprep.mubr.msk.bf16.mxu0 %vm661_vm0, %v513_v8  ;;  %6246 = vmatpush3.bf16.msra.mxu0 %v6467_v44  ;;  %v1932_v52 = vld [vmem:[#allocation2] sm:$0xf]  ;;  %v2003_v58 = vld [vmem:[#allocation2 + $0x4] sm:$0x1] }
 0x13d   : > { %6247 = vmatprep.subr.bf16.mxu0 %v6468_v50  ;;  %6290 = vmatprep.subr.bf16.mxu1 %v6468_v50  ;;  %v2046_v54 = vmul.bf16 %v7376_v51, %v1932_v52  ;;  %v2047_v61 = vmul.bf16 %v7376_v51, %v2003_v58 }
 0x13f   : > { %6298 = vmatpush3.bf16.msra.mxu1 %v6468_v50  ;;  %v2114_v56 = vshrl.u32 %v2046_v54, 16  ;;  %v2117_v57 = vshll.u32 %v2046_v54, 16  ;;  %v2123_v3 = vshll.u32 %v2047_v61, 16 }
 0x140   : > { %6248 = vmatpush3.bf16.msra.mxu0 %v6468_v50  ;;  %6291 = vmatprep.subr.bf16.mxu1 %v6469_v53 }
 0x141   : > { %6249 = vmatprep.subr.bf16.mxu0 %v6469_v53  ;;  %v2116_v62 = vrot.slane %v2114_v56, 4  ;;  %v2119_v63 = vrot.slane %v2117_v57, 5  ;;  %v2125_v8 = vrot.slane %v2123_v3, 5 }
 0x143   : > { %6218 = vmatmul.mubr.msk.bf16.gmra.mrb[12].mxu0 %vm661_vm0, %v515_v9  ;;  %6299 = vmatpush3.bf16.msra.mxu1 %v6469_v53  ;;  %v2120_v1 = vor.u32 %v2119_v63, %v2116_v62  ;;  %v2665_v9 = vmul.bf16 %v7381_v5, %v2625_v4  ;;  %v7430_v63 = vrot.slane %v1965_v59, %v4100_v21 }
 0x144   : > { %6221 = vmatprep.mubr.msk.bf16.mxu0 %vm661_vm0, %v517_v10  ;;  %6250 = vmatpush3.bf16.msra.mxu0 %v6469_v53  ;;  %v2666_v10 = vmul.bf16 %v7381_v5, %v2003_v58 }
 0x145   : > { %6251 = vmatprep.subr.bf16.mxu0 %v6470_v55  ;;  %6292 = vmatprep.subr.bf16.mxu1 %v6470_v55  ;;  %v2121_v7 = vrot.slane %v2120_v1, 4  ;;  %v6005_v19 = vrot.slane %v2665_v9, 9 }
 0x146   : > { %v2798_v20 = vrot.slane %v2666_v10, 5 }
 0x147   : > { %6300 = vmatpush3.bf16.msra.mxu1 %v6470_v55  ;;  %v2126_v18 = vsel %vm7387_vm10, %v2121_v7, %v2125_v8  ;;  %v1466_v7 = vld [vmem:[#allocation2 + $0x18] sm:$0xf]  ;;  %v1469_v8 = vld [vmem:[#allocation2 + $0x1c] sm:$0x1] }
 0x148   : > { %6252 = vmatpush3.bf16.msra.mxu0 %v6470_v55  ;;  %v2799_v42 = vsel %vm7402_vm13, %v6005_v19, %v2798_v20 }
 0x14b   : > { %6222 = vmatmul.mubr.msk.bf16.gmra.mrb[16].mxu0 %vm661_vm0, %v519_v11 }
 0x14c   : > { %6225 = vmatprep.mubr.msk.bf16.mxu0 %vm661_vm0, %v521_v12  ;;  %v3123_v12 = vsub.s32 2, %v7370_v45 }
 0x14e   : > { %v3740_v29 = vrot.slane %v7373_v48, %v3123_v12  ;;  %v3124_v34 = vrot.slane %v1965_v59, %v3123_v12 }
 0x150   : > { %v7418_v47 = vcombine.low %v3740_v29, %v3740_v29  ;;  %v7424_v53 = vcombine.low %v3124_v34, %v3124_v34 }
 0x153   : > { %6226 = vmatmul.mubr.msk.bf16.gmra.mrb[20].mxu0 %vm661_vm0, %v523_v13  ;;  %v7392_v13 = vld [vmem:[#allocation8] ss:$0 sm:$0xff] }
 0x154   : > { %6229 = vmatprep.mubr.msk.bf16.mxu0 %vm661_vm0, %v525_v14  ;;  %v1971_v14 = vmul.bf16 %v7383_v6, %v1932_v52  ;;  %v7422_v52 = vrot.slane %v7373_v48, %v2659_v60 }
 0x156   : > { %v2593_v38 = vadd.bf16 %v2126_v18, %v1971_v14  ;;  %v1454_v18 = vld [vmem:[#allocation2 + $0x8] sm:$0xf] }
 0x158   : > { %v7426_v56 = vadd.bf16 %v2799_v42, %v2593_v38 }
 0x15b   : > { %6230 = vmatmul.mubr.msk.bf16.gmra.mrb[24].mxu0 %vm661_vm0, %v527_v15  ;;  %v4816_v15 = vsub.s32 4, %v7370_v45 }
 0x15c   : > { %6233 = vmatprep.mubr.msk.bf16.mxu0 %vm661_vm0, %v529_v16 }
 0x15d   : > { %v4817_v39 = vrot.slane %v1965_v59, %v4816_v15 }
 0x15f   : > { %v7428_v57 = vcombine.low %v4817_v39, %v4817_v39 }
 0x163   : > { %6234 = vmatmul.mubr.msk.bf16.gmra.mrb[28].mxu0 %vm661_vm0, %v531_v17  ;;  %v7396_v17 = vld [vmem:[#allocation9] ss:$0 sm:$0xff] }
 0x1fe   : > { %v6207_v16 = vpop.f32.mrb[0].mxu0 }
 0x1ff   : > { %v880_v22 = vmul.f32 %v6207_v16, %v7392_v13  ;;  %v744_v25 = vpop.f32.mrb[1].mxu0 }
 0x200   : > { %v878_v31 = vmul.f32 %v7392_v13, %v744_v25  ;;  %v6208_v32 = vpop.f32.mrb[2].mxu0  ;;  %v1457_v25 = vld [vmem:[#allocation2 + $0xc] sm:$0x1] }
 0x201   : > { %v919_v35 = vadd.f32 %v7396_v17, %v880_v22  ;;  %v881_v36 = vmul.f32 %v6208_v32, %v7392_v13  ;;  %v747_v37 = vpop.f32.mrb[3].mxu0 }
 0x202   : > { %v917_v40 = vadd.f32 %v7396_v17, %v878_v31  ;;  %v879_v41 = vmul.f32 %v7392_v13, %v747_v37  ;;  %v1472_v37 = vld [vmem:[#allocation2 + $0x20] sm:$0xf] }
 0x203   : > { %v951_v45 = vmax.f32 %v919_v35, 0.0  ;;  %v920_v46 = vadd.f32 %v7396_v17, %v881_v36 }
 0x204   : > { %v949_v49 = vmax.f32 %v917_v40, 0.0  ;;  %v918_v50 = vadd.f32 %v7396_v17, %v879_v41  ;;  %v1475_v41 = vld [vmem:[#allocation2 + $0x24] sm:$0x1] }
 0x205   : > { %v6127_v54 = vpack.c.bf16 %v951_v45, %v951_v45  ;;  %v952_v55 = vmax.f32 %v920_v46, 0.0 }
 0x206   : > { %v6125_v58 = vpack.c.bf16 %v949_v49, %v949_v49  ;;  %v950_v61 = vmax.f32 %v918_v50, 0.0  ;;  %v6211_v62 = vpop.f32.mrb[4].mxu0 }
 0x207   : > { %v1137_v1 = vshrl.u32 %v6127_v54, 16  ;;  %v1140_v3 = vshll.u32 %v6127_v54, 16  ;;  %v6128_v4 = vpack.c.bf16 %v952_v55, %v952_v55  ;;  %v884_v48 = vmul.f32 %v6211_v62, %v7392_v13  ;;  %v760_v60 = vpop.f32.mrb[5].mxu0  ;;  %v1460_v54 = vld [vmem:[#allocation2 + $0x10] sm:$0xf] }
 0x208   : > { %v1121_v9 = vshrl.u32 %v6125_v58, 16  ;;  %v1124_v10 = vshll.u32 %v6125_v58, 16  ;;  %v6126_v12 = vpack.c.bf16 %v950_v61, %v950_v61  ;;  %v882_v14 = vmul.f32 %v7392_v13, %v760_v60  ;;  %v6212_v15 = vpop.f32.mrb[6].mxu0  ;;  %v1463_v55 = vld [vmem:[#allocation2 + $0x14] sm:$0x1] }
 0x209   : > { %v1139_v16 = vrot.slane %v1137_v1, 7  ;;  %v1145_v59 = vshrl.u32 %v6128_v4, 16  ;;  %v1148_v19 = vshll.u32 %v6128_v4, 16  ;;  %v923_v20 = vadd.f32 %v7396_v17, %v884_v48  ;;  %v763_v21 = vpop.f32.mrb[7].mxu0 }
 0x20a   : > { %v1123_v22 = vrot.slane %v1121_v9, 7  ;;  %v1129_v29 = vshrl.u32 %v6126_v12, 16  ;;  %v1132_v31 = vshll.u32 %v6126_v12, 16  ;;  %v921_v32 = vadd.f32 %v7396_v17, %v882_v14 }
 0x20b   : > { %v1142_v34 = vor.u32 %v1140_v3, %v1139_v16  ;;  %v1143_v35 = vrot.slane %v1139_v16, 4  ;;  %v1147_v36 = vrot.slane %v1145_v59, 7  ;;  %v955_v38 = vmax.f32 %v923_v20, 0.0 }
 0x20c   : > { %v1126_v39 = vor.u32 %v1124_v10, %v1123_v22  ;;  %v1127_v40 = vrot.slane %v1123_v22, 4  ;;  %v1131_v42 = vrot.slane %v1129_v29, 7  ;;  %v953_v43 = vmax.f32 %v921_v32, 0.0 }
 0x20d   : > { %v1467_v45 = vsel %vm7343_vm3, %v1142_v34, %v1466_v7  ;;  %v1470_v46 = vsel %vm7352_vm6, %v1143_v35, %v1469_v8  ;;  %v1150_v49 = vor.u32 %v1148_v19, %v1147_v36  ;;  %v1151_v50 = vrot.slane %v1147_v36, 4  ;;  %v1493_v35 = vld [vmem:[#allocation2 + $0x3c] sm:$0x1] }
 0x20e   : > { %1468 = vst [vmem:[#allocation2 + $0x18] sm:$0xf] %v1467_v45  ;;  %1471 = vst [vmem:[#allocation2 + $0x1c] sm:$0x1] %v1470_v46  ;;  %v1455_v58 = vsel %vm7343_vm3, %v1126_v39, %v1454_v18  ;;  %v1458_v61 = vsel %vm7352_vm6, %v1127_v40, %v1457_v25  ;;  %v1134_v62 = vor.u32 %v1132_v31, %v1131_v42  ;;  %v1135_v1 = vrot.slane %v1131_v42, 4  ;;  %v6215_v3 = vpop.f32.mrb[8].mxu0 }
 0x20f   : > { %1456 = vst [vmem:[#allocation2 + $0x8] sm:$0xf] %v1455_v58  ;;  %1459 = vst [vmem:[#allocation2 + $0xc] sm:$0x1] %v1458_v61  ;;  %v1473_v4 = vsel %vm7343_vm3, %v1150_v49, %v1472_v37  ;;  %v1476_v48 = vsel %vm7352_vm6, %v1151_v50, %v1475_v41  ;;  %v6131_v60 = vpack.c.bf16 %v955_v38, %v955_v38  ;;  %v776_v8 = vpop.f32.mrb[9].mxu0 }
 0x210   : > { %v6129_v7 = vpack.c.bf16 %v953_v43, %v953_v43  ;;  %1474 = vst [vmem:[#allocation2 + $0x20] sm:$0xf] %v1473_v4  ;;  %1477 = vst [vmem:[#allocation2 + $0x24] sm:$0x1] %v1476_v48  ;;  %v1461_v9 = vsel %vm7343_vm3, %v1134_v62, %v1460_v54  ;;  %v1464_v10 = vsel %vm7352_vm6, %v1135_v1, %v1463_v55  ;;  %v6216_v16 = vpop.f32.mrb[10].mxu0 }
 0x211   : > { %v885_v12 = vmul.f32 %v6212_v15, %v7392_v13  ;;  %v883_v14 = vmul.f32 %v7392_v13, %v763_v21  ;;  %1462 = vst [vmem:[#allocation2 + $0x10] sm:$0xf] %v1461_v9  ;;  %1465 = vst [vmem:[#allocation2 + $0x14] sm:$0x1] %v1464_v10  ;;  %v1169_v18 = vshrl.u32 %v6131_v60, 16  ;;  %v1172_v59 = vshll.u32 %v6131_v60, 16 }
 0x212   : > { %v1153_v19 = vshrl.u32 %v6129_v7, 16  ;;  %v1156_v20 = vshll.u32 %v6129_v7, 16  ;;  %v779_v22 = vpop.f32.mrb[11].mxu0  ;;  %v888_v31 = vmul.f32 %v6215_v3, %v7392_v13  ;;  %v886_v32 = vmul.f32 %v7392_v13, %v776_v8  ;;  %v1490_v15 = vld [vmem:[#allocation2 + $0x38] sm:$0xf] }
 0x213   : > { %v924_v25 = vadd.f32 %v7396_v17, %v885_v12  ;;  %v922_v29 = vadd.f32 %v7396_v17, %v883_v14  ;;  %v1171_v34 = vrot.slane %v1169_v18, 7  ;;  %v889_v36 = vmul.f32 %v6216_v16, %v7392_v13  ;;  %v1478_v38 = vld [vmem:[#allocation2 + $0x28] sm:$0xf]  ;;  %v1481_v39 = vld [vmem:[#allocation2 + $0x2c] sm:$0x1] }
 0x214   : > { %v1155_v21 = vrot.slane %v1153_v19, 7  ;;  %v887_v37 = vmul.f32 %v7392_v13, %v779_v22  ;;  %v927_v42 = vadd.f32 %v7396_v17, %v888_v31  ;;  %v925_v43 = vadd.f32 %v7396_v17, %v886_v32 }
 0x215   : > { %v956_v40 = vmax.f32 %v924_v25, 0.0  ;;  %v954_v41 = vmax.f32 %v922_v29, 0.0  ;;  %v1697_v45 = vld [vmem:[#allocation2 + $0x18] sm:$0x1]  ;;  %v1818_v46 = vld [vmem:[#allocation2 + $0x1c] sm:$0x1]  ;;  %v1174_v49 = vor.u32 %v1172_v59, %v1171_v34 }
 0x216   : > { %v1175_v50 = vrot.slane %v1171_v34, 4  ;;  %v1158_v54 = vor.u32 %v1156_v20, %v1155_v21  ;;  %v1159_v55 = vrot.slane %v1155_v21, 4  ;;  %v1698_v58 = vsel %vm7352_vm6, 0, %v1697_v45  ;;  %v1691_v62 = vld [vmem:[#allocation2 + $0x8] sm:$0x1]  ;;  %v6219_v31 = vpop.f32.mrb[12].mxu0 }
 0x217   : > { %v1819_v61 = vsel %vm7364_vm7, 0, %v1818_v46  ;;  %v1812_v1 = vld [vmem:[#allocation2 + $0xc] sm:$0x1]  ;;  %v6132_v3 = vpack.c.bf16 %v956_v40, %v956_v40  ;;  %v6130_v4 = vpack.c.bf16 %v954_v41, %v954_v41  ;;  %1699 = vst [vmem:[#allocation2 + $0x18] sm:$0x1] %v1698_v58  ;;  %v1692_v48 = vsel %vm7352_vm6, 0, %v1691_v62 }
 0x218   : > { %1820 = vst [vmem:[#allocation2 + $0x1c] sm:$0x1] %v1819_v61  ;;  %v1813_v60 = vsel %vm7364_vm7, 0, %v1812_v1  ;;  %v1700_v7 = vld [vmem:[#allocation2 + $0x20] sm:$0x1]  ;;  %v1491_v9 = vsel %vm7343_vm3, %v1174_v49, %v1490_v15  ;;  %v1494_v10 = vsel %vm7352_vm6, %v1175_v50, %v1493_v35  ;;  %v1479_v59 = vsel %vm7343_vm3, %v1158_v54, %v1478_v38  ;;  %v792_v21 = vpop.f32.mrb[13].mxu0 }
 0x219   : > { %v1821_v8 = vld [vmem:[#allocation2 + $0x24] sm:$0x1]  ;;  %1693 = vst [vmem:[#allocation2 + $0x8] sm:$0x1] %v1692_v48  ;;  %1814 = vst [vmem:[#allocation2 + $0xc] sm:$0x1] %v1813_v60  ;;  %v1482_v19 = vsel %vm7352_vm6, %v1159_v55, %v1481_v39  ;;  %v928_v40 = vadd.f32 %v7396_v17, %v889_v36  ;;  %v926_v41 = vadd.f32 %v7396_v17, %v887_v37 }
 0x21a   : > { %v1701_v12 = vsel %vm7352_vm6, 0, %v1700_v7  ;;  %v1822_v14 = vsel %vm7364_vm7, 0, %v1821_v8  ;;  %v1694_v16 = vld [vmem:[#allocation2 + $0x10] sm:$0x1]  ;;  %v1815_v18 = vld [vmem:[#allocation2 + $0x14] sm:$0x1]  ;;  %v892_v45 = vmul.f32 %v6219_v31, %v7392_v13  ;;  %v890_v61 = vmul.f32 %v7392_v13, %v792_v21 }
 0x21b   : > { %1492 = vst [vmem:[#allocation2 + $0x38] sm:$0xf] %v1491_v9  ;;  %1495 = vst [vmem:[#allocation2 + $0x3c] sm:$0x1] %v1494_v10  ;;  %v1695_v20 = vsel %vm7352_vm6, 0, %v1694_v16  ;;  %v1816_v22 = vsel %vm7364_vm7, 0, %v1815_v18 }
 0x21c   : > { %1702 = vst [vmem:[#allocation2 + $0x20] sm:$0x1] %v1701_v12  ;;  %1823 = vst [vmem:[#allocation2 + $0x24] sm:$0x1] %v1822_v14  ;;  %v1177_v25 = vshrl.u32 %v6132_v3, 16  ;;  %v1180_v29 = vshll.u32 %v6132_v3, 16 }
 0x21d   : > { %1480 = vst [vmem:[#allocation2 + $0x28] sm:$0xf] %v1479_v59  ;;  %1483 = vst [vmem:[#allocation2 + $0x2c] sm:$0x1] %v1482_v19  ;;  %v1161_v32 = vshrl.u32 %v6130_v4, 16  ;;  %v1164_v34 = vshll.u32 %v6130_v4, 16 }
 0x21e   : > { %1696 = vst [vmem:[#allocation2 + $0x10] sm:$0x1] %v1695_v20  ;;  %1817 = vst [vmem:[#allocation2 + $0x14] sm:$0x1] %v1816_v22  ;;  %v959_v15 = vmax.f32 %v927_v42, 0.0  ;;  %v957_v35 = vmax.f32 %v925_v43, 0.0 }
 0x21f   : > { %v1179_v38 = vrot.slane %v1177_v25, 7  ;;  %v1496_v39 = vld [vmem:[#allocation2 + $0x40] sm:$0xf]  ;;  %v7491_v46 = vpop.f32.mrb[14].mxu0  ;;  %v1499_v49 = vld [vmem:[#allocation2 + $0x44] sm:$0x1] }
 0x220   : > { %v1163_v50 = vrot.slane %v1161_v32, 7  ;;  %v1484_v54 = vld [vmem:[#allocation2 + $0x30] sm:$0xf]  ;;  %v6135_v55 = vpack.c.bf16 %v959_v15, %v959_v15  ;;  %v6133_v58 = vpack.c.bf16 %v957_v35, %v957_v35  ;;  %v7494_v42 = vpop.f32.mrb[15].mxu0  ;;  %v1487_v1 = vld [vmem:[#allocation2 + $0x34] sm:$0x1] }
 0x221   : > { %v1182_v43 = vor.u32 %v1180_v29, %v1179_v38  ;;  %v1183_v62 = vrot.slane %v1179_v38, 4  ;;  %v960_v3 = vmax.f32 %v928_v40, 0.0  ;;  %v958_v36 = vmax.f32 %v926_v41, 0.0  ;;  %v7496_v7 = vpop.f32.mrb[16].mxu0  ;;  %v1526_v29 = vld [vmem:[#allocation2 + $0x68] sm:$0xf] }
 0x222   : > { %v1166_v4 = vor.u32 %v1164_v34, %v1163_v50  ;;  %v1167_v37 = vrot.slane %v1163_v50, 4  ;;  %v1201_v48 = vshrl.u32 %v6135_v55, 16  ;;  %v1204_v60 = vshll.u32 %v6135_v55, 16  ;;  %v1709_v8 = vld [vmem:[#allocation2 + $0x38] sm:$0x1]  ;;  %v808_v21 = vpop.f32.mrb[17].mxu0 }
 0x223   : > { %v1830_v9 = vld [vmem:[#allocation2 + $0x3c] sm:$0x1]  ;;  %v1497_v10 = vsel %vm7343_vm3, %v1182_v43, %v1496_v39  ;;  %v1500_v12 = vsel %vm7352_vm6, %v1183_v62, %v1499_v49  ;;  %v1185_v14 = vshrl.u32 %v6133_v58, 16  ;;  %v1188_v16 = vshll.u32 %v6133_v58, 16  ;;  %v1529_v31 = vld [vmem:[#allocation2 + $0x6c] sm:$0x1] }
 0x224   : > { %v1710_v18 = vsel %vm7352_vm6, 0, %v1709_v8  ;;  %v1831_v59 = vsel %vm7364_vm7, 0, %v1830_v9  ;;  %v1703_v19 = vld [vmem:[#allocation2 + $0x28] sm:$0x1]  ;;  %v1824_v20 = vld [vmem:[#allocation2 + $0x2c] sm:$0x1]  ;;  %v1485_v22 = vsel %vm7343_vm3, %v1166_v4, %v1484_v54  ;;  %v1488_v25 = vsel %vm7352_vm6, %v1167_v37, %v1487_v1 }
 0x225   : > { %1498 = vst [vmem:[#allocation2 + $0x40] sm:$0xf] %v1497_v10  ;;  %1501 = vst [vmem:[#allocation2 + $0x44] sm:$0x1] %v1500_v12  ;;  %v1704_v32 = vsel %vm7352_vm6, 0, %v1703_v19  ;;  %v1825_v34 = vsel %vm7364_vm7, 0, %v1824_v20  ;;  %v6136_v40 = vpack.c.bf16 %v960_v3, %v960_v3  ;;  %v6134_v41 = vpack.c.bf16 %v958_v36, %v958_v36 }
 0x226   : > { %1711 = vst [vmem:[#allocation2 + $0x38] sm:$0x1] %v1710_v18  ;;  %1832 = vst [vmem:[#allocation2 + $0x3c] sm:$0x1] %v1831_v59  ;;  %v1203_v15 = vrot.slane %v1201_v48, 7  ;;  %v1187_v35 = vrot.slane %v1185_v14, 7  ;;  %v931_v49 = vadd.f32 %v7396_v17, %v892_v45  ;;  %v929_v50 = vadd.f32 %v7396_v17, %v890_v61 }
 0x227   : > { %1486 = vst [vmem:[#allocation2 + $0x30] sm:$0xf] %v1485_v22  ;;  %1489 = vst [vmem:[#allocation2 + $0x34] sm:$0x1] %v1488_v25  ;;  %v1514_v38 = vld [vmem:[#allocation2 + $0x58] sm:$0xf]  ;;  %v893_v25 = vmul.f32 %v7491_v46, %v7392_v13 }
 0x228   : > { %1705 = vst [vmem:[#allocation2 + $0x28] sm:$0x1] %v1704_v32  ;;  %1826 = vst [vmem:[#allocation2 + $0x2c] sm:$0x1] %v1825_v34  ;;  %v1517_v39 = vld [vmem:[#allocation2 + $0x5c] sm:$0x1]  ;;  %v1206_v55 = vor.u32 %v1204_v60, %v1203_v15  ;;  %v1190_v43 = vor.u32 %v1188_v16, %v1187_v35  ;;  %v894_v32 = vmul.f32 %v7392_v13, %v808_v21 }
 0x229   : > { %v7516_v54 = vpop.f32.mrb[18].mxu0  ;;  %v1207_v58 = vrot.slane %v1203_v15, 4  ;;  %v1191_v62 = vrot.slane %v1187_v35, 4  ;;  %v1209_v4 = vshrl.u32 %v6136_v40, 16  ;;  %v1212_v37 = vshll.u32 %v6136_v40, 16 }
 0x22a   : > { %v7518_v1 = vpop.f32.mrb[19].mxu0  ;;  %v1193_v48 = vshrl.u32 %v6134_v41, 16  ;;  %v1196_v8 = vshll.u32 %v6134_v41, 16  ;;  %v1527_v3 = vsel %vm7343_vm3, %v1206_v55, %v1526_v29  ;;  %v1515_v61 = vsel %vm7343_vm3, %v1190_v43, %v1514_v38  ;;  %v1532_v60 = vld [vmem:[#allocation2 + $0x70] sm:$0xf] }
 0x22b   : > { %v1530_v45 = vsel %vm7352_vm6, %v1207_v58, %v1529_v31  ;;  %v1518_v36 = vsel %vm7352_vm6, %v1191_v62, %v1517_v39  ;;  %v1520_v9 = vld [vmem:[#allocation2 + $0x60] sm:$0xf]  ;;  %1528 = vst [vmem:[#allocation2 + $0x68] sm:$0xf] %v1527_v3  ;;  %1516 = vst [vmem:[#allocation2 + $0x58] sm:$0xf] %v1515_v61  ;;  %v891_v29 = vmul.f32 %v7392_v13, %v7494_v42 }
 0x22c   : > { %1531 = vst [vmem:[#allocation2 + $0x6c] sm:$0x1] %v1530_v45  ;;  %1519 = vst [vmem:[#allocation2 + $0x5c] sm:$0x1] %v1518_v36  ;;  %v1211_v10 = vrot.slane %v1209_v4, 7  ;;  %v1195_v14 = vrot.slane %v1193_v48, 7  ;;  %v896_v31 = vmul.f32 %v7496_v7, %v7392_v13  ;;  %v932_v48 = vadd.f32 %v7396_v17, %v893_v25 }
 0x22d   : > { %v1535_v12 = vld [vmem:[#allocation2 + $0x74] sm:$0x1]  ;;  %v1523_v16 = vld [vmem:[#allocation2 + $0x64] sm:$0x1]  ;;  %v963_v18 = vmax.f32 %v931_v49, 0.0  ;;  %v961_v59 = vmax.f32 %v929_v50, 0.0 }
 0x22e   : > { %v7528_v19 = vpop.f32.mrb[20].mxu0  ;;  %v1712_v20 = vld [vmem:[#allocation2 + $0x40] sm:$0x1]  ;;  %v1833_v22 = vld [vmem:[#allocation2 + $0x44] sm:$0x1]  ;;  %v1214_v40 = vor.u32 %v1212_v37, %v1211_v10  ;;  %v1198_v46 = vor.u32 %v1196_v8, %v1195_v14  ;;  %v1215_v21 = vrot.slane %v1211_v10, 4  ;;  %v930_v8 = vadd.f32 %v7396_v17, %v891_v29 }
 0x22f   : > { %v7537_v34 = vpop.f32.mrb[21].mxu0  ;;  %v1713_v15 = vsel %vm7352_vm6, 0, %v1712_v20  ;;  %v1834_v35 = vsel %vm7364_vm7, 0, %v1833_v22  ;;  %v1706_v38 = vld [vmem:[#allocation2 + $0x30] sm:$0x1]  ;;  %v1199_v41 = vrot.slane %v1195_v14, 4  ;;  %v6139_v58 = vpack.c.bf16 %v963_v18, %v963_v18 }
 0x230   : > { %v1827_v39 = vld [vmem:[#allocation2 + $0x34] sm:$0x1]  ;;  %1714 = vst [vmem:[#allocation2 + $0x40] sm:$0x1] %v1713_v15  ;;  %1835 = vst [vmem:[#allocation2 + $0x44] sm:$0x1] %v1834_v35  ;;  %v1533_v50 = vsel %vm7343_vm3, %v1214_v40, %v1532_v60  ;;  %v1521_v55 = vsel %vm7343_vm3, %v1198_v46, %v1520_v9  ;;  %v6137_v43 = vpack.c.bf16 %v961_v59, %v961_v59 }
 0x231   : > { %v1707_v42 = vsel %vm7352_vm6, 0, %v1706_v38  ;;  %v1828_v7 = vsel %vm7364_vm7, 0, %v1827_v39  ;;  %v7547_v49 = vpop.f32.mrb[22].mxu0  ;;  %1534 = vst [vmem:[#allocation2 + $0x70] sm:$0xf] %v1533_v50  ;;  %v1536_v4 = vsel %vm7352_vm6, %v1215_v21, %v1535_v12  ;;  %v1524_v37 = vsel %vm7352_vm6, %v1199_v41, %v1523_v16 }
 0x232   : > { %1708 = vst [vmem:[#allocation2 + $0x30] sm:$0x1] %v1707_v42  ;;  %1829 = vst [vmem:[#allocation2 + $0x34] sm:$0x1] %v1828_v7  ;;  %v7553_v62 = vpop.f32.mrb[23].mxu0  ;;  %v1233_v3 = vshrl.u32 %v6139_v58, 16  ;;  %v935_v12 = vadd.f32 %v7396_v17, %v896_v31  ;;  %v933_v59 = vadd.f32 %v7396_v17, %v894_v32  ;;  %v7565_v16 = vmul.f32 %v7516_v54, %v7392_v13 }
 0x233   : > { %1522 = vst [vmem:[#allocation2 + $0x60] sm:$0xf] %v1521_v55  ;;  %1537 = vst [vmem:[#allocation2 + $0x74] sm:$0x1] %v1536_v4  ;;  %v1236_v45 = vshll.u32 %v6139_v58, 16  ;;  %v1217_v61 = vshrl.u32 %v6137_v43, 16  ;;  %v7569_v20 = vmul.f32 %v7392_v13, %v7518_v1 }
 0x234   : > { %1525 = vst [vmem:[#allocation2 + $0x64] sm:$0x1] %v1524_v37  ;;  %v1220_v36 = vshll.u32 %v6137_v43, 16  ;;  %v1727_v60 = vld [vmem:[#allocation2 + $0x68] sm:$0x1]  ;;  %v1235_v15 = vrot.slane %v1233_v3, 7 }
 0x235   : > { %v1848_v9 = vld [vmem:[#allocation2 + $0x6c] sm:$0x1]  ;;  %v1721_v10 = vld [vmem:[#allocation2 + $0x58] sm:$0x1]  ;;  %v1550_v14 = vld [vmem:[#allocation2 + $0x88] sm:$0xf] }
 0x236   : > { %v1553_v18 = vld [vmem:[#allocation2 + $0x8c] sm:$0x1]  ;;  %v1728_v22 = vsel %vm7352_vm6, 0, %v1727_v60  ;;  %v1849_v25 = vsel %vm7364_vm7, 0, %v1848_v9  ;;  %v1722_v29 = vsel %vm7352_vm6, 0, %v1721_v10  ;;  %v1219_v1 = vrot.slane %v1217_v61, 7 }
 0x237   : > { %v1842_v31 = vld [vmem:[#allocation2 + $0x5c] sm:$0x1]  ;;  %v1538_v32 = vld [vmem:[#allocation2 + $0x78] sm:$0xf]  ;;  %1729 = vst [vmem:[#allocation2 + $0x68] sm:$0x1] %v1728_v22  ;;  %v1238_v40 = vor.u32 %v1236_v45, %v1235_v15 }
 0x238   : > { %1850 = vst [vmem:[#allocation2 + $0x6c] sm:$0x1] %v1849_v25  ;;  %1723 = vst [vmem:[#allocation2 + $0x58] sm:$0x1] %v1722_v29  ;;  %v1843_v54 = vsel %vm7364_vm7, 0, %v1842_v31  ;;  %v964_v35 = vmax.f32 %v932_v48, 0.0  ;;  %v1222_v50 = vor.u32 %v1220_v36, %v1219_v1 }
 0x239   : > { %v962_v38 = vmax.f32 %v930_v8, 0.0  ;;  %v7579_v39 = vpop.f32.mrb[24].mxu0  ;;  %1844 = vst [vmem:[#allocation2 + $0x5c] sm:$0x1] %v1843_v54  ;;  %v1239_v46 = vrot.slane %v1235_v15, 4  ;;  %v967_v7 = vmax.f32 %v935_v12, 0.0  ;;  %v1551_v48 = vsel %vm7343_vm3, %v1238_v40, %v1550_v14 }
 0x23a   : > { %v1541_v42 = vld [vmem:[#allocation2 + $0x7c] sm:$0x1]  ;;  %v965_v21 = vmax.f32 %v933_v59, 0.0  ;;  %v7581_v41 = vpop.f32.mrb[25].mxu0  ;;  %v1223_v55 = vrot.slane %v1219_v1, 4  ;;  %v6140_v58 = vpack.c.bf16 %v964_v35, %v964_v35  ;;  %v1539_v14 = vsel %vm7343_vm3, %v1222_v50, %v1538_v32 }
 0x23b   : > { %v6138_v43 = vpack.c.bf16 %v962_v38, %v962_v38  ;;  %v7583_v4 = vpop.f32.mrb[26].mxu0  ;;  %v1730_v37 = vld [vmem:[#allocation2 + $0x70] sm:$0x1]  ;;  %v1724_v3 = vld [vmem:[#allocation2 + $0x60] sm:$0x1]  ;;  %v1554_v8 = vsel %vm7352_vm6, %v1239_v46, %v1553_v18  ;;  %v6143_v45 = vpack.c.bf16 %v967_v7, %v967_v7 }
 0x23c   : > { %v6141_v61 = vpack.c.bf16 %v965_v21, %v965_v21  ;;  %v7589_v60 = vpop.f32.mrb[27].mxu0  ;;  %v1731_v36 = vsel %vm7352_vm6, 0, %v1730_v37  ;;  %v1851_v9 = vld [vmem:[#allocation2 + $0x74] sm:$0x1]  ;;  %v1725_v10 = vsel %vm7352_vm6, 0, %v1724_v3  ;;  %v1542_v18 = vsel %vm7352_vm6, %v1223_v55, %v1541_v42 }
 0x23d   : > { %v1845_v12 = vld [vmem:[#allocation2 + $0x64] sm:$0x1]  ;;  %1552 = vst [vmem:[#allocation2 + $0x88] sm:$0xf] %v1551_v48  ;;  %1555 = vst [vmem:[#allocation2 + $0x8c] sm:$0x1] %v1554_v8  ;;  %v936_v21 = vadd.f32 %v7396_v17, %v7565_v16  ;;  %v934_v48 = vadd.f32 %v7396_v17, %v7569_v20 }
 0x23e   : > { %1732 = vst [vmem:[#allocation2 + $0x70] sm:$0x1] %v1731_v36  ;;  %v1852_v59 = vsel %vm7364_vm7, 0, %v1851_v9  ;;  %1726 = vst [vmem:[#allocation2 + $0x60] sm:$0x1] %v1725_v10  ;;  %v1846_v22 = vsel %vm7364_vm7, 0, %v1845_v12 }
 0x23f   : > { %1540 = vst [vmem:[#allocation2 + $0x78] sm:$0xf] %v1539_v14  ;;  %1543 = vst [vmem:[#allocation2 + $0x7c] sm:$0x1] %v1542_v18  ;;  %v1241_v25 = vshrl.u32 %v6140_v58, 16  ;;  %v1244_v29 = vshll.u32 %v6140_v58, 16 }
 0x240   : > { %1853 = vst [vmem:[#allocation2 + $0x74] sm:$0x1] %v1852_v59  ;;  %1847 = vst [vmem:[#allocation2 + $0x64] sm:$0x1] %v1846_v22  ;;  %v1556_v31 = vld [vmem:[#allocation2 + $0x90] sm:$0xf] }
 0x241   : > { %v1559_v15 = vld [vmem:[#allocation2 + $0x94] sm:$0x1]  ;;  %v1225_v32 = vshrl.u32 %v6138_v43, 16  ;;  %v1228_v54 = vshll.u32 %v6138_v43, 16  ;;  %v1265_v1 = vshrl.u32 %v6143_v45, 16  ;;  %v1268_v35 = vshll.u32 %v6143_v45, 16 }
 0x242   : > { %v1243_v38 = vrot.slane %v1241_v25, 7  ;;  %v1544_v40 = vld [vmem:[#allocation2 + $0x80] sm:$0xf]  ;;  %v1547_v46 = vld [vmem:[#allocation2 + $0x84] sm:$0x1]  ;;  %v1249_v42 = vshrl.u32 %v6141_v61, 16  ;;  %v900_v43 = vmul.f32 %v7528_v19, %v7392_v13 }
 0x243   : > { %v1252_v7 = vshll.u32 %v6141_v61, 16  ;;  %v7605_v50 = vpop.f32.mrb[28].mxu0  ;;  %v1227_v55 = vrot.slane %v1225_v32, 7  ;;  %v1267_v58 = vrot.slane %v1265_v1, 7  ;;  %v1586_v37 = vld [vmem:[#allocation2 + $0xb8] sm:$0xf] }
 0x244   : > { %v1589_v3 = vld [vmem:[#allocation2 + $0xbc] sm:$0x1]  ;;  %v7611_v8 = vpop.f32.mrb[29].mxu0  ;;  %v1246_v45 = vor.u32 %v1244_v29, %v1243_v38  ;;  %v1247_v36 = vrot.slane %v1243_v38, 4  ;;  %v1251_v61 = vrot.slane %v1249_v42, 7  ;;  %v968_v10 = vmax.f32 %v936_v21, 0.0 }
 0x245   : > { %v1574_v9 = vld [vmem:[#allocation2 + $0xa8] sm:$0xf]  ;;  %v7613_v16 = vpop.f32.mrb[30].mxu0  ;;  %v1230_v12 = vor.u32 %v1228_v54, %v1227_v55  ;;  %v1231_v14 = vrot.slane %v1227_v55, 4  ;;  %v1270_v18 = vor.u32 %v1268_v35, %v1267_v58  ;;  %v1271_v59 = vrot.slane %v1267_v58, 4 }
 0x246   : > { %v1577_v22 = vld [vmem:[#allocation2 + $0xac] sm:$0x1]  ;;  %v7615_v25 = vpop.f32.mrb[31].mxu0  ;;  %v1739_v20 = vld [vmem:[#allocation2 + $0x88] sm:$0x1]  ;;  %v1557_v19 = vsel %vm7343_vm3, %v1246_v45, %v1556_v31  ;;  %v1560_v29 = vsel %vm7352_vm6, %v1247_v36, %v1559_v15  ;;  %v1254_v1 = vor.u32 %v1252_v7, %v1251_v61  ;;  %v1255_v38 = vrot.slane %v1251_v61, 4 }
 0x247   : > { %v1860_v32 = vld [vmem:[#allocation2 + $0x8c] sm:$0x1]  ;;  %v1740_v42 = vsel %vm7352_vm6, 0, %v1739_v20  ;;  %v1733_v35 = vld [vmem:[#allocation2 + $0x78] sm:$0x1]  ;;  %v1545_v55 = vsel %vm7343_vm3, %v1230_v12, %v1544_v40  ;;  %v1548_v31 = vsel %vm7352_vm6, %v1231_v14, %v1547_v46  ;;  %v1587_v58 = vsel %vm7343_vm3, %v1270_v18, %v1586_v37 }
 0x248   : > { %v1861_v54 = vsel %vm7364_vm7, 0, %v1860_v32  ;;  %v1854_v21 = vld [vmem:[#allocation2 + $0x7c] sm:$0x1]  ;;  %1558 = vst [vmem:[#allocation2 + $0x90] sm:$0xf] %v1557_v19  ;;  %v1734_v15 = vsel %vm7352_vm6, 0, %v1733_v35  ;;  %v1590_v45 = vsel %vm7352_vm6, %v1271_v59, %v1589_v3  ;;  %v1575_v40 = vsel %vm7343_vm3, %v1254_v1, %v1574_v9 }
 0x249   : > { %1561 = vst [vmem:[#allocation2 + $0x94] sm:$0x1] %v1560_v29  ;;  %1741 = vst [vmem:[#allocation2 + $0x88] sm:$0x1] %v1740_v42  ;;  %v1855_v7 = vsel %vm7364_vm7, 0, %v1854_v21  ;;  %v1578_v46 = vsel %vm7352_vm6, %v1255_v38, %v1577_v22  ;;  %v6144_v36 = vpack.c.bf16 %v968_v10, %v968_v10  ;;  %v966_v61 = vmax.f32 %v934_v48, 0.0 }
 0x24a   : > { %1862 = vst [vmem:[#allocation2 + $0x8c] sm:$0x1] %v1861_v54  ;;  %1546 = vst [vmem:[#allocation2 + $0x80] sm:$0xf] %v1545_v55  ;;  %v939_v12 = vadd.f32 %v7396_v17, %v900_v43  ;;  %v898_v37 = vmul.f32 %v7392_v13, %v7537_v34  ;;  %v901_v3 = vmul.f32 %v7547_v49, %v7392_v13  ;;  %v1592_v32 = vld [vmem:[#allocation2 + $0xc0] sm:$0xf] }
 0x24b   : > { %1549 = vst [vmem:[#allocation2 + $0x84] sm:$0x1] %v1548_v31  ;;  %1735 = vst [vmem:[#allocation2 + $0x78] sm:$0x1] %v1734_v15  ;;  %v899_v14 = vmul.f32 %v7392_v13, %v7553_v62  ;;  %v1273_v18 = vshrl.u32 %v6144_v36, 16  ;;  %v1276_v9 = vshll.u32 %v6144_v36, 16  ;;  %v6142_v59 = vpack.c.bf16 %v966_v61, %v966_v61 }
 0x24c   : > { %1856 = vst [vmem:[#allocation2 + $0x7c] sm:$0x1] %v1855_v7  ;;  %1588 = vst [vmem:[#allocation2 + $0xb8] sm:$0xf] %v1587_v58  ;;  %v904_v10 = vmul.f32 %v7579_v39, %v7392_v13  ;;  %v971_v48 = vmax.f32 %v939_v12, 0.0  ;;  %v937_v22 = vadd.f32 %v7396_v17, %v898_v37  ;;  %v940_v43 = vadd.f32 %v7396_v17, %v901_v3 }
 0x24d   : > { %1591 = vst [vmem:[#allocation2 + $0xbc] sm:$0x1] %v1590_v45  ;;  %1576 = vst [vmem:[#allocation2 + $0xa8] sm:$0xf] %v1575_v40  ;;  %v7653_v20 = vadd.f32 %v7396_v17, %v899_v14  ;;  %v1275_v34 = vrot.slane %v1273_v18, 7  ;;  %v1257_v49 = vshrl.u32 %v6142_v59, 16  ;;  %v902_v54 = vmul.f32 %v7392_v13, %v7581_v41 }
 0x24e   : > { %1579 = vst [vmem:[#allocation2 + $0xac] sm:$0x1] %v1578_v46  ;;  %v1260_v19 = vshll.u32 %v6142_v59, 16  ;;  %v7656_v62 = vadd.f32 %v7396_v17, %v904_v10  ;;  %v6147_v38 = vpack.c.bf16 %v971_v48, %v971_v48  ;;  %v969_v42 = vmax.f32 %v937_v22, 0.0  ;;  %v1595_v7 = vld [vmem:[#allocation2 + $0xc4] sm:$0x1] }
 0x24f   : > { %v1742_v29 = vld [vmem:[#allocation2 + $0x90] sm:$0x1]  ;;  %v972_v39 = vmax.f32 %v940_v43, 0.0  ;;  %v1278_v15 = vor.u32 %v1276_v9, %v1275_v34  ;;  %v7666_v58 = vmul.f32 %v7583_v4, %v7392_v13  ;;  %v7679_v14 = vadd.f32 %v7396_v17, %v902_v54  ;;  %v1583_v22 = vld [vmem:[#allocation2 + $0xb4] sm:$0x1] }
 0x250   : > { %v1863_v1 = vld [vmem:[#allocation2 + $0x94] sm:$0x1]  ;;  %v1743_v35 = vsel %vm7352_vm6, 0, %v1742_v29  ;;  %v6145_v36 = vpack.c.bf16 %v969_v42, %v969_v42  ;;  %v1279_v59 = vrot.slane %v1275_v34, 4  ;;  %v1259_v10 = vrot.slane %v1257_v49, 7 }
 0x251   : > { %v1864_v21 = vsel %vm7364_vm7, 0, %v1863_v1  ;;  %v1736_v55 = vld [vmem:[#allocation2 + $0x80] sm:$0x1]  ;;  %1744 = vst [vmem:[#allocation2 + $0x90] sm:$0x1] %v1743_v35  ;;  %v6148_v61 = vpack.c.bf16 %v972_v39, %v972_v39  ;;  %v1593_v3 = vsel %vm7343_vm3, %v1278_v15, %v1592_v32  ;;  %v1297_v43 = vshrl.u32 %v6147_v38, 16 }
 0x252   : > { %v1857_v31 = vld [vmem:[#allocation2 + $0x84] sm:$0x1]  ;;  %1865 = vst [vmem:[#allocation2 + $0x94] sm:$0x1] %v1864_v21  ;;  %v1737_v45 = vsel %vm7352_vm6, 0, %v1736_v55  ;;  %v1300_v32 = vshll.u32 %v6147_v38, 16  ;;  %v1596_v1 = vsel %vm7352_vm6, %v1279_v59, %v1595_v7  ;;  %v1262_v42 = vor.u32 %v1260_v19, %v1259_v10 }
 0x253   : > { %v1858_v41 = vsel %vm7364_vm7, 0, %v1857_v31  ;;  %v1757_v40 = vld [vmem:[#allocation2 + $0xb8] sm:$0x1]  ;;  %1738 = vst [vmem:[#allocation2 + $0x80] sm:$0x1] %v1737_v45  ;;  %v1281_v29 = vshrl.u32 %v6145_v36, 16 }
 0x254   : > { %v1878_v46 = vld [vmem:[#allocation2 + $0xbc] sm:$0x1]  ;;  %1859 = vst [vmem:[#allocation2 + $0x84] sm:$0x1] %v1858_v41  ;;  %v1758_v12 = vsel %vm7352_vm6, 0, %v1757_v40  ;;  %v1284_v17 = vshll.u32 %v6145_v36, 16 }
 0x255   : > { %v1879_v13 = vsel %vm7364_vm7, 0, %v1878_v46  ;;  %v1751_v4 = vld [vmem:[#allocation2 + $0xa8] sm:$0x1]  ;;  %v1872_v37 = vld [vmem:[#allocation2 + $0xac] sm:$0x1]  ;;  %v1263_v39 = vrot.slane %v1259_v10, 4 }
 0x256   : > { %1759 = vst [vmem:[#allocation2 + $0xb8] sm:$0x1] %v1758_v12  ;;  %1880 = vst [vmem:[#allocation2 + $0xbc] sm:$0x1] %v1879_v13  ;;  %v1752_v18 = vsel %vm7352_vm6, 0, %v1751_v4  ;;  %v1873_v9 = vsel %vm7364_vm7, 0, %v1872_v37 }
 0x257   : > { %1594 = vst [vmem:[#allocation2 + $0xc0] sm:$0xf] %v1593_v3  ;;  %v1580_v48 = vld [vmem:[#allocation2 + $0xb0] sm:$0xf]  ;;  %1753 = vst [vmem:[#allocation2 + $0xa8] sm:$0x1] %v1752_v18  ;;  %v1584_v38 = vsel %vm7352_vm6, %v1263_v39, %v1583_v22 }
 0x258   : > { %1874 = vst [vmem:[#allocation2 + $0xac] sm:$0x1] %v1873_v9  ;;  %v1610_v54 = vld [vmem:[#allocation2 + $0xd8] sm:$0xf]  ;;  %v1305_v35 = vshrl.u32 %v6148_v61, 16  ;;  %v1299_v21 = vrot.slane %v1297_v43, 7  ;;  %v1581_v15 = vsel %vm7343_vm3, %v1262_v42, %v1580_v48 }
 0x259   : > { %1597 = vst [vmem:[#allocation2 + $0xc4] sm:$0x1] %v1596_v1  ;;  %v1613_v34 = vld [vmem:[#allocation2 + $0xdc] sm:$0x1]  ;;  %v1283_v55 = vrot.slane %v1281_v29, 7  ;;  %v1308_v49 = vshll.u32 %v6148_v61, 16 }
 0x25a   : > { %v970_v31 = vmax.f32 %v7653_v20, 0.0  ;;  %v1598_v45 = vld [vmem:[#allocation2 + $0xc8] sm:$0xf]  ;;  %v1601_v41 = vld [vmem:[#allocation2 + $0xcc] sm:$0x1]  ;;  %v1307_v7 = vrot.slane %v1305_v35, 7  ;;  %v1302_v40 = vor.u32 %v1300_v32, %v1299_v21 }
 0x25b   : > { %v975_v19 = vmax.f32 %v7656_v62, 0.0  ;;  %1582 = vst [vmem:[#allocation2 + $0xb0] sm:$0xf] %v1581_v15  ;;  %1585 = vst [vmem:[#allocation2 + $0xb4] sm:$0x1] %v1584_v38  ;;  %v1303_v46 = vrot.slane %v1299_v21, 4  ;;  %v1286_v36 = vor.u32 %v1284_v17, %v1283_v55 }
 0x25c   : > { %v1287_v12 = vrot.slane %v1283_v55, 4  ;;  %v1616_v61 = vld [vmem:[#allocation2 + $0xe0] sm:$0xf]  ;;  %v1619_v13 = vld [vmem:[#allocation2 + $0xe4] sm:$0x1]  ;;  %v1310_v20 = vor.u32 %v1308_v49, %v1307_v7  ;;  %v1311_v4 = vrot.slane %v1307_v7, 4  ;;  %v6146_v37 = vpack.c.bf16 %v970_v31, %v970_v31 }
 0x25d   : > { %v6151_v3 = vpack.c.bf16 %v975_v19, %v975_v19  ;;  %v1611_v9 = vsel %vm7343_vm3, %v1302_v40, %v1610_v54  ;;  %v1614_v59 = vsel %vm7352_vm6, %v1303_v46, %v1613_v34  ;;  %v1599_v62 = vsel %vm7343_vm3, %v1286_v36, %v1598_v45  ;;  %v1604_v17 = vld [vmem:[#allocation2 + $0xd0] sm:$0xf]  ;;  %v1607_v21 = vld [vmem:[#allocation2 + $0xd4] sm:$0x1]  ;;  %v1646_v45 = vld [vmem:[#allocation2 + $0x108] sm:$0xf] }
 0x25e   : > { %v1760_v18 = vld [vmem:[#allocation2 + $0xc0] sm:$0x1]  ;;  %v1602_v10 = vsel %vm7352_vm6, %v1287_v12, %v1601_v41  ;;  %1612 = vst [vmem:[#allocation2 + $0xd8] sm:$0xf] %v1611_v9  ;;  %1615 = vst [vmem:[#allocation2 + $0xdc] sm:$0x1] %v1614_v59  ;;  %v1617_v22 = vsel %vm7343_vm3, %v1310_v20, %v1616_v61  ;;  %v1620_v43 = vsel %vm7352_vm6, %v1311_v4, %v1619_v13 }
 0x25f   : > { %v1761_v48 = vsel %vm7352_vm6, 0, %v1760_v18  ;;  %1600 = vst [vmem:[#allocation2 + $0xc8] sm:$0xf] %v1599_v62  ;;  %1603 = vst [vmem:[#allocation2 + $0xcc] sm:$0x1] %v1602_v10  ;;  %v1289_v32 = vshrl.u32 %v6146_v37, 16 }
 0x260   : > { %1762 = vst [vmem:[#allocation2 + $0xc0] sm:$0x1] %v1761_v48  ;;  %1618 = vst [vmem:[#allocation2 + $0xe0] sm:$0xf] %v1617_v22  ;;  %v1292_v29 = vshll.u32 %v6146_v37, 16  ;;  %v1329_v1 = vshrl.u32 %v6151_v3, 16 }
 0x261   : > { %1621 = vst [vmem:[#allocation2 + $0xe4] sm:$0x1] %v1620_v43  ;;  %v1332_v42 = vshll.u32 %v6151_v3, 16  ;;  %v973_v39 = vmax.f32 %v7679_v14, 0.0  ;;  %v1881_v54 = vld [vmem:[#allocation2 + $0xc4] sm:$0x1] }
 0x262   : > { %v1291_v35 = vrot.slane %v1289_v32, 7  ;;  %v7708_v34 = vld [vmem:[#allocation9] ss:$0 sm:$0xff]  ;;  %v7712_v49 = vld [vmem:[#allocation8] ss:$0 sm:$0xff]  ;;  %v1882_v38 = vsel %vm7364_vm7, 0, %v1881_v54 }
 0x263   : > { %v944_v55 = vadd.f32 %v7708_v34, %v7666_v58  ;;  %v903_v31 = vmul.f32 %v7712_v49, %v7589_v60  ;;  %v908_v15 = vmul.f32 %v7712_v49, %v7605_v50  ;;  %v1331_v14 = vrot.slane %v1329_v1, 7  ;;  %v1649_v41 = vld [vmem:[#allocation2 + $0x10c] sm:$0x1]  ;;  %1883 = vst [vmem:[#allocation2 + $0xc4] sm:$0x1] %v1882_v38 }
 0x264   : > { %v6149_v7 = vpack.c.bf16 %v973_v39, %v973_v39  ;;  %v906_v19 = vmul.f32 %v7712_v49, %v7611_v8  ;;  %v1754_v58 = vld [vmem:[#allocation2 + $0xb0] sm:$0x1]  ;;  %v1875_v40 = vld [vmem:[#allocation2 + $0xb4] sm:$0x1]  ;;  %v1294_v46 = vor.u32 %v1292_v29, %v1291_v35  ;;  %v1295_v36 = vrot.slane %v1291_v35, 4 }
 0x265   : > { %v976_v12 = vmax.f32 %v944_v55, 0.0  ;;  %v942_v60 = vadd.f32 %v7708_v34, %v903_v31  ;;  %v1755_v50 = vsel %vm7352_vm6, 0, %v1754_v58  ;;  %v1876_v61 = vsel %vm7364_vm7, 0, %v1875_v40  ;;  %v1769_v18 = vld [vmem:[#allocation2 + $0xd8] sm:$0x1] }
 0x266   : > { %v1334_v13 = vor.u32 %v1332_v42, %v1331_v14  ;;  %v1335_v20 = vrot.slane %v1331_v14, 4  ;;  %1756 = vst [vmem:[#allocation2 + $0xb0] sm:$0x1] %v1755_v50  ;;  %1877 = vst [vmem:[#allocation2 + $0xb4] sm:$0x1] %v1876_v61  ;;  %v1605_v8 = vsel %vm7343_vm3, %v1294_v46, %v1604_v17  ;;  %v1608_v4 = vsel %vm7352_vm6, %v1295_v36, %v1607_v21 }
 0x267   : > { %v1313_v37 = vshrl.u32 %v6149_v7, 16  ;;  %v1316_v3 = vshll.u32 %v6149_v7, 16  ;;  %v1890_v9 = vld [vmem:[#allocation2 + $0xdc] sm:$0x1]  ;;  %v1763_v59 = vld [vmem:[#allocation2 + $0xc8] sm:$0x1]  ;;  %v6152_v43 = vpack.c.bf16 %v976_v12, %v976_v12  ;;  %v947_v32 = vadd.f32 %v7708_v34, %v908_v15 }
 0x268   : > { %1606 = vst [vmem:[#allocation2 + $0xd0] sm:$0xf] %v1605_v8  ;;  %1609 = vst [vmem:[#allocation2 + $0xd4] sm:$0x1] %v1608_v4  ;;  %v1647_v62 = vsel %vm7343_vm3, %v1334_v13, %v1646_v45  ;;  %v1650_v10 = vsel %vm7352_vm6, %v1335_v20, %v1649_v41  ;;  %v1634_v48 = vld [vmem:[#allocation2 + $0xf8] sm:$0xf]  ;;  %v945_v31 = vadd.f32 %v7708_v34, %v906_v19 }
 0x269   : > { %v1637_v22 = vld [vmem:[#allocation2 + $0xfc] sm:$0x1]  ;;  %v1770_v29 = vsel %vm7352_vm6, 0, %v1769_v18  ;;  %v1891_v17 = vsel %vm7364_vm7, 0, %v1890_v9  ;;  %v1764_v1 = vsel %vm7352_vm6, 0, %v1763_v59  ;;  %v1315_v39 = vrot.slane %v1313_v37, 7 }
 0x26a   : > { %v1884_v42 = vld [vmem:[#allocation2 + $0xcc] sm:$0x1]  ;;  %1648 = vst [vmem:[#allocation2 + $0x108] sm:$0xf] %v1647_v62  ;;  %1651 = vst [vmem:[#allocation2 + $0x10c] sm:$0x1] %v1650_v10  ;;  %v909_v15 = vmul.f32 %v7712_v49, %v7613_v16  ;;  %v907_v59 = vmul.f32 %v7712_v49, %v7615_v25 }
 0x26b   : > { %1771 = vst [vmem:[#allocation2 + $0xd8] sm:$0x1] %v1770_v29  ;;  %1892 = vst [vmem:[#allocation2 + $0xdc] sm:$0x1] %v1891_v17  ;;  %v1885_v54 = vsel %vm7364_vm7, 0, %v1884_v42  ;;  %v1337_v55 = vshrl.u32 %v6152_v43, 16  ;;  %v1318_v45 = vor.u32 %v1316_v3, %v1315_v39 }
 0x26c   : > { %1765 = vst [vmem:[#allocation2 + $0xc8] sm:$0x1] %v1764_v1  ;;  %v1772_v35 = vld [vmem:[#allocation2 + $0xe0] sm:$0x1]  ;;  %v1893_v21 = vld [vmem:[#allocation2 + $0xe4] sm:$0x1]  ;;  %v948_v13 = vadd.f32 %v7708_v34, %v909_v15 }
 0x26d   : > { %1886 = vst [vmem:[#allocation2 + $0xcc] sm:$0x1] %v1885_v54  ;;  %v1773_v38 = vsel %vm7352_vm6, 0, %v1772_v35  ;;  %v1894_v14 = vsel %vm7364_vm7, 0, %v1893_v21  ;;  %v1319_v41 = vrot.slane %v1315_v39, 4  ;;  %v1339_v7 = vrot.slane %v1337_v55, 7 }
 0x26e   : > { %1774 = vst [vmem:[#allocation2 + $0xe0] sm:$0x1] %v1773_v38  ;;  %1895 = vst [vmem:[#allocation2 + $0xe4] sm:$0x1] %v1894_v14  ;;  %v1340_v58 = vshll.u32 %v6152_v43, 16  ;;  %v974_v40 = vmax.f32 %v942_v60, 0.0  ;;  %v1635_v16 = vsel %vm7343_vm3, %v1318_v45, %v1634_v48 }
 0x26f   : > { %v979_v46 = vmax.f32 %v947_v32, 0.0  ;;  %v7751_v36 = vld [vmem:[#allocation2 + $0x8] sm:$0xf]  ;;  %v1638_v19 = vsel %vm7352_vm6, %v1319_v41, %v1637_v22  ;;  %v1652_v12 = vld [vmem:[#allocation2 + $0x110] sm:$0xf]  ;;  %v977_v61 = vmax.f32 %v945_v31, 0.0  ;;  %v946_v41 = vadd.f32 %v7708_v34, %v907_v59 }
 0x270   : > { %v1655_v50 = vld [vmem:[#allocation2 + $0x114] sm:$0x1]  ;;  %1636 = vst [vmem:[#allocation2 + $0xf8] sm:$0xf] %v1635_v16  ;;  %1639 = vst [vmem:[#allocation2 + $0xfc] sm:$0x1] %v1638_v19  ;;  %v1342_v20 = vor.u32 %v1340_v58, %v1339_v7  ;;  %v6150_v4 = vpack.c.bf16 %v974_v40, %v974_v40  ;;  %v1972_v62 = vmul.bf16 %v7383_v6, %v7751_v36 }
 0x271   : > { %v1343_v8 = vrot.slane %v1339_v7, 4  ;;  %v6155_v60 = vpack.c.bf16 %v979_v46, %v979_v46  ;;  %v1766_v37 = vld [vmem:[#allocation2 + $0xd0] sm:$0x1]  ;;  %v1887_v3 = vld [vmem:[#allocation2 + $0xd4] sm:$0x1]  ;;  %v6153_v18 = vpack.c.bf16 %v977_v61, %v977_v61  ;;  %v980_v9 = vmax.f32 %v948_v13, 0.0 }
 0x272   : > { %v7762_v10 = vld [vmem:[#allocation2 + $0x8] sm:$0xe]  ;;  %v1767_v48 = vsel %vm7352_vm6, 0, %v1766_v37  ;;  %v1888_v22 = vsel %vm7364_vm7, 0, %v1887_v3  ;;  %v1787_v43 = vld [vmem:[#allocation2 + $0x108] sm:$0x1]  ;;  %v1653_v29 = vsel %vm7343_vm3, %v1342_v20, %v1652_v12  ;;  %v2048_v7 = vmul.bf16 %v7376_v51, %v7751_v36 }
 0x273   : > { %v1908_v32 = vld [vmem:[#allocation2 + $0x10c] sm:$0x1]  ;;  %v1656_v17 = vsel %vm7352_vm6, %v1343_v8, %v1655_v50  ;;  %1768 = vst [vmem:[#allocation2 + $0xd0] sm:$0x1] %v1767_v48  ;;  %1889 = vst [vmem:[#allocation2 + $0xd4] sm:$0x1] %v1888_v22  ;;  %v6156_v45 = vpack.c.bf16 %v980_v9, %v980_v9  ;;  %v2667_v12 = vmul.bf16 %v7381_v5, %v7762_v10 }
 0x274   : > { %v1788_v25 = vsel %vm7352_vm6, 0, %v1787_v43  ;;  %v1909_v49 = vsel %vm7364_vm7, 0, %v1908_v32  ;;  %1654 = vst [vmem:[#allocation2 + $0x110] sm:$0xf] %v1653_v29  ;;  %1657 = vst [vmem:[#allocation2 + $0x114] sm:$0x1] %v1656_v17 }
 0x275   : > { %v1321_v1 = vshrl.u32 %v6150_v4, 16  ;;  %v1324_v42 = vshll.u32 %v6150_v4, 16  ;;  %v7776_v39 = vld [vmem:[#allocation2 + $0xc] sm:$0x1]  ;;  %1789 = vst [vmem:[#allocation2 + $0x108] sm:$0x1] %v1788_v25 }
 0x276   : > { %1910 = vst [vmem:[#allocation2 + $0x10c] sm:$0x1] %v1909_v49  ;;  %v1640_v54 = vld [vmem:[#allocation2 + $0x100] sm:$0xf]  ;;  %v1361_v35 = vshrl.u32 %v6155_v60, 16  ;;  %v1364_v21 = vshll.u32 %v6155_v60, 16  ;;  %v2049_v19 = vmul.bf16 %v7376_v51, %v7776_v39  ;;  %v2668_v34 = vmul.bf16 %v7381_v5, %v7776_v39 }
 0x277   : > { %v1345_v55 = vshrl.u32 %v6153_v18, 16  ;;  %v1348_v31 = vshll.u32 %v6153_v18, 16  ;;  %v1323_v15 = vrot.slane %v1321_v1, 7  ;;  %v1643_v38 = vld [vmem:[#allocation2 + $0x104] sm:$0x1]  ;;  %v1369_v8 = vshrl.u32 %v6156_v45, 16 }
 0x278   : > { %v1670_v14 = vld [vmem:[#allocation2 + $0x128] sm:$0xf]  ;;  %v1363_v58 = vrot.slane %v1361_v35, 7  ;;  %v1673_v40 = vld [vmem:[#allocation2 + $0x12c] sm:$0x1]  ;;  %v1372_v25 = vshll.u32 %v6156_v45, 16 }
 0x279   : > { %v1347_v46 = vrot.slane %v1345_v55, 7  ;;  %v1658_v16 = vld [vmem:[#allocation2 + $0x118] sm:$0xf]  ;;  %v1902_v61 = vld [vmem:[#allocation2 + $0xfc] sm:$0x1]  ;;  %v1326_v13 = vor.u32 %v1324_v42, %v1323_v15  ;;  %v1327_v20 = vrot.slane %v1323_v15, 4 }
 0x27a   : > { %v1781_v50 = vld [vmem:[#allocation2 + $0xf8] sm:$0x1]  ;;  %v1903_v60 = vsel %vm7364_vm7, 0, %v1902_v61  ;;  %v1366_v37 = vor.u32 %v1364_v21, %v1363_v58  ;;  %v1367_v3 = vrot.slane %v1363_v58, 4  ;;  %v1661_v18 = vld [vmem:[#allocation2 + $0x11c] sm:$0x1] }
 0x27b   : > { %v1782_v4 = vsel %vm7352_vm6, 0, %v1781_v50  ;;  %1904 = vst [vmem:[#allocation2 + $0xfc] sm:$0x1] %v1903_v60  ;;  %v1641_v9 = vsel %vm7343_vm3, %v1326_v13, %v1640_v54  ;;  %v1644_v59 = vsel %vm7352_vm6, %v1327_v20, %v1643_v38  ;;  %v1350_v10 = vor.u32 %v1348_v31, %v1347_v46  ;;  %v1790_v22 = vld [vmem:[#allocation2 + $0x110] sm:$0x1] }
 0x27c   : > { %1783 = vst [vmem:[#allocation2 + $0xf8] sm:$0x1] %v1782_v4  ;;  %v1351_v48 = vrot.slane %v1347_v46, 4  ;;  %v1911_v43 = vld [vmem:[#allocation2 + $0x114] sm:$0x1]  ;;  %v1671_v32 = vsel %vm7343_vm3, %v1366_v37, %v1670_v14  ;;  %v1674_v29 = vsel %vm7352_vm6, %v1367_v3, %v1673_v40  ;;  %v1371_v17 = vrot.slane %v1369_v8, 7 }
 0x27d   : > { %1642 = vst [vmem:[#allocation2 + $0x100] sm:$0xf] %v1641_v9  ;;  %1645 = vst [vmem:[#allocation2 + $0x104] sm:$0x1] %v1644_v59  ;;  %v1791_v49 = vsel %vm7352_vm6, 0, %v1790_v22  ;;  %v1912_v1 = vsel %vm7364_vm7, 0, %v1911_v43  ;;  %v1659_v42 = vsel %vm7343_vm3, %v1350_v10, %v1658_v16 }
 0x27e   : > { %1672 = vst [vmem:[#allocation2 + $0x128] sm:$0xf] %v1671_v32  ;;  %1675 = vst [vmem:[#allocation2 + $0x12c] sm:$0x1] %v1674_v29  ;;  %v1662_v39 = vsel %vm7352_vm6, %v1351_v48, %v1661_v18  ;;  %v1676_v54 = vld [vmem:[#allocation2 + $0x130] sm:$0xf]  ;;  %v1374_v21 = vor.u32 %v1372_v25, %v1371_v17 }
 0x27f   : > { %v1679_v35 = vld [vmem:[#allocation2 + $0x134] sm:$0x1]  ;;  %1792 = vst [vmem:[#allocation2 + $0x110] sm:$0x1] %v1791_v49  ;;  %1913 = vst [vmem:[#allocation2 + $0x114] sm:$0x1] %v1912_v1 }
 0x280   : > { %1660 = vst [vmem:[#allocation2 + $0x118] sm:$0xf] %v1659_v42  ;;  %1663 = vst [vmem:[#allocation2 + $0x11c] sm:$0x1] %v1662_v39  ;;  %v1375_v55 = vrot.slane %v1371_v17, 4  ;;  %v978_v31 = vmax.f32 %v946_v41, 0.0  ;;  %v1677_v16 = vsel %vm7343_vm3, %v1374_v21, %v1676_v54 }
 0x281   : > { %v2128_v15 = vshrl.u32 %v2048_v7, 16  ;;  %v2989_v38 = vld [vmem:[#allocation2 + $0x8] sm:$0xf]  ;;  %v2131_v14 = vshll.u32 %v2048_v7, 16  ;;  %v2137_v45 = vshll.u32 %v2049_v19, 16  ;;  %v7807_v58 = vrot.slane %v2667_v12, 9 }
 0x282   : > { %v7809_v40 = vrot.slane %v2668_v34, 5  ;;  %v7811_v46 = vld [vmem:[#allocation2 + $0x10] sm:$0xf]  ;;  %v1680_v50 = vsel %vm7352_vm6, %v1375_v55, %v1679_v35  ;;  %v6154_v61 = vpack.c.bf16 %v978_v31, %v978_v31  ;;  %v7817_v20 = vld [vmem:[#allocation2 + $0xc] sm:$0x1]  ;;  %v3025_v12 = vmul.bf16 %v7422_v52, %v2989_v38 }
 0x283   : > { %v2130_v13 = vrot.slane %v2128_v15, 4  ;;  %1678 = vst [vmem:[#allocation2 + $0x130] sm:$0xf] %v1677_v16  ;;  %1681 = vst [vmem:[#allocation2 + $0x134] sm:$0x1] %v1680_v50  ;;  %v2133_v41 = vrot.slane %v2131_v14, 5  ;;  %v3026_v37 = vmul.bf16 %v7422_v52, %v7811_v46  ;;  %v3129_v3 = vmul.bf16 %v7424_v53, %v2989_v38 }
 0x284   : > { %v2139_v7 = vrot.slane %v2137_v45, 5  ;;  %v2803_v19 = vsel %vm7402_vm13, %v7807_v58, %v7809_v40  ;;  %v7824_v8 = vld [vmem:[#allocation2 + $0x14] sm:$0x1]  ;;  %v7826_v34 = vld [vmem:[#allocation2 + $0x8] sm:$0xe]  ;;  %v1353_v4 = vshrl.u32 %v6154_v61, 16  ;;  %v7834_v48 = vadd.bf16 %v3025_v12, %v7426_v56 }
 0x285   : > { %v1356_v60 = vshll.u32 %v6154_v61, 16  ;;  %v7831_v18 = vld [vmem:[#allocation2 + $0x10] sm:$0xe]  ;;  %v1784_v9 = vld [vmem:[#allocation2 + $0x100] sm:$0x1]  ;;  %v2134_v10 = vor.u32 %v2133_v41, %v2130_v13  ;;  %v3130_v22 = vmul.bf16 %v7424_v53, %v7817_v20  ;;  %v3131_v43 = vmul.bf16 %v7424_v53, %v7811_v46 }
 0x286   : > { %v1905_v59 = vld [vmem:[#allocation2 + $0x104] sm:$0x1]  ;;  %v1785_v32 = vsel %vm7352_vm6, 0, %v1784_v9  ;;  %v1799_v17 = vld [vmem:[#allocation2 + $0x128] sm:$0x1]  ;;  %v3132_v49 = vmul.bf16 %v7424_v53, %v7824_v8  ;;  %v3745_v56 = vmul.bf16 %v7418_v47, %v7826_v34  ;;  %v3746_v35 = vmul.bf16 %v7418_v47, %v7817_v20 }
 0x287   : > { %v1906_v29 = vsel %vm7364_vm7, 0, %v1905_v59  ;;  %v1920_v25 = vld [vmem:[#allocation2 + $0x12c] sm:$0x1]  ;;  %1786 = vst [vmem:[#allocation2 + $0x100] sm:$0x1] %v1785_v32  ;;  %v1800_v1 = vsel %vm7352_vm6, 0, %v1799_v17  ;;  %v3747_v21 = vmul.bf16 %v7418_v47, %v7831_v18 }
 0x288   : > { %1907 = vst [vmem:[#allocation2 + $0x104] sm:$0x1] %v1906_v29  ;;  %v1921_v42 = vsel %vm7364_vm7, 0, %v1920_v25  ;;  %v1793_v39 = vld [vmem:[#allocation2 + $0x118] sm:$0x1]  ;;  %v1355_v15 = vrot.slane %v1353_v4, 7 }
 0x289   : > { %v1914_v54 = vld [vmem:[#allocation2 + $0x11c] sm:$0x1]  ;;  %1801 = vst [vmem:[#allocation2 + $0x128] sm:$0x1] %v1800_v1  ;;  %1922 = vst [vmem:[#allocation2 + $0x12c] sm:$0x1] %v1921_v42 }
 0x28a   : > { %v1794_v55 = vsel %vm7352_vm6, 0, %v1793_v39  ;;  %v1915_v31 = vsel %vm7364_vm7, 0, %v1914_v54  ;;  %v1664_v38 = vld [vmem:[#allocation2 + $0x120] sm:$0xf]  ;;  %v2135_v14 = vrot.slane %v2134_v10, 4  ;;  %v3194_v58 = vshrl.u32 %v3129_v3, 16 }
 0x28b   : > { %1795 = vst [vmem:[#allocation2 + $0x118] sm:$0x1] %v1794_v55  ;;  %1916 = vst [vmem:[#allocation2 + $0x11c] sm:$0x1] %v1915_v31  ;;  %v1667_v45 = vld [vmem:[#allocation2 + $0x124] sm:$0x1]  ;;  %v1358_v20 = vor.u32 %v1356_v60, %v1355_v15 }
 0x28c   : > { %v3197_v40 = vshll.u32 %v3129_v3, 16  ;;  %v3203_v16 = vshll.u32 %v3130_v22, 16  ;;  %v3208_v50 = vshrl.u32 %v3131_v43, 16  ;;  %v1802_v61 = vld [vmem:[#allocation2 + $0x130] sm:$0x1]  ;;  %v1359_v41 = vrot.slane %v1355_v15, 4 }
 0x28d   : > { %v1923_v13 = vld [vmem:[#allocation2 + $0x134] sm:$0x1]  ;;  %v2140_v12 = vsel %vm7387_vm10, %v2135_v14, %v2139_v7  ;;  %v3211_v34 = vshll.u32 %v3131_v43, 16  ;;  %v1803_v4 = vsel %vm7352_vm6, 0, %v1802_v61  ;;  %v3196_v9 = vrot.slane %v3194_v58, 4 }
 0x28e   : > { %v1924_v18 = vsel %vm7364_vm7, 0, %v1923_v13  ;;  %v2594_v3 = vadd.bf16 %v2140_v12, %v1972_v62  ;;  %1804 = vst [vmem:[#allocation2 + $0x130] sm:$0x1] %v1803_v4  ;;  %v1665_v60 = vsel %vm7343_vm3, %v1358_v20, %v1664_v38  ;;  %v1668_v7 = vsel %vm7352_vm6, %v1359_v41, %v1667_v45  ;;  %v4066_v17 = vld [vmem:[#allocation2 + $0x10] sm:$0xf] }
 0x28f   : > { %1925 = vst [vmem:[#allocation2 + $0x134] sm:$0x1] %v1924_v18  ;;  %v3199_v59 = vrot.slane %v3197_v40, 5  ;;  %v3205_v10 = vrot.slane %v3203_v16, 5  ;;  %1666 = vst [vmem:[#allocation2 + $0x120] sm:$0xf] %v1665_v60  ;;  %v3748_v62 = vmul.bf16 %v7418_v47, %v7824_v8  ;;  %v4102_v45 = vmul.bf16 %v7430_v63, %v4066_v17 }
 0x290   : > { %1669 = vst [vmem:[#allocation2 + $0x124] sm:$0x1] %v1668_v7  ;;  %v2957_v22 = vadd.bf16 %v2803_v19, %v2594_v3  ;;  %v3210_v43 = vrot.slane %v3208_v50, 4  ;;  %v3213_v32 = vrot.slane %v3211_v34, 5  ;;  %v3217_v29 = vshll.u32 %v3132_v49, 16 }
 0x291   : > { %v3200_v36 = vor.u32 %v3199_v59, %v3196_v9  ;;  %v6039_v25 = vrot.slane %v3745_v56, 9  ;;  %v3875_v1 = vrot.slane %v3746_v35, 5  ;;  %v4067_v42 = vld [vmem:[#allocation2 + $0x18] sm:$0xf]  ;;  %v4166_v39 = vld [vmem:[#allocation2 + $0x14] sm:$0x1]  ;;  %v4206_v35 = vmul.bf16 %v7432_v0, %v4066_v17 }
 0x292   : > { %v3058_v54 = vadd.bf16 %v3026_v37, %v2957_v22  ;;  %v3214_v55 = vor.u32 %v3213_v32, %v3210_v43  ;;  %v3219_v31 = vrot.slane %v3217_v29, 5  ;;  %v6040_v15 = vrot.slane %v3747_v21, 9  ;;  %v4167_v19 = vld [vmem:[#allocation2 + $0x1c] sm:$0x1]  ;;  %v4782_v46 = vld [vmem:[#allocation2 + $0x10] sm:$0xe] }
 0x293   : > { %v3201_v38 = vrot.slane %v3200_v36, 4  ;;  %v3876_v49 = vsel %vm7402_vm13, %v6039_v25, %v3875_v1  ;;  %v3879_v14 = vrot.slane %v3748_v62, 5  ;;  %v4103_v56 = vmul.bf16 %v7430_v63, %v4067_v42  ;;  %v7899_v25 = vld [vmem:[#allocation2 + $0x10] sm:$0xf] }
 0x294   : > { %v3215_v8 = vrot.slane %v3214_v55, 4  ;;  %v4207_v58 = vmul.bf16 %v7432_v0, %v4166_v39  ;;  %v4208_v40 = vmul.bf16 %v7432_v0, %v4067_v42  ;;  %v4209_v16 = vmul.bf16 %v7432_v0, %v4167_v19 }
 0x295   : > { %v3206_v37 = vsel %vm7387_vm10, %v3201_v38, %v3205_v10  ;;  %v3880_v21 = vsel %vm7402_vm13, %v6040_v15, %v3879_v14  ;;  %v4271_v13 = vshrl.u32 %v4206_v35, 16  ;;  %v4274_v20 = vshll.u32 %v4206_v35, 16  ;;  %v4783_v10 = vld [vmem:[#allocation2 + $0x18] sm:$0xe]  ;;  %v3020_v33 = vld [vmem:[#allocation2 + $0x130] sm:$0xf] }
 0x296   : > { %v3220_v50 = vsel %vm7387_vm10, %v3215_v8, %v3219_v31  ;;  %v3673_v61 = vadd.bf16 %v3206_v37, %v7834_v48  ;;  %v1796_v41 = vld [vmem:[#allocation2 + $0x120] sm:$0x1]  ;;  %v4280_v4 = vshll.u32 %v4207_v58, 16  ;;  %v4285_v18 = vshrl.u32 %v4208_v40, 16  ;;  %v7903_v31 = vld [vmem:[#allocation2 + $0x18] sm:$0xf] }
 0x297   : > { %v1917_v12 = vld [vmem:[#allocation2 + $0x124] sm:$0x1]  ;;  %v3674_v34 = vadd.bf16 %v3220_v50, %v3058_v54  ;;  %v4822_v3 = vmul.bf16 %v7428_v57, %v4782_v46  ;;  %v1797_v9 = vsel %vm7352_vm6, 0, %v1796_v41  ;;  %v4273_v59 = vrot.slane %v4271_v13, 4  ;;  %v2005_v8 = vld [vmem:[#allocation2 + $0x14] sm:$0x1] }
 0x298   : > { %v1918_v60 = vsel %vm7364_vm7, 0, %v1917_v12  ;;  %v4033_v7 = vadd.bf16 %v3876_v49, %v3673_v61  ;;  %1798 = vst [vmem:[#allocation2 + $0x120] sm:$0x1] %v1797_v9  ;;  %v4276_v22 = vrot.slane %v4274_v20, 5  ;;  %v4282_v43 = vrot.slane %v4280_v4, 5 }
 0x299   : > { %1919 = vst [vmem:[#allocation2 + $0x124] sm:$0x1] %v1918_v60  ;;  %v4034_v48 = vadd.bf16 %v3880_v21, %v3674_v34  ;;  %v4287_v32 = vrot.slane %v4285_v18, 4  ;;  %v4288_v17 = vshll.u32 %v4208_v40, 16  ;;  %v4294_v36 = vshll.u32 %v4209_v16, 16 }
 0x29a   : > { %v4134_v29 = vadd.bf16 %v4102_v45, %v4033_v7  ;;  %v4823_v62 = vmul.bf16 %v7428_v57, %v4166_v39  ;;  %v4277_v42 = vor.u32 %v4276_v22, %v4273_v59  ;;  %v4824_v54 = vmul.bf16 %v7428_v57, %v4783_v10  ;;  %v2006_v46 = vld [vmem:[#allocation2 + $0x1c] sm:$0x1]  ;;  %v2627_v9 = vld [vmem:[#allocation2 + $0x10] sm:$0xe] }
 0x29b   : > { %v4135_v1 = vadd.bf16 %v4103_v56, %v4034_v48  ;;  %v4825_v55 = vmul.bf16 %v7428_v57, %v4167_v19  ;;  %v4290_v15 = vrot.slane %v4288_v17, 5  ;;  %v4296_v38 = vrot.slane %v4294_v36, 5  ;;  %v2628_v48 = vld [vmem:[#allocation2 + $0x18] sm:$0xe] }
 0x29c   : > { %v6073_v49 = vrot.slane %v4822_v3, 9  ;;  %v4952_v14 = vrot.slane %v4823_v62, 5  ;;  %v4278_v45 = vrot.slane %v4277_v42, 4  ;;  %v6074_v35 = vrot.slane %v4824_v54, 9 }
 0x29d   : > { %v4956_v58 = vrot.slane %v4825_v55, 5  ;;  %v1973_v39 = vmul.bf16 %v7383_v6, %v7899_v25  ;;  %v4291_v56 = vor.u32 %v4290_v15, %v4287_v32  ;;  %v1974_v19 = vmul.bf16 %v7383_v6, %v7903_v31  ;;  %v7926_v55 = vld [vmem:[#allocation14] ss:$0 sm:$0xff] }
 0x29e   : > { %v4953_v37 = vsel %vm7402_vm13, %v6073_v49, %v4952_v14  ;;  %v2050_v21 = vmul.bf16 %v7376_v51, %v7899_v25  ;;  %v4283_v40 = vsel %vm7387_vm10, %v4278_v45, %v4282_v43  ;;  %v2051_v50 = vmul.bf16 %v7376_v51, %v2005_v8  ;;  %v7923_v43 = vld [vmem:[#allocation12] ss:$0 sm:$0xff]  ;;  %v2991_v49 = vld [vmem:[#allocation2 + $0x18] sm:$0xf] }
 0x29f   : > { %v4957_v16 = vsel %vm7402_vm13, %v6074_v35, %v4956_v58  ;;  %v2052_v61 = vmul.bf16 %v7376_v51, %v7903_v31  ;;  %v4292_v13 = vrot.slane %v4291_v56, 4  ;;  %v4750_v20 = vadd.bf16 %v4283_v40, %v4134_v29  ;;  %v2992_v58 = vld [vmem:[#allocation2 + $0x20] sm:$0xf] }
 0x2a0   : > { %v2053_v41 = vmul.bf16 %v7376_v51, %v2006_v46  ;;  %v2142_v12 = vshrl.u32 %v2050_v21, 16  ;;  %v2145_v34 = vshll.u32 %v2050_v21, 16  ;;  %v2151_v4 = vshll.u32 %v2051_v50, 16 }
 0x2a1   : > { %v2156_v18 = vshrl.u32 %v2052_v61, 16  ;;  %v2159_v3 = vshll.u32 %v2052_v61, 16  ;;  %v4297_v60 = vsel %vm7387_vm10, %v4292_v13, %v4296_v38  ;;  %v5110_v7 = vadd.bf16 %v4953_v37, %v4750_v20  ;;  %v3091_v13 = vld [vmem:[#allocation2 + $0x1c] sm:$0x1] }
 0x2a2   : > { %v2144_v59 = vrot.slane %v2142_v12, 4  ;;  %v2165_v10 = vshll.u32 %v2053_v41, 16  ;;  %v4751_v22 = vadd.bf16 %v4297_v60, %v4135_v1  ;;  %v2147_v32 = vrot.slane %v2145_v34, 5  ;;  %v3092_v34 = vld [vmem:[#allocation2 + $0x24] sm:$0x1] }
 0x2a3   : > { %v2153_v29 = vrot.slane %v2151_v4, 5  ;;  %v2158_v17 = vrot.slane %v2156_v18, 4  ;;  %v5142_v36 = vunpack.c.l.bf16 %v5110_v7  ;;  %v2161_v62 = vrot.slane %v2159_v3, 5  ;;  %v3707_v4 = vld [vmem:[#allocation2 + $0x18] sm:$0xe] }
 0x2a4   : > { %v2167_v25 = vrot.slane %v2165_v10, 5  ;;  %v2669_v42 = vmul.bf16 %v7381_v5, %v2627_v9  ;;  %v5111_v54 = vadd.bf16 %v4957_v16, %v4751_v22  ;;  %v2148_v31 = vor.u32 %v2147_v32, %v2144_v59 }
 0x2a5   : > { %v2670_v15 = vmul.bf16 %v7381_v5, %v2005_v8  ;;  %v2671_v38 = vmul.bf16 %v7381_v5, %v2628_v48  ;;  %v5181_v1 = vmul.f32 %v7923_v43, %v5142_v36  ;;  %v2162_v14 = vor.u32 %v2161_v62, %v2158_v17 }
 0x2a6   : > { %v2672_v45 = vmul.bf16 %v7381_v5, %v2006_v46  ;;  %v6007_v35 = vrot.slane %v2669_v42, 9  ;;  %v5143_v56 = vunpack.c.l.bf16 %v5111_v54  ;;  %v2149_v37 = vrot.slane %v2148_v31, 4 }
 0x2a7   : > { %v2806_v21 = vrot.slane %v2670_v15, 5  ;;  %v6008_v40 = vrot.slane %v2671_v38, 9  ;;  %v5220_v16 = vadd.f32 %v7926_v55, %v5181_v1  ;;  %v2163_v50 = vrot.slane %v2162_v14, 4 }
 0x2a8   : > { %v2810_v61 = vrot.slane %v2672_v45, 5  ;;  %v3027_v8 = vmul.bf16 %v7422_v52, %v2991_v49  ;;  %v5182_v20 = vmul.f32 %v7923_v43, %v5143_v56  ;;  %v2154_v41 = vsel %vm7387_vm10, %v2149_v37, %v2153_v29  ;;  %v4068_v45 = vld [vmem:[#allocation2 + $0x20] sm:$0xf] }
 0x2a9   : > { %v2807_v46 = vsel %vm7402_vm13, %v6007_v35, %v2806_v21  ;;  %v3028_v12 = vmul.bf16 %v7422_v52, %v2992_v58  ;;  %v5252_v18 = vmax.f32 %v5220_v16, 0.0  ;;  %v2168_v3 = vsel %vm7387_vm10, %v2163_v50, %v2167_v25 }
 0x2aa   : > { %v2595_v9 = vadd.bf16 %v2154_v41, %v1973_v39  ;;  %v2811_v60 = vsel %vm7402_vm13, %v6008_v40, %v2810_v61  ;;  %v5221_v7 = vadd.f32 %v7926_v55, %v5182_v20  ;;  %v2596_v59 = vadd.bf16 %v2168_v3, %v1974_v19  ;;  %v3708_v19 = vld [vmem:[#allocation2 + $0x20] sm:$0xe]  ;;  %v4069_v61 = vld [vmem:[#allocation2 + $0x28] sm:$0xf] }
 0x2ab   : > { %v3133_v10 = vmul.bf16 %v7424_v53, %v2991_v49  ;;  %v3134_v48 = vmul.bf16 %v7424_v53, %v3091_v13  ;;  %v3135_v32 = vmul.bf16 %v7424_v53, %v2992_v58  ;;  %v3136_v29 = vmul.bf16 %v7424_v53, %v3092_v34 }
 0x2ac   : > { %v2958_v22 = vadd.bf16 %v2807_v46, %v2595_v9  ;;  %v3749_v17 = vmul.bf16 %v7418_v47, %v3707_v4  ;;  %v5253_v36 = vmax.f32 %v5221_v7, 0.0  ;;  %v2959_v62 = vadd.bf16 %v2811_v60, %v2596_v59  ;;  %v4169_v60 = vld [vmem:[#allocation2 + $0x2c] sm:$0x1] }
 0x2ad   : > { %v3222_v39 = vshrl.u32 %v3133_v10, 16  ;;  %v3225_v25 = vshll.u32 %v3133_v10, 16  ;;  %v3231_v54 = vshll.u32 %v3134_v48, 16  ;;  %v3236_v31 = vshrl.u32 %v3135_v32, 16 }
 0x2ae   : > { %v3059_v42 = vadd.bf16 %v3027_v8, %v2958_v22  ;;  %v3239_v15 = vshll.u32 %v3135_v32, 16  ;;  %v5284_v38 = vpack.c.bf16 %v5253_v36, %v5252_v18  ;;  %v3060_v49 = vadd.bf16 %v3028_v12, %v2959_v62  ;;  %v4168_v8 = vld [vmem:[#allocation2 + $0x24] sm:$0x1] }
 0x2af   : > { %v3224_v1 = vrot.slane %v3222_v39, 4  ;;  %v3227_v14 = vrot.slane %v3225_v25, 5  ;;  %v3233_v35 = vrot.slane %v3231_v54, 5  ;;  %v3238_v58 = vrot.slane %v3236_v31, 4 }
 0x2b0   : > { %v3241_v56 = vrot.slane %v3239_v15, 5  ;;  %v3245_v37 = vshll.u32 %v3136_v29, 16  ;;  %6253 = vmatprep.mubr.bf16.mxu0 %v5284_v38  ;;  %v3750_v40 = vmul.bf16 %v7418_v47, %v3091_v13  ;;  %v3751_v16 = vmul.bf16 %v7418_v47, %v3708_v19  ;;  %v4784_v15 = vld [vmem:[#allocation2 + $0x20] sm:$0xe] }
 0x2b1   : > { %v3228_v21 = vor.u32 %v3227_v14, %v3224_v1  ;;  %v3752_v50 = vmul.bf16 %v7418_v47, %v3092_v34  ;;  %v6041_v46 = vrot.slane %v3749_v17, 9  ;;  %v4104_v12 = vmul.bf16 %v7430_v63, %v4068_v45 }
 0x2b2   : > { %v3242_v20 = vor.u32 %v3241_v56, %v3238_v58  ;;  %v3247_v41 = vrot.slane %v3245_v37, 5  ;;  %v3883_v18 = vrot.slane %v3750_v40, 5  ;;  %v6042_v3 = vrot.slane %v3751_v16, 9 }
 0x2b3   : > { %v3229_v4 = vrot.slane %v3228_v21, 4  ;;  %v3887_v9 = vrot.slane %v3752_v50, 5  ;;  %v4105_v59 = vmul.bf16 %v7430_v63, %v4069_v61  ;;  %v4210_v13 = vmul.bf16 %v7432_v0, %v4068_v45  ;;  %v4785_v45 = vld [vmem:[#allocation2 + $0x28] sm:$0xe]  ;;  %v7967_v21 = vld [vmem:[#allocation2 + $0x20] sm:$0xf] }
 0x2b4   : > { %v3243_v7 = vrot.slane %v3242_v20, 4  ;;  %v4211_v10 = vmul.bf16 %v7432_v0, %v4168_v8  ;;  %v3884_v48 = vsel %vm7402_vm13, %v6041_v46, %v3883_v18  ;;  %v4212_v32 = vmul.bf16 %v7432_v0, %v4069_v61  ;;  %v7970_v50 = vld [vmem:[#allocation2 + $0x28] sm:$0xf] }
 0x2b5   : > { %v3234_v34 = vsel %vm7387_vm10, %v3229_v4, %v3233_v35  ;;  %v3888_v22 = vsel %vm7402_vm13, %v6042_v3, %v3887_v9  ;;  %v4213_v36 = vmul.bf16 %v7432_v0, %v4169_v60  ;;  %v4299_v62 = vshrl.u32 %v4210_v13, 16  ;;  %v2007_v4 = vld [vmem:[#allocation2 + $0x24] sm:$0x1] }
 0x2b6   : > { %v3248_v29 = vsel %vm7387_vm10, %v3243_v7, %v3247_v41  ;;  %v3675_v17 = vadd.bf16 %v3234_v34, %v3059_v42  ;;  %v4302_v25 = vshll.u32 %v4210_v13, 16  ;;  %v4308_v54 = vshll.u32 %v4211_v10, 16  ;;  %v2008_v7 = vld [vmem:[#allocation2 + $0x2c] sm:$0x1] }
 0x2b7   : > { %v3676_v39 = vadd.bf16 %v3248_v29, %v3060_v49  ;;  %v4313_v31 = vshrl.u32 %v4212_v32, 16  ;;  %v4301_v38 = vrot.slane %v4299_v62, 4  ;;  %v4316_v1 = vshll.u32 %v4212_v32, 16 }
 0x2b8   : > { %v4035_v19 = vadd.bf16 %v3884_v48, %v3675_v17  ;;  %v4322_v14 = vshll.u32 %v4213_v36, 16  ;;  %v4304_v58 = vrot.slane %v4302_v25, 5  ;;  %v4310_v56 = vrot.slane %v4308_v54, 5 }
 0x2b9   : > { %v4036_v35 = vadd.bf16 %v3888_v22, %v3676_v39  ;;  %v4315_v37 = vrot.slane %v4313_v31, 4  ;;  %v4318_v40 = vrot.slane %v4316_v1, 5  ;;  %v4826_v49 = vmul.bf16 %v7428_v57, %v4784_v15  ;;  %v2629_v1 = vld [vmem:[#allocation2 + $0x20] sm:$0xe] }
 0x2ba   : > { %v4136_v42 = vadd.bf16 %v4104_v12, %v4035_v19  ;;  %v4324_v16 = vrot.slane %v4322_v14, 5  ;;  %v4305_v20 = vor.u32 %v4304_v58, %v4301_v38  ;;  %v4827_v41 = vmul.bf16 %v7428_v57, %v4168_v8 }
 0x2bb   : > { %v4137_v61 = vadd.bf16 %v4105_v59, %v4036_v35  ;;  %v4828_v46 = vmul.bf16 %v7428_v57, %v4785_v45  ;;  %v4319_v18 = vor.u32 %v4318_v40, %v4315_v37  ;;  %v4829_v3 = vmul.bf16 %v7428_v57, %v4169_v60 }
 0x2bc   : > { %v6075_v9 = vrot.slane %v4826_v49, 9  ;;  %v1975_v12 = vmul.bf16 %v7383_v6, %v7967_v21  ;;  %v4306_v13 = vrot.slane %v4305_v20, 4  ;;  %v4960_v10 = vrot.slane %v4827_v41, 5 }
 0x2bd   : > { %v6076_v34 = vrot.slane %v4828_v46, 9  ;;  %v1976_v59 = vmul.bf16 %v7383_v6, %v7970_v50  ;;  %v4320_v48 = vrot.slane %v4319_v18, 4  ;;  %v4964_v22 = vrot.slane %v4829_v3, 5 }
 0x2be   : > { %v2054_v8 = vmul.bf16 %v7376_v51, %v7967_v21  ;;  %v2055_v32 = vmul.bf16 %v7376_v51, %v2007_v4  ;;  %v4311_v60 = vsel %vm7387_vm10, %v4306_v13, %v4310_v56  ;;  %v4961_v29 = vsel %vm7402_vm13, %v6075_v9, %v4960_v10  ;;  %v2630_v56 = vld [vmem:[#allocation2 + $0x28] sm:$0xe] }
 0x2bf   : > { %v2056_v17 = vmul.bf16 %v7376_v51, %v7970_v50  ;;  %v2057_v36 = vmul.bf16 %v7376_v51, %v2008_v7  ;;  %v4325_v62 = vsel %vm7387_vm10, %v4320_v48, %v4324_v16  ;;  %v4752_v39 = vadd.bf16 %v4311_v60, %v4136_v42  ;;  %v2993_v9 = vld [vmem:[#allocation2 + $0x28] sm:$0xf] }
 0x2c0   : > { %v4965_v25 = vsel %vm7402_vm13, %v6076_v34, %v4964_v22  ;;  %v2170_v54 = vshrl.u32 %v2054_v8, 16  ;;  %v4753_v31 = vadd.bf16 %v4325_v62, %v4137_v61  ;;  %v2173_v15 = vshll.u32 %v2054_v8, 16  ;;  %v2994_v22 = vld [vmem:[#allocation2 + $0x30] sm:$0xf] }
 0x2c1   : > { %v2179_v19 = vshll.u32 %v2055_v32, 16  ;;  %v2184_v38 = vshrl.u32 %v2056_v17, 16  ;;  %v5112_v14 = vadd.bf16 %v4961_v29, %v4752_v39  ;;  %v2187_v35 = vshll.u32 %v2056_v17, 16  ;;  %v3093_v39 = vld [vmem:[#allocation2 + $0x2c] sm:$0x1] }
 0x2c2   : > { %v2172_v45 = vrot.slane %v2170_v54, 4  ;;  %v2193_v58 = vshll.u32 %v2057_v36, 16  ;;  %v5113_v37 = vadd.bf16 %v4965_v25, %v4753_v31  ;;  %v2175_v40 = vrot.slane %v2173_v15, 5  ;;  %v3094_v15 = vld [vmem:[#allocation2 + $0x34] sm:$0x1] }
 0x2c3   : > { %v2181_v49 = vrot.slane %v2179_v19, 5  ;;  %v2186_v50 = vrot.slane %v2184_v38, 4  ;;  %v5144_v16 = vunpack.c.l.bf16 %v5112_v14  ;;  %v2189_v42 = vrot.slane %v2187_v35, 5  ;;  %v3709_v19 = vld [vmem:[#allocation2 + $0x28] sm:$0xe] }
 0x2c4   : > { %v2195_v20 = vrot.slane %v2193_v58, 5  ;;  %v2673_v41 = vmul.bf16 %v7381_v5, %v2629_v1  ;;  %v5145_v46 = vunpack.c.l.bf16 %v5113_v37  ;;  %v2176_v61 = vor.u32 %v2175_v40, %v2172_v45 }
 0x2c5   : > { %v2674_v18 = vmul.bf16 %v7381_v5, %v2007_v4  ;;  %v2675_v3 = vmul.bf16 %v7381_v5, %v2630_v56  ;;  %v5183_v13 = vmul.f32 %v7923_v43, %v5144_v16  ;;  %v2190_v10 = vor.u32 %v2189_v42, %v2186_v50 }
 0x2c6   : > { %v2676_v34 = vmul.bf16 %v7381_v5, %v2008_v7  ;;  %v6009_v48 = vrot.slane %v2673_v41, 9  ;;  %v5184_v8 = vmul.f32 %v7923_v43, %v5145_v46  ;;  %v2177_v32 = vrot.slane %v2176_v61, 4 }
 0x2c7   : > { %v2814_v60 = vrot.slane %v2674_v18, 5  ;;  %v6010_v29 = vrot.slane %v2675_v3, 9  ;;  %v5222_v17 = vadd.f32 %v7926_v55, %v5183_v13  ;;  %v2191_v36 = vrot.slane %v2190_v10, 4 }
 0x2c8   : > { %v2818_v62 = vrot.slane %v2676_v34, 5  ;;  %v3029_v4 = vmul.bf16 %v7422_v52, %v2993_v9  ;;  %v5223_v25 = vadd.f32 %v7926_v55, %v5184_v8  ;;  %v2182_v54 = vsel %vm7387_vm10, %v2177_v32, %v2181_v49  ;;  %v4070_v34 = vld [vmem:[#allocation2 + $0x30] sm:$0xf] }
 0x2c9   : > { %v2815_v7 = vsel %vm7402_vm13, %v6009_v48, %v2814_v60  ;;  %v3030_v31 = vmul.bf16 %v7422_v52, %v2994_v22  ;;  %v5254_v38 = vmax.f32 %v5222_v17, 0.0  ;;  %v2196_v1 = vsel %vm7387_vm10, %v2191_v36, %v2195_v20  ;;  %v4071_v60 = vld [vmem:[#allocation2 + $0x38] sm:$0xf] }
 0x2ca   : > { %v2597_v14 = vadd.bf16 %v2182_v54, %v1975_v12  ;;  %v2819_v45 = vsel %vm7402_vm13, %v6010_v29, %v2818_v62  ;;  %v5255_v35 = vmax.f32 %v5223_v25, 0.0  ;;  %v2598_v58 = vadd.bf16 %v2196_v1, %v1976_v59  ;;  %v3710_v59 = vld [vmem:[#allocation2 + $0x30] sm:$0xe] }
 0x2cb   : > { %v3137_v56 = vmul.bf16 %v7424_v53, %v2993_v9  ;;  %v3138_v37 = vmul.bf16 %v7424_v53, %v3093_v39  ;;  %v3139_v49 = vmul.bf16 %v7424_v53, %v2994_v22  ;;  %v3140_v50 = vmul.bf16 %v7424_v53, %v3094_v15 }
 0x2cc   : > { %v2960_v40 = vadd.bf16 %v2815_v7, %v2597_v14  ;;  %v3753_v16 = vmul.bf16 %v7418_v47, %v3709_v19  ;;  %v5285_v42 = vpack.c.bf16 %v5255_v35, %v5254_v38  ;;  %v2961_v20 = vadd.bf16 %v2819_v45, %v2598_v58  ;;  %v4171_v19 = vld [vmem:[#allocation2 + $0x3c] sm:$0x1] }
 0x2cd   : > { %v3250_v21 = vshrl.u32 %v3137_v56, 16  ;;  %v3253_v12 = vshll.u32 %v3137_v56, 16  ;;  %v3259_v46 = vshll.u32 %v3138_v37, 16  ;;  %v3264_v61 = vshrl.u32 %v3139_v49, 16 }
 0x2ce   : > { %v3061_v41 = vadd.bf16 %v3029_v4, %v2960_v40  ;;  %v3267_v18 = vshll.u32 %v3139_v49, 16  ;;  %6254 = vmatmul.mubr.bf16.vlgmr.msra.gmra.mrb[32].mxu0 %v5285_v42  ;;  %v3062_v3 = vadd.bf16 %v3030_v31, %v2961_v20  ;;  %v3273_v10 = vshll.u32 %v3140_v50, 16  ;;  %v4170_v4 = vld [vmem:[#allocation2 + $0x34] sm:$0x1] }
 0x2cf   : > { %v3252_v9 = vrot.slane %v3250_v21, 4  ;;  %v3255_v13 = vrot.slane %v3253_v12, 5  ;;  %v3261_v48 = vrot.slane %v3259_v46, 5  ;;  %v3266_v22 = vrot.slane %v3264_v61, 4 }
 0x2d0   : > { %v3269_v8 = vrot.slane %v3267_v18, 5  ;;  %v3754_v32 = vmul.bf16 %v7418_v47, %v3093_v39  ;;  %v3275_v17 = vrot.slane %v3273_v10, 5  ;;  %v3755_v36 = vmul.bf16 %v7418_v47, %v3710_v59  ;;  %v4786_v18 = vld [vmem:[#allocation2 + $0x30] sm:$0xe] }
 0x2d1   : > { %v3256_v29 = vor.u32 %v3255_v13, %v3252_v9  ;;  %v3756_v62 = vmul.bf16 %v7418_v47, %v3094_v15  ;;  %v6043_v54 = vrot.slane %v3753_v16, 9  ;;  %v4106_v31 = vmul.bf16 %v7430_v63, %v4070_v34 }
 0x2d2   : > { %v3270_v25 = vor.u32 %v3269_v8, %v3266_v22  ;;  %v3891_v7 = vrot.slane %v3754_v32, 5  ;;  %v6044_v1 = vrot.slane %v3755_v36, 9  ;;  %v4107_v45 = vmul.bf16 %v7430_v63, %v4071_v60 }
 0x2d3   : > { %v3257_v38 = vrot.slane %v3256_v29, 4  ;;  %v3895_v14 = vrot.slane %v3756_v62, 5  ;;  %v4214_v58 = vmul.bf16 %v7432_v0, %v4070_v34  ;;  %v4215_v15 = vmul.bf16 %v7432_v0, %v4170_v4  ;;  %v4787_v34 = vld [vmem:[#allocation2 + $0x38] sm:$0xe] }
 0x2d4   : > { %v3271_v39 = vrot.slane %v3270_v25, 4  ;;  %v3892_v35 = vsel %vm7402_vm13, %v6043_v54, %v3891_v7  ;;  %v4216_v40 = vmul.bf16 %v7432_v0, %v4071_v60  ;;  %v4217_v49 = vmul.bf16 %v7432_v0, %v4171_v19  ;;  %v1502_v60 = vld [vmem:[#allocation2 + $0x48] sm:$0xf] }
 0x2d5   : > { %v3262_v56 = vsel %vm7387_vm10, %v3257_v38, %v3261_v48  ;;  %v3896_v37 = vsel %vm7402_vm13, %v6044_v1, %v3895_v14  ;;  %v4327_v42 = vshrl.u32 %v4214_v58, 16  ;;  %v4330_v20 = vshll.u32 %v4214_v58, 16  ;;  %v8039_v38 = vld [vmem:[#allocation2 + $0x30] sm:$0xf]  ;;  %v8041_v1 = vld [vmem:[#allocation2 + $0x38] sm:$0xf] }
 0x2d6   : > { %v3276_v50 = vsel %vm7387_vm10, %v3271_v39, %v3275_v17  ;;  %v3677_v16 = vadd.bf16 %v3262_v56, %v3061_v41  ;;  %v4336_v12 = vshll.u32 %v4215_v15, 16  ;;  %v4341_v46 = vshrl.u32 %v4216_v40, 16  ;;  %v2009_v56 = vld [vmem:[#allocation2 + $0x34] sm:$0x1] }
 0x2d7   : > { %v3678_v21 = vadd.bf16 %v3276_v50, %v3062_v3  ;;  %v4344_v61 = vshll.u32 %v4216_v40, 16  ;;  %v4329_v9 = vrot.slane %v4327_v42, 4  ;;  %v4332_v13 = vrot.slane %v4330_v20, 5  ;;  %v1505_v3 = vld [vmem:[#allocation2 + $0x4c] sm:$0x1] }
 0x2d8   : > { %v4037_v59 = vadd.bf16 %v3892_v35, %v3677_v16  ;;  %v4350_v10 = vshll.u32 %v4217_v49, 16  ;;  %v4338_v22 = vrot.slane %v4336_v12, 5  ;;  %v4343_v8 = vrot.slane %v4341_v46, 4  ;;  %v2010_v50 = vld [vmem:[#allocation2 + $0x3c] sm:$0x1] }
 0x2d9   : > { %v4038_v48 = vadd.bf16 %v3896_v37, %v3678_v21  ;;  %v4346_v32 = vrot.slane %v4344_v61, 5  ;;  %v4333_v17 = vor.u32 %v4332_v13, %v4329_v9  ;;  %v4830_v36 = vmul.bf16 %v7428_v57, %v4786_v18 }
 0x2da   : > { %v4138_v29 = vadd.bf16 %v4106_v31, %v4037_v59  ;;  %v4352_v41 = vrot.slane %v4350_v10, 5  ;;  %v4831_v54 = vmul.bf16 %v7428_v57, %v4170_v4  ;;  %v4832_v7 = vmul.bf16 %v7428_v57, %v4787_v34 }
 0x2db   : > { %v4139_v62 = vadd.bf16 %v4107_v45, %v4038_v48  ;;  %v4347_v25 = vor.u32 %v4346_v32, %v4343_v8  ;;  %v4334_v14 = vrot.slane %v4333_v17, 4  ;;  %v4833_v39 = vmul.bf16 %v7428_v57, %v4171_v19  ;;  %v2631_v32 = vld [vmem:[#allocation2 + $0x30] sm:$0xe] }
 0x2dc   : > { %v6077_v35 = vrot.slane %v4830_v36, 9  ;;  %v1503_v31 = vsel %vm7343_vm3, %v7347_v24, %v1502_v60  ;;  %v4968_v15 = vrot.slane %v4831_v54, 5  ;;  %v6078_v45 = vrot.slane %v4832_v7, 9  ;;  %v2632_v36 = vld [vmem:[#allocation2 + $0x38] sm:$0xe] }
 0x2dd   : > { %v4348_v58 = vrot.slane %v4347_v25, 4  ;;  %1504 = vst [vmem:[#allocation2 + $0x48] sm:$0xf] %v1503_v31  ;;  %v1506_v4 = vsel %vm7352_vm6, %v7356_v28, %v1505_v3  ;;  %v4339_v37 = vsel %vm7387_vm10, %v4334_v14, %v4338_v22  ;;  %v4972_v40 = vrot.slane %v4833_v39, 5 }
 0x2de   : > { %1507 = vst [vmem:[#allocation2 + $0x4c] sm:$0x1] %v1506_v4  ;;  %v1977_v19 = vmul.bf16 %v7383_v6, %v8039_v38  ;;  %v1978_v49 = vmul.bf16 %v7383_v6, %v8041_v1  ;;  %v4754_v42 = vadd.bf16 %v4339_v37, %v4138_v29  ;;  %v4969_v20 = vsel %vm7402_vm13, %v6077_v35, %v4968_v15 }
 0x2df   : > { %v4353_v16 = vsel %vm7387_vm10, %v4348_v58, %v4352_v41  ;;  %v2058_v21 = vmul.bf16 %v7376_v51, %v8039_v38  ;;  %v4973_v46 = vsel %vm7402_vm13, %v6078_v45, %v4972_v40  ;;  %v2059_v61 = vmul.bf16 %v7376_v51, %v2009_v56 }
 0x2e0   : > { %v4755_v12 = vadd.bf16 %v4353_v16, %v4139_v62  ;;  %v2060_v18 = vmul.bf16 %v7376_v51, %v8041_v1  ;;  %v5114_v59 = vadd.bf16 %v4969_v20, %v4754_v42  ;;  %v2061_v9 = vmul.bf16 %v7376_v51, %v2010_v50 }
 0x2e1   : > { %v2198_v13 = vshrl.u32 %v2058_v21, 16  ;;  %v2201_v10 = vshll.u32 %v2058_v21, 16  ;;  %v2207_v48 = vshll.u32 %v2059_v61, 16  ;;  %v2677_v45 = vmul.bf16 %v7381_v5, %v2631_v32  ;;  %v2996_v61 = vld [vmem:[#allocation2 + $0x40] sm:$0xf] }
 0x2e2   : > { %v5115_v34 = vadd.bf16 %v4973_v46, %v4755_v12  ;;  %v2212_v22 = vshrl.u32 %v2060_v18, 16  ;;  %v2215_v8 = vshll.u32 %v2060_v18, 16  ;;  %v5146_v60 = vunpack.c.l.bf16 %v5114_v59  ;;  %v2995_v46 = vld [vmem:[#allocation2 + $0x38] sm:$0xf] }
 0x2e3   : > { %v2200_v29 = vrot.slane %v2198_v13, 4  ;;  %v2203_v17 = vrot.slane %v2201_v10, 5  ;;  %v2221_v41 = vshll.u32 %v2061_v9, 16  ;;  %v2209_v25 = vrot.slane %v2207_v48, 5 }
 0x2e4   : > { %v5147_v3 = vunpack.c.l.bf16 %v5115_v34  ;;  %v1715_v62 = vld [vmem:[#allocation2 + $0x48] sm:$0x1]  ;;  %v2214_v54 = vrot.slane %v2212_v22, 4  ;;  %v2217_v7 = vrot.slane %v2215_v8, 5  ;;  %v5185_v38 = vmul.f32 %v7923_v43, %v5146_v60  ;;  %v3095_v22 = vld [vmem:[#allocation2 + $0x3c] sm:$0x1] }
 0x2e5   : > { %v1716_v1 = vsel %vm7352_vm6, 0, %v1715_v62  ;;  %v1836_v14 = vld [vmem:[#allocation2 + $0x4c] sm:$0x1]  ;;  %v2204_v39 = vor.u32 %v2203_v17, %v2200_v29  ;;  %v2223_v35 = vrot.slane %v2221_v41, 5  ;;  %v2678_v40 = vmul.bf16 %v7381_v5, %v2009_v56  ;;  %v3096_v8 = vld [vmem:[#allocation2 + $0x44] sm:$0x1] }
 0x2e6   : > { %v5186_v31 = vmul.f32 %v7923_v43, %v5147_v3  ;;  %1717 = vst [vmem:[#allocation2 + $0x48] sm:$0x1] %v1716_v1  ;;  %v1837_v58 = vsel %vm7364_vm7, 0, %v1836_v14  ;;  %v2218_v15 = vor.u32 %v2217_v7, %v2214_v54  ;;  %v5224_v4 = vadd.f32 %v7926_v55, %v5185_v38  ;;  %v3711_v17 = vld [vmem:[#allocation2 + $0x38] sm:$0xe] }
 0x2e7   : > { %1838 = vst [vmem:[#allocation2 + $0x4c] sm:$0x1] %v1837_v58  ;;  %v2205_v37 = vrot.slane %v2204_v39, 4  ;;  %v2679_v16 = vmul.bf16 %v7381_v5, %v2632_v36  ;;  %v2680_v21 = vmul.bf16 %v7381_v5, %v2010_v50  ;;  %v6011_v12 = vrot.slane %v2677_v45, 9  ;;  %v3712_v14 = vld [vmem:[#allocation2 + $0x40] sm:$0xe] }
 0x2e8   : > { %v5225_v42 = vadd.f32 %v7926_v55, %v5186_v31  ;;  %v2219_v20 = vrot.slane %v2218_v15, 4  ;;  %v5256_v18 = vmax.f32 %v5224_v4, 0.0  ;;  %v2822_v9 = vrot.slane %v2678_v40, 5 }
 0x2e9   : > { %v2210_v59 = vsel %vm7387_vm10, %v2205_v37, %v2209_v25  ;;  %v6012_v13 = vrot.slane %v2679_v16, 9  ;;  %v2826_v48 = vrot.slane %v2680_v21, 5  ;;  %v3031_v60 = vmul.bf16 %v7422_v52, %v2995_v46  ;;  %v4072_v16 = vld [vmem:[#allocation2 + $0x40] sm:$0xf] }
 0x2ea   : > { %v5257_v10 = vmax.f32 %v5225_v42, 0.0  ;;  %v2224_v56 = vsel %vm7387_vm10, %v2219_v20, %v2223_v35  ;;  %v2599_v34 = vadd.bf16 %v2210_v59, %v1977_v19  ;;  %v2823_v50 = vsel %vm7402_vm13, %v6011_v12, %v2822_v9 }
 0x2eb   : > { %v2600_v32 = vadd.bf16 %v2224_v56, %v1978_v49  ;;  %v3032_v29 = vmul.bf16 %v7422_v52, %v2996_v61  ;;  %v2827_v36 = vsel %vm7402_vm13, %v6012_v13, %v2826_v48  ;;  %v3141_v62 = vmul.bf16 %v7424_v53, %v2995_v46  ;;  %v4172_v13 = vld [vmem:[#allocation2 + $0x44] sm:$0x1] }
 0x2ec   : > { %v5286_v41 = vpack.c.bf16 %v5257_v10, %v5256_v18  ;;  %v2962_v3 = vadd.bf16 %v2823_v50, %v2599_v34  ;;  %v3142_v25 = vmul.bf16 %v7424_v53, %v3095_v22  ;;  %v3143_v49 = vmul.bf16 %v7424_v53, %v2996_v61 }
 0x2ed   : > { %v2963_v19 = vadd.bf16 %v2827_v36, %v2600_v32  ;;  %v3144_v54 = vmul.bf16 %v7424_v53, %v3096_v8  ;;  %v3278_v38 = vshrl.u32 %v3141_v62, 16  ;;  %v3281_v1 = vshll.u32 %v3141_v62, 16  ;;  %v4073_v9 = vld [vmem:[#allocation2 + $0x48] sm:$0xf] }
 0x2ee   : > { %6257 = vmatprep.mubr.bf16.mxu1 %v5286_v41  ;;  %v3063_v7 = vadd.bf16 %v3031_v60, %v2962_v3  ;;  %v3757_v39 = vmul.bf16 %v7418_v47, %v3711_v17  ;;  %v3287_v31 = vshll.u32 %v3142_v25, 16  ;;  %v3292_v58 = vshrl.u32 %v3143_v49, 16  ;;  %v4173_v32 = vld [vmem:[#allocation2 + $0x4c] sm:$0x1] }
 0x2ef   : > { %v3064_v35 = vadd.bf16 %v3032_v29, %v2963_v19  ;;  %v3295_v15 = vshll.u32 %v3143_v49, 16  ;;  %v3280_v45 = vrot.slane %v3278_v38, 4  ;;  %v3283_v4 = vrot.slane %v3281_v1, 5 }
 0x2f0   : > { %v3301_v37 = vshll.u32 %v3144_v54, 16  ;;  %v3758_v40 = vmul.bf16 %v7418_v47, %v3095_v22  ;;  %v3289_v42 = vrot.slane %v3287_v31, 5  ;;  %v3294_v20 = vrot.slane %v3292_v58, 4 }
 0x2f1   : > { %v3297_v21 = vrot.slane %v3295_v15, 5  ;;  %v3759_v12 = vmul.bf16 %v7418_v47, %v3712_v14  ;;  %v3284_v46 = vor.u32 %v3283_v4, %v3280_v45  ;;  %v3760_v18 = vmul.bf16 %v7418_v47, %v3096_v8  ;;  %v4788_v14 = vld [vmem:[#allocation2 + $0x40] sm:$0xe] }
 0x2f2   : > { %v3303_v61 = vrot.slane %v3301_v37, 5  ;;  %v6045_v59 = vrot.slane %v3757_v39, 9  ;;  %v3899_v56 = vrot.slane %v3758_v40, 5  ;;  %v4108_v48 = vmul.bf16 %v7430_v63, %v4072_v16 }
 0x2f3   : > { %v3298_v10 = vor.u32 %v3297_v21, %v3294_v20  ;;  %v6046_v34 = vrot.slane %v3759_v12, 9  ;;  %v3285_v22 = vrot.slane %v3284_v46, 4  ;;  %v3903_v50 = vrot.slane %v3760_v18, 5  ;;  %v1508_v46 = vld [vmem:[#allocation2 + $0x50] sm:$0xf] }
 0x2f4   : > { %v4109_v60 = vmul.bf16 %v7430_v63, %v4073_v9  ;;  %v4218_v29 = vmul.bf16 %v7432_v0, %v4072_v16  ;;  %v3900_v41 = vsel %vm7402_vm13, %v6045_v59, %v3899_v56  ;;  %v4219_v8 = vmul.bf16 %v7432_v0, %v4172_v13  ;;  %v4789_v16 = vld [vmem:[#allocation2 + $0x48] sm:$0xe] }
 0x2f5   : > { %v3299_v17 = vrot.slane %v3298_v10, 4  ;;  %v4220_v36 = vmul.bf16 %v7432_v0, %v4073_v9  ;;  %v3290_v3 = vsel %vm7387_vm10, %v3285_v22, %v3289_v42  ;;  %v3904_v62 = vsel %vm7402_vm13, %v6046_v34, %v3903_v50  ;;  %v8116_v22 = vld [vmem:[#allocation2 + $0x58] sm:$0xf] }
 0x2f6   : > { %v4221_v19 = vmul.bf16 %v7432_v0, %v4173_v32  ;;  %v4355_v25 = vshrl.u32 %v4218_v29, 16  ;;  %v3679_v54 = vadd.bf16 %v3290_v3, %v3063_v7  ;;  %v4358_v38 = vshll.u32 %v4218_v29, 16  ;;  %v2634_v3 = vld [vmem:[#allocation2 + $0x58] sm:$0xe] }
 0x2f7   : > { %v3304_v49 = vsel %vm7387_vm10, %v3299_v17, %v3303_v61  ;;  %v4364_v1 = vshll.u32 %v4219_v8, 16  ;;  %v4369_v58 = vshrl.u32 %v4220_v36, 16  ;;  %v4372_v15 = vshll.u32 %v4220_v36, 16 }
 0x2f8   : > { %v3680_v39 = vadd.bf16 %v3304_v49, %v3064_v35  ;;  %v4357_v31 = vrot.slane %v4355_v25, 4  ;;  %v4039_v45 = vadd.bf16 %v3900_v41, %v3679_v54  ;;  %v4360_v4 = vrot.slane %v4358_v38, 5  ;;  %v1511_v35 = vld [vmem:[#allocation2 + $0x54] sm:$0x1]  ;;  %v2012_v41 = vld [vmem:[#allocation2 + $0x5c] sm:$0x1] }
 0x2f9   : > { %v4366_v37 = vrot.slane %v4364_v1, 5  ;;  %v4378_v40 = vshll.u32 %v4221_v19, 16  ;;  %v4371_v20 = vrot.slane %v4369_v58, 4  ;;  %v4374_v21 = vrot.slane %v4372_v15, 5  ;;  %v8132_v49 = vld [vmem:[#allocation2 + $0x58] sm:$0xf] }
 0x2fa   : > { %v4040_v42 = vadd.bf16 %v3904_v62, %v3680_v39  ;;  %v4834_v12 = vmul.bf16 %v7428_v57, %v4788_v14  ;;  %v4140_v61 = vadd.bf16 %v4108_v48, %v4039_v45  ;;  %v4361_v7 = vor.u32 %v4360_v4, %v4357_v31  ;;  %v2998_v45 = vld [vmem:[#allocation2 + $0x60] sm:$0xf] }
 0x2fb   : > { %v4380_v18 = vrot.slane %v4378_v40, 5  ;;  %v4835_v59 = vmul.bf16 %v7428_v57, %v4172_v13  ;;  %v4375_v10 = vor.u32 %v4374_v21, %v4371_v20  ;;  %v4836_v56 = vmul.bf16 %v7428_v57, %v4789_v16 }
 0x2fc   : > { %v4141_v9 = vadd.bf16 %v4109_v60, %v4040_v42  ;;  %v4837_v34 = vmul.bf16 %v7428_v57, %v4173_v32  ;;  %v4362_v50 = vrot.slane %v4361_v7, 4  ;;  %v6079_v29 = vrot.slane %v4834_v12, 9  ;;  %v8143_v42 = vld [vmem:[#allocation2 + $0x5c] sm:$0x1] }
 0x2fd   : > { %v4976_v17 = vrot.slane %v4835_v59, 5  ;;  %v1509_v48 = vsel %vm7343_vm3, %v7347_v24, %v1508_v46  ;;  %v4376_v8 = vrot.slane %v4375_v10, 4  ;;  %v6080_v36 = vrot.slane %v4836_v56, 9 }
 0x2fe   : > { %v4980_v13 = vrot.slane %v4837_v34, 5  ;;  %1510 = vst [vmem:[#allocation2 + $0x50] sm:$0xf] %v1509_v48  ;;  %v1512_v60 = vsel %vm7352_vm6, %v7356_v28, %v1511_v35  ;;  %v4367_v32 = vsel %vm7387_vm10, %v4362_v50, %v4366_v37  ;;  %v1980_v19 = vmul.bf16 %v7383_v6, %v8116_v22  ;;  %v8146_v34 = vld [vmem:[#allocation2 + $0x64] sm:$0x1] }
 0x2ff   : > { %v4977_v62 = vsel %vm7402_vm13, %v6079_v29, %v4976_v17  ;;  %1513 = vst [vmem:[#allocation2 + $0x54] sm:$0x1] %v1512_v60  ;;  %v2064_v25 = vmul.bf16 %v7376_v51, %v8116_v22  ;;  %v4381_v54 = vsel %vm7387_vm10, %v4376_v8, %v4380_v18  ;;  %v4756_v38 = vadd.bf16 %v4367_v32, %v4140_v61 }
 0x300   : > { %v4981_v1 = vsel %vm7402_vm13, %v6080_v36, %v4980_v13  ;;  %v2065_v14 = vmul.bf16 %v7376_v51, %v2012_v41  ;;  %v4757_v39 = vadd.bf16 %v4381_v54, %v4141_v9  ;;  %v2683_v15 = vmul.bf16 %v7381_v5, %v2634_v3 }
 0x301   : > { %v2240_v31 = vshrl.u32 %v2064_v25, 16  ;;  %v2243_v58 = vshll.u32 %v2064_v25, 16  ;;  %v5116_v4 = vadd.bf16 %v4977_v62, %v4756_v38  ;;  %v2684_v40 = vmul.bf16 %v7381_v5, %v2012_v41 }
 0x302   : > { %v2249_v37 = vshll.u32 %v2065_v14, 16  ;;  %v3033_v16 = vmul.bf16 %v7422_v52, %v8132_v49  ;;  %v5117_v20 = vadd.bf16 %v4981_v1, %v4757_v39  ;;  %v6014_v46 = vrot.slane %v2683_v15, 9  ;;  %v3713_v39 = vld [vmem:[#allocation2 + $0x58] sm:$0xe] }
 0x303   : > { %v2242_v21 = vrot.slane %v2240_v31, 4  ;;  %v2245_v12 = vrot.slane %v2243_v58, 5  ;;  %v5148_v61 = vunpack.c.l.bf16 %v5116_v4  ;;  %v2834_v18 = vrot.slane %v2684_v40, 5 }
 0x304   : > { %v2251_v7 = vrot.slane %v2249_v37, 5  ;;  %v3034_v59 = vmul.bf16 %v7422_v52, %v2998_v45  ;;  %v5149_v35 = vunpack.c.l.bf16 %v5117_v20  ;;  %v3145_v22 = vmul.bf16 %v7424_v53, %v8132_v49 }
 0x305   : > { %v1718_v9 = vld [vmem:[#allocation2 + $0x50] sm:$0x1]  ;;  %v2246_v10 = vor.u32 %v2245_v12, %v2242_v21  ;;  %v2633_v56 = vld [vmem:[#allocation2 + $0x50] sm:$0xe]  ;;  %v3146_v50 = vmul.bf16 %v7424_v53, %v8143_v42  ;;  %v5187_v29 = vmul.f32 %v7923_v43, %v5148_v61  ;;  %v2835_v8 = vsel %vm7402_vm13, %v6014_v46, %v2834_v18  ;;  %v3714_v21 = vld [vmem:[#allocation2 + $0x60] sm:$0xe] }
 0x306   : > { %v1719_v17 = vsel %vm7352_vm6, 0, %v1718_v9  ;;  %v1839_v48 = vld [vmem:[#allocation2 + $0x54] sm:$0x1]  ;;  %v2681_v41 = vmul.bf16 %v7381_v5, %v2633_v56  ;;  %v5188_v36 = vmul.f32 %v7923_v43, %v5149_v35  ;;  %v3147_v3 = vmul.bf16 %v7424_v53, %v2998_v45 }
 0x307   : > { %1720 = vst [vmem:[#allocation2 + $0x50] sm:$0x1] %v1719_v17  ;;  %v1840_v13 = vsel %vm7364_vm7, 0, %v1839_v48  ;;  %v2247_v60 = vrot.slane %v2246_v10, 4  ;;  %v5226_v32 = vadd.f32 %v7926_v55, %v5187_v29  ;;  %v3148_v25 = vmul.bf16 %v7424_v53, %v8146_v34 }
 0x308   : > { %1841 = vst [vmem:[#allocation2 + $0x54] sm:$0x1] %v1840_v13  ;;  %v8163_v62 = vrot.slane %v2681_v41, 9  ;;  %v3306_v54 = vshrl.u32 %v3145_v22, 16  ;;  %v5227_v38 = vadd.f32 %v7926_v55, %v5188_v36  ;;  %v3309_v1 = vshll.u32 %v3145_v22, 16 }
 0x309   : > { %v2252_v43 = vsel %vm7387_vm10, %v2247_v60, %v2251_v7  ;;  %v3315_v14 = vshll.u32 %v3146_v50, 16  ;;  %v5258_v31 = vmax.f32 %v5226_v32, 0.0  ;;  %v3320_v45 = vshrl.u32 %v3147_v3, 16  ;;  %v4075_v60 = vld [vmem:[#allocation2 + $0x68] sm:$0xf] }
 0x30a   : > { %v2602_v58 = vadd.bf16 %v2252_v43, %v1980_v19  ;;  %v3308_v15 = vrot.slane %v3306_v54, 4  ;;  %v5259_v4 = vmax.f32 %v5227_v38, 0.0  ;;  %v3311_v37 = vrot.slane %v3309_v1, 5  ;;  %v8188_v54 = vld [vmem:[#allocation2 + $0x60] sm:$0xf] }
 0x30b   : > { %v3317_v40 = vrot.slane %v3315_v14, 5  ;;  %v3323_v20 = vshll.u32 %v3147_v3, 16  ;;  %v3322_v46 = vrot.slane %v3320_v45, 4  ;;  %v3329_v61 = vshll.u32 %v3148_v25, 16 }
 0x30c   : > { %v2965_v12 = vadd.bf16 %v2835_v8, %v2602_v58  ;;  %v3761_v55 = vmul.bf16 %v7418_v47, %v3713_v39  ;;  %v5287_v18 = vpack.c.bf16 %v5259_v4, %v5258_v31  ;;  %v3312_v35 = vor.u32 %v3311_v37, %v3308_v15  ;;  %v4175_v39 = vld [vmem:[#allocation2 + $0x6c] sm:$0x1]  ;;  %v4174_v4 = vld [vmem:[#allocation2 + $0x64] sm:$0x1] }
 0x30d   : > { %v3325_v7 = vrot.slane %v3323_v20, 5  ;;  %v3762_v9 = vmul.bf16 %v7418_v47, %v8143_v42  ;;  %v3331_v56 = vrot.slane %v3329_v61, 5  ;;  %v3763_v22 = vmul.bf16 %v7418_v47, %v3714_v21 }
 0x30e   : > { %v1940_v10 = vld [vmem:[#allocation2 + $0x50] sm:$0xf]  ;;  %v3066_v19 = vadd.bf16 %v3034_v59, %v2965_v12  ;;  %v3764_v50 = vmul.bf16 %v7418_v47, %v8146_v34  ;;  %6258 = vmatmul.mubr.bf16.vlgmr.msra.gmra.mrb[0].mxu1 %v5287_v18  ;;  %v3313_v41 = vrot.slane %v3312_v35, 4  ;;  %v8180_v13 = vrot.slane %v3761_v55, 9  ;;  %v4790_v12 = vld [vmem:[#allocation2 + $0x60] sm:$0xe] }
 0x30f   : > { %v1979_v29 = vmul.bf16 %v7383_v6, %v1940_v10  ;;  %v2011_v17 = vld [vmem:[#allocation2 + $0x54] sm:$0x1]  ;;  %v2062_v48 = vmul.bf16 %v7376_v51, %v1940_v10  ;;  %v3326_v8 = vor.u32 %v3325_v7, %v3322_v46  ;;  %v8182_v59 = vrot.slane %v3762_v9, 5 }
 0x310   : > { %v2063_v36 = vmul.bf16 %v7376_v51, %v2011_v17  ;;  %v2682_v42 = vmul.bf16 %v7381_v5, %v2011_v17  ;;  %v8186_v34 = vsel %vm7387_vm10, %v3313_v41, %v3317_v40  ;;  %v6048_v14 = vrot.slane %v3763_v22, 9 }
 0x311   : > { %v2226_v3 = vshrl.u32 %v2062_v48, 16  ;;  %v2229_v32 = vshll.u32 %v2062_v48, 16  ;;  %v3327_v25 = vrot.slane %v3326_v8, 4  ;;  %v3908_v1 = vsel %vm7402_vm13, %v8180_v13, %v8182_v59  ;;  %v4791_v8 = vld [vmem:[#allocation2 + $0x68] sm:$0xe] }
 0x312   : > { %v2235_v38 = vshll.u32 %v2063_v36, 16  ;;  %v2830_v43 = vrot.slane %v2682_v42, 5  ;;  %v3911_v45 = vrot.slane %v3764_v50, 5  ;;  %v4110_v21 = vmul.bf16 %v7430_v63, %v8188_v54 }
 0x313   : > { %v2228_v31 = vrot.slane %v2226_v3, 4  ;;  %v2231_v58 = vrot.slane %v2229_v32, 5  ;;  %v3332_v15 = vsel %vm7387_vm10, %v3327_v25, %v3331_v56  ;;  %v4111_v55 = vmul.bf16 %v7430_v63, %v4075_v60 }
 0x314   : > { %v2237_v37 = vrot.slane %v2235_v38, 5  ;;  %v2831_v40 = vsel %vm7402_vm13, %v8163_v62, %v2830_v43  ;;  %v3682_v20 = vadd.bf16 %v3332_v15, %v3066_v19  ;;  %v3912_v61 = vsel %vm7402_vm13, %v6048_v14, %v3911_v45  ;;  %v8212_v14 = vld [vmem:[#allocation2 + $0x60] sm:$0xf] }
 0x315   : > { %v2232_v46 = vor.u32 %v2231_v58, %v2228_v31  ;;  %v4222_v18 = vmul.bf16 %v7432_v0, %v8188_v54  ;;  %v4223_v7 = vmul.bf16 %v7432_v0, %v4174_v4  ;;  %v4224_v9 = vmul.bf16 %v7432_v0, %v4075_v60 }
 0x316   : > { %v4042_v35 = vadd.bf16 %v3912_v61, %v3682_v20  ;;  %v4225_v62 = vmul.bf16 %v7432_v0, %v4175_v39  ;;  %v4838_v22 = vmul.bf16 %v7428_v57, %v4790_v12  ;;  %v4839_v15 = vmul.bf16 %v7428_v57, %v4174_v4  ;;  %v8216_v20 = vld [vmem:[#allocation2 + $0x68] sm:$0xf] }
 0x317   : > { %v2233_v10 = vrot.slane %v2232_v46, 4  ;;  %v4383_v19 = vshrl.u32 %v4222_v18, 16  ;;  %v4386_v56 = vshll.u32 %v4222_v18, 16  ;;  %v4392_v17 = vshll.u32 %v4223_v7, 16 }
 0x318   : > { %v4143_v50 = vadd.bf16 %v4111_v55, %v4042_v35  ;;  %v4397_v48 = vshrl.u32 %v4224_v9, 16  ;;  %v4400_v41 = vshll.u32 %v4224_v9, 16  ;;  %v4406_v32 = vshll.u32 %v4225_v62, 16  ;;  %v2013_v55 = vld [vmem:[#allocation2 + $0x64] sm:$0x1] }
 0x319   : > { %v2238_v36 = vsel %vm7387_vm10, %v2233_v10, %v2237_v37  ;;  %v4385_v42 = vrot.slane %v4383_v19, 4  ;;  %v4388_v3 = vrot.slane %v4386_v56, 5  ;;  %v4394_v60 = vrot.slane %v4392_v17, 5  ;;  %v2014_v10 = vld [vmem:[#allocation2 + $0x6c] sm:$0x1] }
 0x31a   : > { %v2601_v25 = vadd.bf16 %v2238_v36, %v1979_v29  ;;  %v4399_v38 = vrot.slane %v4397_v48, 4  ;;  %v4402_v43 = vrot.slane %v4400_v41, 5  ;;  %v4408_v58 = vrot.slane %v4406_v32, 5 }
 0x31b   : > { %v4389_v31 = vor.u32 %v4388_v3, %v4385_v42  ;;  %v4840_v45 = vmul.bf16 %v7428_v57, %v4791_v8  ;;  %v4841_v37 = vmul.bf16 %v7428_v57, %v4175_v39  ;;  %v6081_v61 = vrot.slane %v4838_v22, 9 }
 0x31c   : > { %v2964_v12 = vadd.bf16 %v2831_v40, %v2601_v25  ;;  %v4403_v46 = vor.u32 %v4402_v43, %v4399_v38  ;;  %v4984_v18 = vrot.slane %v4839_v15, 5  ;;  %v1981_v7 = vmul.bf16 %v7383_v6, %v8212_v14 }
 0x31d   : > { %v4390_v29 = vrot.slane %v4389_v31, 4  ;;  %v6082_v35 = vrot.slane %v4840_v45, 9  ;;  %v4988_v62 = vrot.slane %v4841_v37, 5  ;;  %v1982_v40 = vmul.bf16 %v7383_v6, %v8216_v20 }
 0x31e   : > { %v3065_v4 = vadd.bf16 %v3033_v16, %v2964_v12  ;;  %v4404_v9 = vrot.slane %v4403_v46, 4  ;;  %v4985_v19 = vsel %vm7402_vm13, %v6081_v61, %v4984_v18  ;;  %v2066_v56 = vmul.bf16 %v7376_v51, %v8212_v14  ;;  %v2999_v18 = vld [vmem:[#allocation2 + $0x68] sm:$0xf] }
 0x31f   : > { %v4395_v39 = vsel %vm7387_vm10, %v4390_v29, %v4394_v60  ;;  %v2067_v22 = vmul.bf16 %v7376_v51, %v2013_v55  ;;  %v4989_v17 = vsel %vm7402_vm13, %v6082_v35, %v4988_v62  ;;  %v2068_v48 = vmul.bf16 %v7376_v51, %v8216_v20  ;;  %v2635_v60 = vld [vmem:[#allocation2 + $0x60] sm:$0xe]  ;;  %v8252_v35 = vld [vmem:[#allocation12] ss:$0 sm:$0xff] }
 0x320   : > { %v3681_v49 = vadd.bf16 %v8186_v34, %v3065_v4  ;;  %v4409_v16 = vsel %vm7387_vm10, %v4404_v9, %v4408_v58  ;;  %v2069_v8 = vmul.bf16 %v7376_v51, %v2014_v10  ;;  %v2254_v36 = vshrl.u32 %v2066_v56, 16  ;;  %v2636_v58 = vld [vmem:[#allocation2 + $0x68] sm:$0xe] }
 0x321   : > { %v4759_v41 = vadd.bf16 %v4409_v16, %v4143_v50  ;;  %v2257_v42 = vshll.u32 %v2066_v56, 16  ;;  %v2263_v3 = vshll.u32 %v2067_v22, 16  ;;  %v2268_v32 = vshrl.u32 %v2068_v48, 16  ;;  %v3000_v16 = vld [vmem:[#allocation2 + $0x70] sm:$0xf] }
 0x322   : > { %v4041_v34 = vadd.bf16 %v3908_v1, %v3681_v49  ;;  %v2271_v25 = vshll.u32 %v2068_v48, 16  ;;  %v2256_v43 = vrot.slane %v2254_v36, 4  ;;  %v2277_v31 = vshll.u32 %v2069_v8, 16  ;;  %v3099_v8 = vld [vmem:[#allocation2 + $0x6c] sm:$0x1] }
 0x323   : > { %v5119_v38 = vadd.bf16 %v4989_v17, %v4759_v41  ;;  %v2259_v14 = vrot.slane %v2257_v42, 5  ;;  %v2265_v15 = vrot.slane %v2263_v3, 5  ;;  %v2270_v45 = vrot.slane %v2268_v32, 4  ;;  %v3715_v3 = vld [vmem:[#allocation2 + $0x68] sm:$0xe] }
 0x324   : > { %v4142_v50 = vadd.bf16 %v4110_v21, %v4041_v34  ;;  %v2273_v20 = vrot.slane %v2271_v25, 5  ;;  %v2279_v13 = vrot.slane %v2277_v31, 5  ;;  %v2685_v59 = vmul.bf16 %v7381_v5, %v2635_v60  ;;  %v3100_v34 = vld [vmem:[#allocation2 + $0x74] sm:$0x1] }
 0x325   : > { %v5151_v12 = vunpack.c.l.bf16 %v5119_v38  ;;  %v2260_v46 = vor.u32 %v2259_v14, %v2256_v43  ;;  %v2686_v61 = vmul.bf16 %v7381_v5, %v2013_v55  ;;  %v2687_v29 = vmul.bf16 %v7381_v5, %v2636_v58 }
 0x326   : > { %v4758_v1 = vadd.bf16 %v4395_v39, %v4142_v50  ;;  %v2274_v37 = vor.u32 %v2273_v20, %v2270_v45  ;;  %v2688_v4 = vmul.bf16 %v7381_v5, %v2014_v10  ;;  %v6015_v9 = vrot.slane %v2685_v59, 9  ;;  %v8256_v39 = vld [vmem:[#allocation14] ss:$0 sm:$0xff] }
 0x327   : > { %v5190_v54 = vmul.f32 %v8252_v35, %v5151_v12  ;;  %v2261_v21 = vrot.slane %v2260_v46, 4  ;;  %v2838_v22 = vrot.slane %v2686_v61, 5  ;;  %v6016_v49 = vrot.slane %v2687_v29, 9  ;;  %v3716_v61 = vld [vmem:[#allocation2 + $0x70] sm:$0xe] }
 0x328   : > { %v5118_v62 = vadd.bf16 %v4985_v19, %v4758_v1  ;;  %v2275_v56 = vrot.slane %v2274_v37, 4  ;;  %v2842_v48 = vrot.slane %v2688_v4, 5  ;;  %v3035_v41 = vmul.bf16 %v7422_v52, %v2999_v18  ;;  %v4076_v4 = vld [vmem:[#allocation2 + $0x70] sm:$0xf] }
 0x329   : > { %v5229_v55 = vadd.f32 %v8256_v39, %v5190_v54  ;;  %v2266_v17 = vsel %vm7387_vm10, %v2261_v21, %v2265_v15  ;;  %v2839_v42 = vsel %vm7402_vm13, %v6015_v9, %v2838_v22  ;;  %v3036_v38 = vmul.bf16 %v7422_v52, %v3000_v16 }
 0x32a   : > { %v5150_v36 = vunpack.c.l.bf16 %v5118_v62  ;;  %v2280_v10 = vsel %vm7387_vm10, %v2275_v56, %v2279_v13  ;;  %v2603_v19 = vadd.bf16 %v2266_v17, %v1981_v7  ;;  %v2843_v60 = vsel %vm7402_vm13, %v6016_v49, %v2842_v48  ;;  %v4077_v49 = vld [vmem:[#allocation2 + $0x78] sm:$0xf] }
 0x32b   : > { %v5261_v32 = vmax.f32 %v5229_v55, 0.0  ;;  %v2604_v25 = vadd.bf16 %v2280_v10, %v1982_v40  ;;  %v3149_v31 = vmul.bf16 %v7424_v53, %v2999_v18  ;;  %v3150_v58 = vmul.bf16 %v7424_v53, %v3099_v8 }
 0x32c   : > { %v5189_v43 = vmul.f32 %v8252_v35, %v5150_v36  ;;  %v2966_v14 = vadd.bf16 %v2839_v42, %v2603_v19  ;;  %v3151_v50 = vmul.bf16 %v7424_v53, %v3000_v16  ;;  %v3152_v15 = vmul.bf16 %v7424_v53, %v3100_v34  ;;  %v4176_v42 = vld [vmem:[#allocation2 + $0x74] sm:$0x1] }
 0x32d   : > { %v2967_v7 = vadd.bf16 %v2843_v60, %v2604_v25  ;;  %v3765_v45 = vmul.bf16 %v7418_v47, %v3715_v3  ;;  %v3334_v12 = vshrl.u32 %v3149_v31, 16  ;;  %v3337_v46 = vshll.u32 %v3149_v31, 16  ;;  %v4177_v3 = vld [vmem:[#allocation2 + $0x7c] sm:$0x1] }
 0x32e   : > { %v5228_v40 = vadd.f32 %v8256_v39, %v5189_v43  ;;  %v3067_v20 = vadd.bf16 %v3035_v41, %v2966_v14  ;;  %v3343_v59 = vshll.u32 %v3150_v58, 16  ;;  %v3348_v1 = vshrl.u32 %v3151_v50, 16 }
 0x32f   : > { %v3068_v13 = vadd.bf16 %v3036_v38, %v2967_v7  ;;  %v3351_v37 = vshll.u32 %v3151_v50, 16  ;;  %v3336_v18 = vrot.slane %v3334_v12, 4  ;;  %v3339_v54 = vrot.slane %v3337_v46, 5 }
 0x330   : > { %v5260_v29 = vmax.f32 %v5228_v40, 0.0  ;;  %v3357_v21 = vshll.u32 %v3152_v15, 16  ;;  %v3345_v9 = vrot.slane %v3343_v59, 5  ;;  %v3350_v62 = vrot.slane %v3348_v1, 4 }
 0x331   : > { %v3353_v56 = vrot.slane %v3351_v37, 5  ;;  %v3766_v22 = vmul.bf16 %v7418_v47, %v3099_v8  ;;  %v3340_v55 = vor.u32 %v3339_v54, %v3336_v18  ;;  %v3767_v48 = vmul.bf16 %v7418_v47, %v3716_v61  ;;  %v4792_v61 = vld [vmem:[#allocation2 + $0x70] sm:$0xe] }
 0x332   : > { %v5288_v16 = vpack.c.bf16 %v5261_v32, %v5260_v29  ;;  %v3359_v17 = vrot.slane %v3357_v21, 5  ;;  %v3768_v36 = vmul.bf16 %v7418_v47, %v3100_v34  ;;  %v6049_v10 = vrot.slane %v3765_v45, 9 }
 0x333   : > { %v3354_v41 = vor.u32 %v3353_v56, %v3350_v62  ;;  %v3915_v19 = vrot.slane %v3766_v22, 5  ;;  %v3341_v25 = vrot.slane %v3340_v55, 4  ;;  %v6050_v60 = vrot.slane %v3767_v48, 9 }
 0x334   : > { %6261 = vmatprep.mubr.bf16.mxu1 %v5288_v16  ;;  %v4112_v38 = vmul.bf16 %v7430_v63, %v4076_v4  ;;  %v4113_v8 = vmul.bf16 %v7430_v63, %v4077_v49  ;;  %v3919_v14 = vrot.slane %v3768_v36, 5  ;;  %v4226_v31 = vmul.bf16 %v7432_v0, %v4076_v4  ;;  %v4793_v4 = vld [vmem:[#allocation2 + $0x78] sm:$0xe] }
 0x335   : > { %v3355_v43 = vrot.slane %v3354_v41, 4  ;;  %v3916_v32 = vsel %vm7402_vm13, %v6049_v10, %v3915_v19  ;;  %v3346_v34 = vsel %vm7387_vm10, %v3341_v25, %v3345_v9  ;;  %v4227_v58 = vmul.bf16 %v7432_v0, %v4176_v42  ;;  %v2015_v19 = vld [vmem:[#allocation2 + $0x74] sm:$0x1] }
 0x336   : > { %v4228_v7 = vmul.bf16 %v7432_v0, %v4077_v49  ;;  %v4229_v50 = vmul.bf16 %v7432_v0, %v4177_v3  ;;  %v3683_v45 = vadd.bf16 %v3346_v34, %v3067_v20  ;;  %v3920_v40 = vsel %vm7402_vm13, %v6050_v60, %v3919_v14  ;;  %v8293_v49 = vld [vmem:[#allocation2 + $0x70] sm:$0xf] }
 0x337   : > { %v3360_v15 = vsel %vm7387_vm10, %v3355_v43, %v3359_v17  ;;  %v4411_v12 = vshrl.u32 %v4226_v31, 16  ;;  %v4414_v59 = vshll.u32 %v4226_v31, 16  ;;  %v4420_v1 = vshll.u32 %v4227_v58, 16  ;;  %v8296_v17 = vld [vmem:[#allocation2 + $0x78] sm:$0xf] }
 0x338   : > { %v3684_v46 = vadd.bf16 %v3360_v15, %v3068_v13  ;;  %v4425_v37 = vshrl.u32 %v4228_v7, 16  ;;  %v4043_v29 = vadd.bf16 %v3916_v32, %v3683_v45  ;;  %v4428_v54 = vshll.u32 %v4228_v7, 16  ;;  %v2016_v32 = vld [vmem:[#allocation2 + $0x7c] sm:$0x1] }
 0x339   : > { %v4413_v18 = vrot.slane %v4411_v12, 4  ;;  %v4434_v21 = vshll.u32 %v4229_v50, 16  ;;  %v4416_v62 = vrot.slane %v4414_v59, 5  ;;  %v4422_v56 = vrot.slane %v4420_v1, 5 }
 0x33a   : > { %v4044_v9 = vadd.bf16 %v3920_v40, %v3684_v46  ;;  %v4427_v22 = vrot.slane %v4425_v37, 4  ;;  %v4144_v20 = vadd.bf16 %v4112_v38, %v4043_v29  ;;  %v4430_v16 = vrot.slane %v4428_v54, 5  ;;  %v2637_v54 = vld [vmem:[#allocation2 + $0x70] sm:$0xe] }
 0x33b   : > { %v4436_v55 = vrot.slane %v4434_v21, 5  ;;  %v4842_v13 = vmul.bf16 %v7428_v57, %v4792_v61  ;;  %v4417_v41 = vor.u32 %v4416_v62, %v4413_v18  ;;  %v4843_v36 = vmul.bf16 %v7428_v57, %v4176_v42 }
 0x33c   : > { %v4145_v48 = vadd.bf16 %v4113_v8, %v4044_v9  ;;  %v4844_v10 = vmul.bf16 %v7428_v57, %v4793_v4  ;;  %v4431_v25 = vor.u32 %v4430_v16, %v4427_v22  ;;  %v4845_v60 = vmul.bf16 %v7428_v57, %v4177_v3 }
 0x33d   : > { %v6083_v43 = vrot.slane %v4842_v13, 9  ;;  %v1983_v38 = vmul.bf16 %v7383_v6, %v8293_v49  ;;  %v4418_v14 = vrot.slane %v4417_v41, 4  ;;  %v4992_v31 = vrot.slane %v4843_v36, 5 }
 0x33e   : > { %v6084_v34 = vrot.slane %v4844_v10, 9  ;;  %v1984_v8 = vmul.bf16 %v7383_v6, %v8296_v17  ;;  %v4432_v58 = vrot.slane %v4431_v25, 4  ;;  %v4996_v7 = vrot.slane %v4845_v60, 5 }
 0x33f   : > { %v2070_v42 = vmul.bf16 %v7376_v51, %v8293_v49  ;;  %v2071_v50 = vmul.bf16 %v7376_v51, %v2015_v19  ;;  %v4423_v3 = vsel %vm7387_vm10, %v4418_v14, %v4422_v56  ;;  %v4993_v15 = vsel %vm7402_vm13, %v6083_v43, %v4992_v31  ;;  %v2638_v56 = vld [vmem:[#allocation2 + $0x78] sm:$0xe] }
 0x340   : > { %v2072_v45 = vmul.bf16 %v7376_v51, %v8296_v17  ;;  %v2073_v40 = vmul.bf16 %v7376_v51, %v2016_v32  ;;  %v4437_v12 = vsel %vm7387_vm10, %v4432_v58, %v4436_v55  ;;  %v4760_v46 = vadd.bf16 %v4423_v3, %v4144_v20  ;;  %v3001_v43 = vld [vmem:[#allocation2 + $0x78] sm:$0xf] }
 0x341   : > { %v4997_v59 = vsel %vm7402_vm13, %v6084_v34, %v4996_v7  ;;  %v2282_v1 = vshrl.u32 %v2070_v42, 16  ;;  %v4761_v37 = vadd.bf16 %v4437_v12, %v4145_v48  ;;  %v2285_v61 = vshll.u32 %v2070_v42, 16  ;;  %v3002_v7 = vld [vmem:[#allocation2 + $0x80] sm:$0xf] }
 0x342   : > { %v2291_v29 = vshll.u32 %v2071_v50, 16  ;;  %v2296_v18 = vshrl.u32 %v2072_v45, 16  ;;  %v5120_v21 = vadd.bf16 %v4993_v15, %v4760_v46  ;;  %v2299_v9 = vshll.u32 %v2072_v45, 16  ;;  %v3101_v46 = vld [vmem:[#allocation2 + $0x7c] sm:$0x1] }
 0x343   : > { %v2284_v4 = vrot.slane %v2282_v1, 4  ;;  %v2305_v62 = vshll.u32 %v2073_v40, 16  ;;  %v5121_v22 = vadd.bf16 %v4997_v59, %v4761_v37  ;;  %v2287_v16 = vrot.slane %v2285_v61, 5  ;;  %v3102_v61 = vld [vmem:[#allocation2 + $0x84] sm:$0x1] }
 0x344   : > { %v2293_v13 = vrot.slane %v2291_v29, 5  ;;  %v2298_v17 = vrot.slane %v2296_v18, 4  ;;  %v5152_v55 = vunpack.c.l.bf16 %v5120_v21  ;;  %v2301_v20 = vrot.slane %v2299_v9, 5  ;;  %v3717_v29 = vld [vmem:[#allocation2 + $0x78] sm:$0xe] }
 0x345   : > { %v2307_v41 = vrot.slane %v2305_v62, 5  ;;  %v2689_v36 = vmul.bf16 %v7381_v5, %v2637_v54  ;;  %v5153_v10 = vunpack.c.l.bf16 %v5121_v22  ;;  %v2288_v48 = vor.u32 %v2287_v16, %v2284_v4 }
 0x346   : > { %v2690_v25 = vmul.bf16 %v7381_v5, %v2015_v19  ;;  %v2691_v60 = vmul.bf16 %v7381_v5, %v2638_v56  ;;  %v5191_v14 = vmul.f32 %v8252_v35, %v5152_v55  ;;  %v2302_v31 = vor.u32 %v2301_v20, %v2298_v17 }
 0x347   : > { %v2692_v34 = vmul.bf16 %v7381_v5, %v2016_v32  ;;  %v6017_v58 = vrot.slane %v2689_v36, 9  ;;  %v5192_v42 = vmul.f32 %v8252_v35, %v5153_v10  ;;  %v2289_v50 = vrot.slane %v2288_v48, 4 }
 0x348   : > { %v2846_v3 = vrot.slane %v2690_v25, 5  ;;  %v6018_v15 = vrot.slane %v2691_v60, 9  ;;  %v5230_v45 = vadd.f32 %v8256_v39, %v5191_v14  ;;  %v2303_v40 = vrot.slane %v2302_v31, 4 }
 0x349   : > { %v2850_v12 = vrot.slane %v2692_v34, 5  ;;  %v3037_v19 = vmul.bf16 %v7422_v52, %v3001_v43  ;;  %v5231_v59 = vadd.f32 %v8256_v39, %v5192_v42  ;;  %v2294_v1 = vsel %vm7387_vm10, %v2289_v50, %v2293_v13  ;;  %v4078_v34 = vld [vmem:[#allocation2 + $0x80] sm:$0xf] }
 0x34a   : > { %v2847_v32 = vsel %vm7402_vm13, %v6017_v58, %v2846_v3  ;;  %v3038_v37 = vmul.bf16 %v7422_v52, %v3002_v7  ;;  %v5262_v18 = vmax.f32 %v5230_v45, 0.0  ;;  %v2308_v54 = vsel %vm7387_vm10, %v2303_v40, %v2307_v41  ;;  %v4079_v3 = vld [vmem:[#allocation2 + $0x88] sm:$0xf] }
 0x34b   : > { %v2605_v21 = vadd.bf16 %v2294_v1, %v1983_v38  ;;  %v2851_v4 = vsel %vm7402_vm13, %v6018_v15, %v2850_v12  ;;  %v5263_v9 = vmax.f32 %v5231_v59, 0.0  ;;  %v2606_v62 = vadd.bf16 %v2308_v54, %v1984_v8  ;;  %v3718_v8 = vld [vmem:[#allocation2 + $0x80] sm:$0xe] }
 0x34c   : > { %v3153_v56 = vmul.bf16 %v7424_v53, %v3001_v43  ;;  %v3154_v22 = vmul.bf16 %v7424_v53, %v3101_v46  ;;  %v3155_v13 = vmul.bf16 %v7424_v53, %v3002_v7  ;;  %v3156_v17 = vmul.bf16 %v7424_v53, %v3102_v61 }
 0x34d   : > { %v2968_v16 = vadd.bf16 %v2847_v32, %v2605_v21  ;;  %v3769_v55 = vmul.bf16 %v7418_v47, %v3717_v29  ;;  %v5289_v20 = vpack.c.bf16 %v5263_v9, %v5262_v18  ;;  %v2969_v41 = vadd.bf16 %v2851_v4, %v2606_v62  ;;  %v4179_v29 = vld [vmem:[#allocation2 + $0x8c] sm:$0x1] }
 0x34e   : > { %v3362_v49 = vshrl.u32 %v3153_v56, 16  ;;  %v3365_v38 = vshll.u32 %v3153_v56, 16  ;;  %v3371_v10 = vshll.u32 %v3154_v22, 16  ;;  %v3376_v48 = vshrl.u32 %v3155_v13, 16 }
 0x34f   : > { %v3069_v36 = vadd.bf16 %v3037_v19, %v2968_v16  ;;  %v3379_v25 = vshll.u32 %v3155_v13, 16  ;;  %6262 = vmatmul.mubr.bf16.gmra.mrb[4].mxu1 %v5289_v20  ;;  %v3070_v60 = vadd.bf16 %v3038_v37, %v2969_v41  ;;  %v3385_v31 = vshll.u32 %v3156_v17, 16  ;;  %v4178_v19 = vld [vmem:[#allocation2 + $0x84] sm:$0x1] }
 0x350   : > { %v3364_v43 = vrot.slane %v3362_v49, 4  ;;  %v3367_v14 = vrot.slane %v3365_v38, 5  ;;  %v3373_v58 = vrot.slane %v3371_v10, 5  ;;  %v3378_v7 = vrot.slane %v3376_v48, 4 }
 0x351   : > { %v3381_v42 = vrot.slane %v3379_v25, 5  ;;  %v3770_v50 = vmul.bf16 %v7418_v47, %v3101_v46  ;;  %v3387_v45 = vrot.slane %v3385_v31, 5  ;;  %v3771_v40 = vmul.bf16 %v7418_v47, %v3718_v8  ;;  %v4794_v25 = vld [vmem:[#allocation2 + $0x80] sm:$0xe] }
 0x352   : > { %v3368_v15 = vor.u32 %v3367_v14, %v3364_v43  ;;  %v3772_v12 = vmul.bf16 %v7418_v47, %v3102_v61  ;;  %v6051_v1 = vrot.slane %v3769_v55, 9  ;;  %v4114_v37 = vmul.bf16 %v7430_v63, %v4078_v34 }
 0x353   : > { %v3382_v59 = vor.u32 %v3381_v42, %v3378_v7  ;;  %v3923_v32 = vrot.slane %v3770_v50, 5  ;;  %v6052_v54 = vrot.slane %v3771_v40, 9  ;;  %v4115_v4 = vmul.bf16 %v7430_v63, %v4079_v3 }
 0x354   : > { %v3369_v18 = vrot.slane %v3368_v15, 4  ;;  %v3927_v21 = vrot.slane %v3772_v12, 5  ;;  %v4230_v62 = vmul.bf16 %v7432_v0, %v4078_v34  ;;  %v4231_v61 = vmul.bf16 %v7432_v0, %v4178_v19  ;;  %v4795_v34 = vld [vmem:[#allocation2 + $0x88] sm:$0xe] }
 0x355   : > { %v3383_v46 = vrot.slane %v3382_v59, 4  ;;  %v3924_v9 = vsel %vm7402_vm13, %v6051_v1, %v3923_v32  ;;  %v4232_v16 = vmul.bf16 %v7432_v0, %v4079_v3  ;;  %v4233_v13 = vmul.bf16 %v7432_v0, %v4179_v29  ;;  %v1562_v3 = vld [vmem:[#allocation2 + $0x98] sm:$0xf] }
 0x356   : > { %v3374_v56 = vsel %vm7387_vm10, %v3369_v18, %v3373_v58  ;;  %v3928_v22 = vsel %vm7402_vm13, %v6052_v54, %v3927_v21  ;;  %v4439_v20 = vshrl.u32 %v4230_v62, 16  ;;  %v4442_v41 = vshll.u32 %v4230_v62, 16  ;;  %v8365_v18 = vld [vmem:[#allocation2 + $0x80] sm:$0xf]  ;;  %v8367_v54 = vld [vmem:[#allocation2 + $0x88] sm:$0xf] }
 0x357   : > { %v3388_v17 = vsel %vm7387_vm10, %v3383_v46, %v3387_v45  ;;  %v3685_v55 = vadd.bf16 %v3374_v56, %v3069_v36  ;;  %v4448_v38 = vshll.u32 %v4231_v61, 16  ;;  %v4453_v10 = vshrl.u32 %v4232_v16, 16  ;;  %v2017_v56 = vld [vmem:[#allocation2 + $0x84] sm:$0x1] }
 0x358   : > { %v3686_v49 = vadd.bf16 %v3388_v17, %v3070_v60  ;;  %v4456_v48 = vshll.u32 %v4232_v16, 16  ;;  %v4441_v43 = vrot.slane %v4439_v20, 4  ;;  %v4444_v14 = vrot.slane %v4442_v41, 5  ;;  %v1565_v60 = vld [vmem:[#allocation2 + $0x9c] sm:$0x1] }
 0x359   : > { %v4045_v8 = vadd.bf16 %v3924_v9, %v3685_v55  ;;  %v4462_v31 = vshll.u32 %v4233_v13, 16  ;;  %v4450_v7 = vrot.slane %v4448_v38, 5  ;;  %v4455_v42 = vrot.slane %v4453_v10, 4  ;;  %v2018_v17 = vld [vmem:[#allocation2 + $0x8c] sm:$0x1] }
 0x35a   : > { %v4046_v58 = vadd.bf16 %v3928_v22, %v3686_v49  ;;  %v4458_v50 = vrot.slane %v4456_v48, 5  ;;  %v4445_v45 = vor.u32 %v4444_v14, %v4441_v43  ;;  %v4846_v40 = vmul.bf16 %v7428_v57, %v4794_v25 }
 0x35b   : > { %v4146_v15 = vadd.bf16 %v4114_v37, %v4045_v8  ;;  %v4464_v36 = vrot.slane %v4462_v31, 5  ;;  %v4847_v1 = vmul.bf16 %v7428_v57, %v4178_v19  ;;  %v4848_v32 = vmul.bf16 %v7428_v57, %v4795_v34 }
 0x35c   : > { %v4147_v12 = vadd.bf16 %v4115_v4, %v4046_v58  ;;  %v4459_v59 = vor.u32 %v4458_v50, %v4455_v42  ;;  %v4446_v21 = vrot.slane %v4445_v45, 4  ;;  %v4849_v46 = vmul.bf16 %v7428_v57, %v4179_v29  ;;  %v2640_v50 = vld [vmem:[#allocation2 + $0x88] sm:$0xe] }
 0x35d   : > { %v6085_v9 = vrot.slane %v4846_v40, 9  ;;  %v1563_v37 = vsel %vm7343_vm3, %v7347_v24, %v1562_v3  ;;  %v5000_v61 = vrot.slane %v4847_v1, 5  ;;  %v6086_v4 = vrot.slane %v4848_v32, 9  ;;  %v2639_v40 = vld [vmem:[#allocation2 + $0x80] sm:$0xe] }
 0x35e   : > { %v4460_v62 = vrot.slane %v4459_v59, 4  ;;  %1564 = vst [vmem:[#allocation2 + $0x98] sm:$0xf] %v1563_v37  ;;  %v1566_v19 = vsel %vm7352_vm6, %v7356_v28, %v1565_v60  ;;  %v4451_v22 = vsel %vm7387_vm10, %v4446_v21, %v4450_v7  ;;  %v5004_v16 = vrot.slane %v4849_v46, 5 }
 0x35f   : > { %1567 = vst [vmem:[#allocation2 + $0x9c] sm:$0x1] %v1566_v19  ;;  %v1985_v29 = vmul.bf16 %v7383_v6, %v8365_v18  ;;  %v1986_v13 = vmul.bf16 %v7383_v6, %v8367_v54  ;;  %v4762_v20 = vadd.bf16 %v4451_v22, %v4146_v15  ;;  %v5001_v41 = vsel %vm7402_vm13, %v6085_v9, %v5000_v61 }
 0x360   : > { %v4465_v55 = vsel %vm7387_vm10, %v4460_v62, %v4464_v36  ;;  %v2074_v49 = vmul.bf16 %v7376_v51, %v8365_v18  ;;  %v5005_v10 = vsel %vm7402_vm13, %v6086_v4, %v5004_v16  ;;  %v2075_v48 = vmul.bf16 %v7376_v51, %v2017_v56 }
 0x361   : > { %v4763_v38 = vadd.bf16 %v4465_v55, %v4147_v12  ;;  %v2076_v25 = vmul.bf16 %v7376_v51, %v8367_v54  ;;  %v5122_v8 = vadd.bf16 %v5001_v41, %v4762_v20  ;;  %v2077_v43 = vmul.bf16 %v7376_v51, %v2018_v17 }
 0x362   : > { %v2310_v14 = vshrl.u32 %v2074_v49, 16  ;;  %v2313_v31 = vshll.u32 %v2074_v49, 16  ;;  %v2319_v58 = vshll.u32 %v2075_v48, 16  ;;  %v2693_v4 = vmul.bf16 %v7381_v5, %v2639_v40  ;;  %v3004_v48 = vld [vmem:[#allocation2 + $0x90] sm:$0xf] }
 0x363   : > { %v5123_v34 = vadd.bf16 %v5005_v10, %v4763_v38  ;;  %v2324_v7 = vshrl.u32 %v2076_v25, 16  ;;  %v2327_v42 = vshll.u32 %v2076_v25, 16  ;;  %v5154_v3 = vunpack.c.l.bf16 %v5122_v8  ;;  %v3003_v10 = vld [vmem:[#allocation2 + $0x88] sm:$0xf] }
 0x364   : > { %v2312_v15 = vrot.slane %v2310_v14, 4  ;;  %v2315_v45 = vrot.slane %v2313_v31, 5  ;;  %v2333_v36 = vshll.u32 %v2077_v43, 16  ;;  %v2321_v59 = vrot.slane %v2319_v58, 5 }
 0x365   : > { %v5155_v60 = vunpack.c.l.bf16 %v5123_v34  ;;  %v1745_v12 = vld [vmem:[#allocation2 + $0x98] sm:$0x1]  ;;  %v2326_v1 = vrot.slane %v2324_v7, 4  ;;  %v2329_v32 = vrot.slane %v2327_v42, 5  ;;  %v5193_v18 = vmul.f32 %v8252_v35, %v5154_v3  ;;  %v3103_v7 = vld [vmem:[#allocation2 + $0x8c] sm:$0x1] }
 0x366   : > { %v1746_v54 = vsel %vm7352_vm6, 0, %v1745_v12  ;;  %v1866_v21 = vld [vmem:[#allocation2 + $0x9c] sm:$0x1]  ;;  %v2316_v46 = vor.u32 %v2315_v45, %v2312_v15  ;;  %v2335_v9 = vrot.slane %v2333_v36, 5  ;;  %v2694_v16 = vmul.bf16 %v7381_v5, %v2017_v56  ;;  %v3104_v42 = vld [vmem:[#allocation2 + $0x94] sm:$0x1] }
 0x367   : > { %v5194_v37 = vmul.f32 %v8252_v35, %v5155_v60  ;;  %1747 = vst [vmem:[#allocation2 + $0x98] sm:$0x1] %v1746_v54  ;;  %v1867_v62 = vsel %vm7364_vm7, 0, %v1866_v21  ;;  %v2330_v61 = vor.u32 %v2329_v32, %v2326_v1  ;;  %v5232_v19 = vadd.f32 %v8256_v39, %v5193_v18  ;;  %v3719_v45 = vld [vmem:[#allocation2 + $0x88] sm:$0xe] }
 0x368   : > { %1868 = vst [vmem:[#allocation2 + $0x9c] sm:$0x1] %v1867_v62  ;;  %v2317_v22 = vrot.slane %v2316_v46, 4  ;;  %v2695_v55 = vmul.bf16 %v7381_v5, %v2640_v50  ;;  %v2696_v49 = vmul.bf16 %v7381_v5, %v2018_v17  ;;  %v6019_v38 = vrot.slane %v2693_v4, 9  ;;  %v3720_v21 = vld [vmem:[#allocation2 + $0x90] sm:$0xe] }
 0x369   : > { %v5233_v20 = vadd.f32 %v8256_v39, %v5194_v37  ;;  %v2331_v41 = vrot.slane %v2330_v61, 4  ;;  %v5264_v25 = vmax.f32 %v5232_v19, 0.0  ;;  %v2854_v43 = vrot.slane %v2694_v16, 5 }
 0x36a   : > { %v2322_v8 = vsel %vm7387_vm10, %v2317_v22, %v2321_v59  ;;  %v6020_v14 = vrot.slane %v2695_v55, 9  ;;  %v2858_v58 = vrot.slane %v2696_v49, 5  ;;  %v3039_v3 = vmul.bf16 %v7422_v52, %v3003_v10  ;;  %v4080_v55 = vld [vmem:[#allocation2 + $0x90] sm:$0xf] }
 0x36b   : > { %v5265_v31 = vmax.f32 %v5233_v20, 0.0  ;;  %v2336_v56 = vsel %vm7387_vm10, %v2331_v41, %v2335_v9  ;;  %v2607_v34 = vadd.bf16 %v2322_v8, %v1985_v29  ;;  %v2855_v17 = vsel %vm7402_vm13, %v6019_v38, %v2854_v43 }
 0x36c   : > { %v2608_v50 = vadd.bf16 %v2336_v56, %v1986_v13  ;;  %v3040_v15 = vmul.bf16 %v7422_v52, %v3004_v48  ;;  %v2859_v40 = vsel %vm7402_vm13, %v6020_v14, %v2858_v58  ;;  %v3157_v12 = vmul.bf16 %v7424_v53, %v3003_v10  ;;  %v4180_v14 = vld [vmem:[#allocation2 + $0x94] sm:$0x1] }
 0x36d   : > { %v5290_v36 = vpack.c.bf16 %v5265_v31, %v5264_v25  ;;  %v2970_v60 = vadd.bf16 %v2855_v17, %v2607_v34  ;;  %v3158_v59 = vmul.bf16 %v7424_v53, %v3103_v7  ;;  %v3159_v13 = vmul.bf16 %v7424_v53, %v3004_v48 }
 0x36e   : > { %v2971_v29 = vadd.bf16 %v2859_v40, %v2608_v50  ;;  %v3160_v1 = vmul.bf16 %v7424_v53, %v3104_v42  ;;  %v3390_v18 = vshrl.u32 %v3157_v12, 16  ;;  %v3393_v54 = vshll.u32 %v3157_v12, 16  ;;  %v4081_v43 = vld [vmem:[#allocation2 + $0x98] sm:$0xf] }
 0x36f   : > { %6265 = vmatprep.mubr.bf16.mxu1 %v5290_v36  ;;  %v3071_v32 = vadd.bf16 %v3039_v3, %v2970_v60  ;;  %v3773_v46 = vmul.bf16 %v7418_v47, %v3719_v45  ;;  %v3399_v37 = vshll.u32 %v3158_v59, 16  ;;  %v3404_v62 = vshrl.u32 %v3159_v13, 16  ;;  %v4181_v50 = vld [vmem:[#allocation2 + $0x9c] sm:$0x1] }
 0x370   : > { %v3072_v9 = vadd.bf16 %v3040_v15, %v2971_v29  ;;  %v3407_v61 = vshll.u32 %v3159_v13, 16  ;;  %v3392_v4 = vrot.slane %v3390_v18, 4  ;;  %v3395_v19 = vrot.slane %v3393_v54, 5 }
 0x371   : > { %v3413_v22 = vshll.u32 %v3160_v1, 16  ;;  %v3774_v16 = vmul.bf16 %v7418_v47, %v3103_v7  ;;  %v3401_v20 = vrot.slane %v3399_v37, 5  ;;  %v3406_v41 = vrot.slane %v3404_v62, 4 }
 0x372   : > { %v3409_v49 = vrot.slane %v3407_v61, 5  ;;  %v3775_v38 = vmul.bf16 %v7418_v47, %v3720_v21  ;;  %v3396_v10 = vor.u32 %v3395_v19, %v3392_v4  ;;  %v3776_v25 = vmul.bf16 %v7418_v47, %v3104_v42  ;;  %v4796_v21 = vld [vmem:[#allocation2 + $0x90] sm:$0xe] }
 0x373   : > { %v3415_v48 = vrot.slane %v3413_v22, 5  ;;  %v6053_v8 = vrot.slane %v3773_v46, 9  ;;  %v3931_v56 = vrot.slane %v3774_v16, 5  ;;  %v4116_v58 = vmul.bf16 %v7430_v63, %v4080_v55 }
 0x374   : > { %v3410_v31 = vor.u32 %v3409_v49, %v3406_v41  ;;  %v6054_v34 = vrot.slane %v3775_v38, 9  ;;  %v3397_v7 = vrot.slane %v3396_v10, 4  ;;  %v3935_v17 = vrot.slane %v3776_v25, 5  ;;  %v1568_v10 = vld [vmem:[#allocation2 + $0xa0] sm:$0xf] }
 0x375   : > { %v4117_v3 = vmul.bf16 %v7430_v63, %v4081_v43  ;;  %v4234_v15 = vmul.bf16 %v7432_v0, %v4080_v55  ;;  %v3932_v36 = vsel %vm7402_vm13, %v6053_v8, %v3931_v56  ;;  %v4235_v42 = vmul.bf16 %v7432_v0, %v4180_v14  ;;  %v4797_v55 = vld [vmem:[#allocation2 + $0x98] sm:$0xe] }
 0x376   : > { %v3411_v45 = vrot.slane %v3410_v31, 4  ;;  %v4236_v40 = vmul.bf16 %v7432_v0, %v4081_v43  ;;  %v3402_v60 = vsel %vm7387_vm10, %v3397_v7, %v3401_v20  ;;  %v3936_v12 = vsel %vm7402_vm13, %v6054_v34, %v3935_v17  ;;  %v8442_v7 = vld [vmem:[#allocation2 + $0xa8] sm:$0xf] }
 0x377   : > { %v4237_v29 = vmul.bf16 %v7432_v0, %v4181_v50  ;;  %v4467_v59 = vshrl.u32 %v4234_v15, 16  ;;  %v3687_v1 = vadd.bf16 %v3402_v60, %v3071_v32  ;;  %v4470_v18 = vshll.u32 %v4234_v15, 16  ;;  %v2642_v60 = vld [vmem:[#allocation2 + $0xa8] sm:$0xe] }
 0x378   : > { %v3416_v13 = vsel %vm7387_vm10, %v3411_v45, %v3415_v48  ;;  %v4476_v54 = vshll.u32 %v4235_v42, 16  ;;  %v4481_v62 = vshrl.u32 %v4236_v40, 16  ;;  %v4484_v61 = vshll.u32 %v4236_v40, 16 }
 0x379   : > { %v3688_v46 = vadd.bf16 %v3416_v13, %v3072_v9  ;;  %v4469_v37 = vrot.slane %v4467_v59, 4  ;;  %v4047_v4 = vadd.bf16 %v3932_v36, %v3687_v1  ;;  %v4472_v19 = vrot.slane %v4470_v18, 5  ;;  %v1571_v9 = vld [vmem:[#allocation2 + $0xa4] sm:$0x1]  ;;  %v2020_v36 = vld [vmem:[#allocation2 + $0xac] sm:$0x1] }
 0x37a   : > { %v4478_v22 = vrot.slane %v4476_v54, 5  ;;  %v4490_v16 = vshll.u32 %v4237_v29, 16  ;;  %v4483_v41 = vrot.slane %v4481_v62, 4  ;;  %v4486_v49 = vrot.slane %v4484_v61, 5  ;;  %v8458_v13 = vld [vmem:[#allocation2 + $0xa8] sm:$0xf] }
 0x37b   : > { %v4048_v20 = vadd.bf16 %v3936_v12, %v3688_v46  ;;  %v4850_v38 = vmul.bf16 %v7428_v57, %v4796_v21  ;;  %v4148_v48 = vadd.bf16 %v4116_v58, %v4047_v4  ;;  %v4473_v32 = vor.u32 %v4472_v19, %v4469_v37  ;;  %v3006_v4 = vld [vmem:[#allocation2 + $0xb0] sm:$0xf] }
 0x37c   : > { %v4492_v25 = vrot.slane %v4490_v16, 5  ;;  %v4851_v8 = vmul.bf16 %v7428_v57, %v4180_v14  ;;  %v4487_v31 = vor.u32 %v4486_v49, %v4483_v41  ;;  %v4852_v56 = vmul.bf16 %v7428_v57, %v4797_v55 }
 0x37d   : > { %v4149_v43 = vadd.bf16 %v4117_v3, %v4048_v20  ;;  %v4853_v34 = vmul.bf16 %v7428_v57, %v4181_v50  ;;  %v4474_v17 = vrot.slane %v4473_v32, 4  ;;  %v6087_v15 = vrot.slane %v4850_v38, 9  ;;  %v8469_v20 = vld [vmem:[#allocation2 + $0xac] sm:$0x1] }
 0x37e   : > { %v5008_v45 = vrot.slane %v4851_v8, 5  ;;  %v1569_v58 = vsel %vm7343_vm3, %v7347_v24, %v1568_v10  ;;  %v4488_v42 = vrot.slane %v4487_v31, 4  ;;  %v6088_v40 = vrot.slane %v4852_v56, 9 }
 0x37f   : > { %v5012_v14 = vrot.slane %v4853_v34, 5  ;;  %1570 = vst [vmem:[#allocation2 + $0xa0] sm:$0xf] %v1569_v58  ;;  %v1572_v3 = vsel %vm7352_vm6, %v7356_v28, %v1571_v9  ;;  %v4479_v50 = vsel %vm7387_vm10, %v4474_v17, %v4478_v22  ;;  %v1988_v29 = vmul.bf16 %v7383_v6, %v8442_v7  ;;  %v8472_v34 = vld [vmem:[#allocation2 + $0xb4] sm:$0x1] }
 0x380   : > { %v5009_v12 = vsel %vm7402_vm13, %v6087_v15, %v5008_v45  ;;  %1573 = vst [vmem:[#allocation2 + $0xa4] sm:$0x1] %v1572_v3  ;;  %v2080_v59 = vmul.bf16 %v7376_v51, %v8442_v7  ;;  %v4493_v1 = vsel %vm7387_vm10, %v4488_v42, %v4492_v25  ;;  %v4764_v18 = vadd.bf16 %v4479_v50, %v4148_v48 }
 0x381   : > { %v5013_v54 = vsel %vm7402_vm13, %v6088_v40, %v5012_v14  ;;  %v2081_v21 = vmul.bf16 %v7376_v51, %v2020_v36  ;;  %v4765_v46 = vadd.bf16 %v4493_v1, %v4149_v43  ;;  %v2699_v61 = vmul.bf16 %v7381_v5, %v2642_v60 }
 0x382   : > { %v2352_v37 = vshrl.u32 %v2080_v59, 16  ;;  %v2355_v62 = vshll.u32 %v2080_v59, 16  ;;  %v5124_v19 = vadd.bf16 %v5009_v12, %v4764_v18  ;;  %v2700_v16 = vmul.bf16 %v7381_v5, %v2020_v36 }
 0x383   : > { %v2361_v22 = vshll.u32 %v2081_v21, 16  ;;  %v3041_v55 = vmul.bf16 %v7422_v52, %v8458_v13  ;;  %v5125_v41 = vadd.bf16 %v5013_v54, %v4765_v46  ;;  %v6022_v10 = vrot.slane %v2699_v61, 9  ;;  %v3721_v46 = vld [vmem:[#allocation2 + $0xa8] sm:$0xe] }
 0x384   : > { %v2354_v49 = vrot.slane %v2352_v37, 4  ;;  %v2357_v38 = vrot.slane %v2355_v62, 5  ;;  %v5156_v48 = vunpack.c.l.bf16 %v5124_v19  ;;  %v2866_v25 = vrot.slane %v2700_v16, 5 }
 0x385   : > { %v2363_v32 = vrot.slane %v2361_v22, 5  ;;  %v3042_v8 = vmul.bf16 %v7422_v52, %v3006_v4  ;;  %v5157_v9 = vunpack.c.l.bf16 %v5125_v41  ;;  %v3161_v7 = vmul.bf16 %v7424_v53, %v8458_v13 }
 0x386   : > { %v1748_v43 = vld [vmem:[#allocation2 + $0xa0] sm:$0x1]  ;;  %v2358_v31 = vor.u32 %v2357_v38, %v2354_v49  ;;  %v2641_v56 = vld [vmem:[#allocation2 + $0xa0] sm:$0xe]  ;;  %v3162_v17 = vmul.bf16 %v7424_v53, %v8469_v20  ;;  %v5195_v15 = vmul.f32 %v8252_v35, %v5156_v48  ;;  %v2867_v42 = vsel %vm7402_vm13, %v6022_v10, %v2866_v25  ;;  %v3722_v49 = vld [vmem:[#allocation2 + $0xb0] sm:$0xe] }
 0x387   : > { %v1749_v45 = vsel %vm7352_vm6, 0, %v1748_v43  ;;  %v1869_v58 = vld [vmem:[#allocation2 + $0xa4] sm:$0x1]  ;;  %v2697_v36 = vmul.bf16 %v7381_v5, %v2641_v56  ;;  %v5196_v40 = vmul.f32 %v8252_v35, %v5157_v9  ;;  %v3163_v60 = vmul.bf16 %v7424_v53, %v3006_v4 }
 0x388   : > { %1750 = vst [vmem:[#allocation2 + $0xa0] sm:$0x1] %v1749_v45  ;;  %v1870_v14 = vsel %vm7364_vm7, 0, %v1869_v58  ;;  %v2359_v3 = vrot.slane %v2358_v31, 4  ;;  %v5234_v50 = vadd.f32 %v8256_v39, %v5195_v15  ;;  %v3164_v59 = vmul.bf16 %v7424_v53, %v8472_v34 }
 0x389   : > { %1871 = vst [vmem:[#allocation2 + $0xa4] sm:$0x1] %v1870_v14  ;;  %v8489_v12 = vrot.slane %v2697_v36, 9  ;;  %v3418_v1 = vshrl.u32 %v3161_v7, 16  ;;  %v5235_v18 = vadd.f32 %v8256_v39, %v5196_v40  ;;  %v3421_v54 = vshll.u32 %v3161_v7, 16 }
 0x38a   : > { %v2364_v35 = vsel %vm7387_vm10, %v2359_v3, %v2363_v32  ;;  %v3427_v21 = vshll.u32 %v3162_v17, 16  ;;  %v5266_v37 = vmax.f32 %v5234_v50, 0.0  ;;  %v3432_v4 = vshrl.u32 %v3163_v60, 16  ;;  %v4083_v3 = vld [vmem:[#allocation2 + $0xb8] sm:$0xf] }
 0x38b   : > { %v2610_v62 = vadd.bf16 %v2364_v35, %v1988_v29  ;;  %v3420_v61 = vrot.slane %v3418_v1, 4  ;;  %v5267_v19 = vmax.f32 %v5235_v18, 0.0  ;;  %v3423_v22 = vrot.slane %v3421_v54, 5  ;;  %v8514_v1 = vld [vmem:[#allocation2 + $0xb0] sm:$0xf] }
 0x38c   : > { %v3429_v16 = vrot.slane %v3427_v21, 5  ;;  %v3435_v41 = vshll.u32 %v3163_v60, 16  ;;  %v3434_v10 = vrot.slane %v3432_v4, 4  ;;  %v3441_v48 = vshll.u32 %v3164_v59, 16 }
 0x38d   : > { %v2973_v38 = vadd.bf16 %v2867_v42, %v2610_v62  ;;  %v3777_v39 = vmul.bf16 %v7418_v47, %v3721_v46  ;;  %v5291_v25 = vpack.c.bf16 %v5267_v19, %v5266_v37  ;;  %v3424_v9 = vor.u32 %v3423_v22, %v3420_v61  ;;  %v4183_v46 = vld [vmem:[#allocation2 + $0xbc] sm:$0x1]  ;;  %v4182_v19 = vld [vmem:[#allocation2 + $0xb4] sm:$0x1] }
 0x38e   : > { %v3437_v32 = vrot.slane %v3435_v41, 5  ;;  %v3778_v43 = vmul.bf16 %v7418_v47, %v8469_v20  ;;  %v3443_v56 = vrot.slane %v3441_v48, 5  ;;  %v3779_v7 = vmul.bf16 %v7418_v47, %v3722_v49 }
 0x38f   : > { %v1948_v31 = vld [vmem:[#allocation2 + $0xa0] sm:$0xf]  ;;  %v3074_v29 = vadd.bf16 %v3042_v8, %v2973_v38  ;;  %v3780_v17 = vmul.bf16 %v7418_v47, %v8472_v34  ;;  %6266 = vmatmul.mubr.bf16.gmra.mrb[8].mxu1 %v5291_v25  ;;  %v3425_v36 = vrot.slane %v3424_v9, 4  ;;  %v8506_v14 = vrot.slane %v3777_v39, 9  ;;  %v4798_v38 = vld [vmem:[#allocation2 + $0xb0] sm:$0xe] }
 0x390   : > { %v1987_v15 = vmul.bf16 %v7383_v6, %v1948_v31  ;;  %v2019_v45 = vld [vmem:[#allocation2 + $0xa4] sm:$0x1]  ;;  %v2078_v58 = vmul.bf16 %v7376_v51, %v1948_v31  ;;  %v3438_v42 = vor.u32 %v3437_v32, %v3434_v10  ;;  %v8508_v8 = vrot.slane %v3778_v43, 5 }
 0x391   : > { %v2079_v40 = vmul.bf16 %v7376_v51, %v2019_v45  ;;  %v2698_v20 = vmul.bf16 %v7381_v5, %v2019_v45  ;;  %v8512_v34 = vsel %vm7387_vm10, %v3425_v36, %v3429_v16  ;;  %v6056_v21 = vrot.slane %v3779_v7, 9 }
 0x392   : > { %v2338_v60 = vshrl.u32 %v2078_v58, 16  ;;  %v2341_v50 = vshll.u32 %v2078_v58, 16  ;;  %v3439_v59 = vrot.slane %v3438_v42, 4  ;;  %v3940_v54 = vsel %vm7402_vm13, %v8506_v14, %v8508_v8  ;;  %v4799_v42 = vld [vmem:[#allocation2 + $0xb8] sm:$0xe] }
 0x393   : > { %v2347_v18 = vshll.u32 %v2079_v40, 16  ;;  %v2862_v35 = vrot.slane %v2698_v20, 5  ;;  %v3943_v4 = vrot.slane %v3780_v17, 5  ;;  %v4118_v49 = vmul.bf16 %v7430_v63, %v8514_v1 }
 0x394   : > { %v2340_v37 = vrot.slane %v2338_v60, 4  ;;  %v2343_v62 = vrot.slane %v2341_v50, 5  ;;  %v3444_v61 = vsel %vm7387_vm10, %v3439_v59, %v3443_v56  ;;  %v4119_v39 = vmul.bf16 %v7430_v63, %v4083_v3 }
 0x395   : > { %v2349_v22 = vrot.slane %v2347_v18, 5  ;;  %v2863_v16 = vsel %vm7402_vm13, %v8489_v12, %v2862_v35  ;;  %v3690_v41 = vadd.bf16 %v3444_v61, %v3074_v29  ;;  %v3944_v48 = vsel %vm7402_vm13, %v6056_v21, %v3943_v4  ;;  %v8538_v21 = vld [vmem:[#allocation2 + $0xb0] sm:$0xf] }
 0x396   : > { %v2344_v10 = vor.u32 %v2343_v62, %v2340_v37  ;;  %v4238_v25 = vmul.bf16 %v7432_v0, %v8514_v1  ;;  %v4239_v32 = vmul.bf16 %v7432_v0, %v4182_v19  ;;  %v4240_v43 = vmul.bf16 %v7432_v0, %v4083_v3 }
 0x397   : > { %v4050_v9 = vadd.bf16 %v3944_v48, %v3690_v41  ;;  %v4241_v12 = vmul.bf16 %v7432_v0, %v4183_v46  ;;  %v4854_v7 = vmul.bf16 %v7428_v57, %v4798_v38  ;;  %v4855_v61 = vmul.bf16 %v7428_v57, %v4182_v19  ;;  %v8542_v41 = vld [vmem:[#allocation2 + $0xb8] sm:$0xf] }
 0x398   : > { %v2345_v31 = vrot.slane %v2344_v10, 4  ;;  %v4495_v29 = vshrl.u32 %v4238_v25, 16  ;;  %v4498_v56 = vshll.u32 %v4238_v25, 16  ;;  %v4504_v45 = vshll.u32 %v4239_v32, 16 }
 0x399   : > { %v4151_v17 = vadd.bf16 %v4119_v39, %v4050_v9  ;;  %v4509_v58 = vshrl.u32 %v4240_v43, 16  ;;  %v4512_v36 = vshll.u32 %v4240_v43, 16  ;;  %v4518_v50 = vshll.u32 %v4241_v12, 16  ;;  %v2021_v39 = vld [vmem:[#allocation2 + $0xb4] sm:$0x1] }
 0x39a   : > { %v2350_v40 = vsel %vm7387_vm10, %v2345_v31, %v2349_v22  ;;  %v4497_v20 = vrot.slane %v4495_v29, 4  ;;  %v4500_v60 = vrot.slane %v4498_v56, 5  ;;  %v4506_v3 = vrot.slane %v4504_v45, 5  ;;  %v2022_v31 = vld [vmem:[#allocation2 + $0xbc] sm:$0x1] }
 0x39b   : > { %v2609_v59 = vadd.bf16 %v2350_v40, %v1987_v15  ;;  %v4511_v18 = vrot.slane %v4509_v58, 4  ;;  %v4514_v35 = vrot.slane %v4512_v36, 5  ;;  %v4520_v62 = vrot.slane %v4518_v50, 5 }
 0x39c   : > { %v4501_v37 = vor.u32 %v4500_v60, %v4497_v20  ;;  %v4856_v4 = vmul.bf16 %v7428_v57, %v4799_v42  ;;  %v4857_v22 = vmul.bf16 %v7428_v57, %v4183_v46  ;;  %v6089_v48 = vrot.slane %v4854_v7, 9 }
 0x39d   : > { %v2972_v38 = vadd.bf16 %v2863_v16, %v2609_v59  ;;  %v4515_v10 = vor.u32 %v4514_v35, %v4511_v18  ;;  %v5016_v25 = vrot.slane %v4855_v61, 5  ;;  %v1989_v32 = vmul.bf16 %v7383_v6, %v8538_v21 }
 0x39e   : > { %v4502_v15 = vrot.slane %v4501_v37, 4  ;;  %v6090_v9 = vrot.slane %v4856_v4, 9  ;;  %v5020_v12 = vrot.slane %v4857_v22, 5  ;;  %v1990_v16 = vmul.bf16 %v7383_v6, %v8542_v41 }
 0x39f   : > { %v3073_v19 = vadd.bf16 %v3041_v55, %v2972_v38  ;;  %v4516_v43 = vrot.slane %v4515_v10, 4  ;;  %v5017_v29 = vsel %vm7402_vm13, %v6089_v48, %v5016_v25  ;;  %v2082_v56 = vmul.bf16 %v7376_v51, %v8538_v21  ;;  %v3007_v25 = vld [vmem:[#allocation2 + $0xb8] sm:$0xf] }
 0x3a0   : > { %v4507_v46 = vsel %vm7387_vm10, %v4502_v15, %v4506_v3  ;;  %v2083_v7 = vmul.bf16 %v7376_v51, %v2021_v39  ;;  %v5021_v45 = vsel %vm7402_vm13, %v6090_v9, %v5020_v12  ;;  %v2084_v58 = vmul.bf16 %v7376_v51, %v8542_v41  ;;  %v2643_v3 = vld [vmem:[#allocation2 + $0xb0] sm:$0xe]  ;;  %v8578_v9 = vld [vmem:[#allocation12] ss:$0 sm:$0xff] }
 0x3a1   : > { %v3689_v13 = vadd.bf16 %v8512_v34, %v3073_v19  ;;  %v4521_v55 = vsel %vm7387_vm10, %v4516_v43, %v4520_v62  ;;  %v2085_v42 = vmul.bf16 %v7376_v51, %v2022_v31  ;;  %v2366_v40 = vshrl.u32 %v2082_v56, 16  ;;  %v2644_v62 = vld [vmem:[#allocation2 + $0xb8] sm:$0xe] }
 0x3a2   : > { %v4767_v36 = vadd.bf16 %v4521_v55, %v4151_v17  ;;  %v2369_v20 = vshll.u32 %v2082_v56, 16  ;;  %v2375_v60 = vshll.u32 %v2083_v7, 16  ;;  %v2380_v50 = vshrl.u32 %v2084_v58, 16  ;;  %v3008_v55 = vld [vmem:[#allocation2 + $0xc0] sm:$0xf] }
 0x3a3   : > { %v4049_v34 = vadd.bf16 %v3940_v54, %v3689_v13  ;;  %v2383_v59 = vshll.u32 %v2084_v58, 16  ;;  %v2368_v35 = vrot.slane %v2366_v40, 4  ;;  %v2389_v37 = vshll.u32 %v2085_v42, 16  ;;  %v3107_v42 = vld [vmem:[#allocation2 + $0xbc] sm:$0x1] }
 0x3a4   : > { %v5127_v18 = vadd.bf16 %v5021_v45, %v4767_v36  ;;  %v2371_v21 = vrot.slane %v2369_v20, 5  ;;  %v2377_v61 = vrot.slane %v2375_v60, 5  ;;  %v2382_v4 = vrot.slane %v2380_v50, 4  ;;  %v3723_v60 = vld [vmem:[#allocation2 + $0xb8] sm:$0xe] }
 0x3a5   : > { %v4150_v17 = vadd.bf16 %v4118_v49, %v4049_v34  ;;  %v2385_v41 = vrot.slane %v2383_v59, 5  ;;  %v2391_v14 = vrot.slane %v2389_v37, 5  ;;  %v2701_v8 = vmul.bf16 %v7381_v5, %v2643_v3  ;;  %v3108_v34 = vld [vmem:[#allocation2 + $0xc4] sm:$0x1] }
 0x3a6   : > { %v5159_v38 = vunpack.c.l.bf16 %v5127_v18  ;;  %v2372_v10 = vor.u32 %v2371_v21, %v2368_v35  ;;  %v2702_v48 = vmul.bf16 %v7381_v5, %v2021_v39  ;;  %v2703_v15 = vmul.bf16 %v7381_v5, %v2644_v62 }
 0x3a7   : > { %v4766_v54 = vadd.bf16 %v4507_v46, %v4150_v17  ;;  %v2386_v22 = vor.u32 %v2385_v41, %v2382_v4  ;;  %v2704_v19 = vmul.bf16 %v7381_v5, %v2022_v31  ;;  %v6023_v43 = vrot.slane %v2701_v8, 9  ;;  %v8582_v46 = vld [vmem:[#allocation14] ss:$0 sm:$0xff] }
 0x3a8   : > { %v5198_v1 = vmul.f32 %v8578_v9, %v5159_v38  ;;  %v2373_v49 = vrot.slane %v2372_v10, 4  ;;  %v2870_v7 = vrot.slane %v2702_v48, 5  ;;  %v6024_v13 = vrot.slane %v2703_v15, 9  ;;  %v3724_v48 = vld [vmem:[#allocation2 + $0xc0] sm:$0xe] }
 0x3a9   : > { %v5126_v12 = vadd.bf16 %v5017_v29, %v4766_v54  ;;  %v2387_v56 = vrot.slane %v2386_v22, 4  ;;  %v2874_v58 = vrot.slane %v2704_v19, 5  ;;  %v3043_v36 = vmul.bf16 %v7422_v52, %v3007_v25  ;;  %v4084_v19 = vld [vmem:[#allocation2 + $0xc0] sm:$0xf] }
 0x3aa   : > { %v5237_v39 = vadd.f32 %v8582_v46, %v5198_v1  ;;  %v2378_v45 = vsel %vm7387_vm10, %v2373_v49, %v2377_v61  ;;  %v2871_v20 = vsel %vm7402_vm13, %v6023_v43, %v2870_v7  ;;  %v3044_v18 = vmul.bf16 %v7422_v52, %v3008_v55 }
 0x3ab   : > { %v5158_v40 = vunpack.c.l.bf16 %v5126_v12  ;;  %v2392_v31 = vsel %vm7387_vm10, %v2387_v56, %v2391_v14  ;;  %v2611_v29 = vadd.bf16 %v2378_v45, %v1989_v32  ;;  %v2875_v3 = vsel %vm7402_vm13, %v6024_v13, %v2874_v58  ;;  %v4085_v13 = vld [vmem:[#allocation2 + $0xc8] sm:$0xf] }
 0x3ac   : > { %v5269_v50 = vmax.f32 %v5237_v39, 0.0  ;;  %v2612_v59 = vadd.bf16 %v2392_v31, %v1990_v16  ;;  %v3165_v37 = vmul.bf16 %v7424_v53, %v3007_v25  ;;  %v3166_v62 = vmul.bf16 %v7424_v53, %v3107_v42 }
 0x3ad   : > { %v5197_v35 = vmul.f32 %v8578_v9, %v5158_v40  ;;  %v2974_v21 = vadd.bf16 %v2871_v20, %v2611_v29  ;;  %v3167_v17 = vmul.bf16 %v7424_v53, %v3008_v55  ;;  %v3168_v61 = vmul.bf16 %v7424_v53, %v3108_v34  ;;  %v4184_v20 = vld [vmem:[#allocation2 + $0xc4] sm:$0x1] }
 0x3ae   : > { %v2975_v32 = vadd.bf16 %v2875_v3, %v2612_v59  ;;  %v3781_v4 = vmul.bf16 %v7418_v47, %v3723_v60  ;;  %v3446_v38 = vshrl.u32 %v3165_v37, 16  ;;  %v3449_v10 = vshll.u32 %v3165_v37, 16  ;;  %v4185_v60 = vld [vmem:[#allocation2 + $0xcc] sm:$0x1] }
 0x3af   : > { %v5236_v16 = vadd.f32 %v8582_v46, %v5197_v35  ;;  %v3075_v41 = vadd.bf16 %v3043_v36, %v2974_v21  ;;  %v3455_v8 = vshll.u32 %v3166_v62, 16  ;;  %v3460_v54 = vshrl.u32 %v3167_v17, 16 }
 0x3b0   : > { %v3076_v14 = vadd.bf16 %v3044_v18, %v2975_v32  ;;  %v3463_v22 = vshll.u32 %v3167_v17, 16  ;;  %v3448_v25 = vrot.slane %v3446_v38, 4  ;;  %v3451_v1 = vrot.slane %v3449_v10, 5 }
 0x3b1   : > { %v5268_v15 = vmax.f32 %v5236_v16, 0.0  ;;  %v3469_v49 = vshll.u32 %v3168_v61, 16  ;;  %v3457_v43 = vrot.slane %v3455_v8, 5  ;;  %v3462_v12 = vrot.slane %v3460_v54, 4 }
 0x3b2   : > { %v3465_v56 = vrot.slane %v3463_v22, 5  ;;  %v3782_v7 = vmul.bf16 %v7418_v47, %v3107_v42  ;;  %v3452_v39 = vor.u32 %v3451_v1, %v3448_v25  ;;  %v3783_v58 = vmul.bf16 %v7418_v47, %v3724_v48  ;;  %v4800_v48 = vld [vmem:[#allocation2 + $0xc0] sm:$0xe] }
 0x3b3   : > { %v5292_v55 = vpack.c.bf16 %v5269_v50, %v5268_v15  ;;  %v3471_v45 = vrot.slane %v3469_v49, 5  ;;  %v3784_v40 = vmul.bf16 %v7418_v47, %v3108_v34  ;;  %v6057_v31 = vrot.slane %v3781_v4, 9 }
 0x3b4   : > { %v3466_v36 = vor.u32 %v3465_v56, %v3462_v12  ;;  %v3947_v29 = vrot.slane %v3782_v7, 5  ;;  %v3453_v59 = vrot.slane %v3452_v39, 4  ;;  %v6058_v3 = vrot.slane %v3783_v58, 9 }
 0x3b5   : > { %6269 = vmatprep.mubr.bf16.mxu1 %v5292_v55  ;;  %v4120_v18 = vmul.bf16 %v7430_v63, %v4084_v19  ;;  %v4121_v42 = vmul.bf16 %v7430_v63, %v4085_v13  ;;  %v3951_v21 = vrot.slane %v3784_v40, 5  ;;  %v4242_v37 = vmul.bf16 %v7432_v0, %v4084_v19  ;;  %v4801_v19 = vld [vmem:[#allocation2 + $0xc8] sm:$0xe] }
 0x3b6   : > { %v3467_v35 = vrot.slane %v3466_v36, 4  ;;  %v3948_v50 = vsel %vm7402_vm13, %v6057_v31, %v3947_v29  ;;  %v3458_v34 = vsel %vm7387_vm10, %v3453_v59, %v3457_v43  ;;  %v4243_v62 = vmul.bf16 %v7432_v0, %v4184_v20  ;;  %v2023_v29 = vld [vmem:[#allocation2 + $0xc4] sm:$0x1] }
 0x3b7   : > { %v4244_v32 = vmul.bf16 %v7432_v0, %v4085_v13  ;;  %v4245_v17 = vmul.bf16 %v7432_v0, %v4185_v60  ;;  %v3691_v4 = vadd.bf16 %v3458_v34, %v3075_v41  ;;  %v3952_v16 = vsel %vm7402_vm13, %v6058_v3, %v3951_v21  ;;  %v8619_v13 = vld [vmem:[#allocation2 + $0xc0] sm:$0xf] }
 0x3b8   : > { %v3472_v61 = vsel %vm7387_vm10, %v3467_v35, %v3471_v45  ;;  %v4523_v38 = vshrl.u32 %v4242_v37, 16  ;;  %v4526_v8 = vshll.u32 %v4242_v37, 16  ;;  %v4532_v54 = vshll.u32 %v4243_v62, 16  ;;  %v8622_v45 = vld [vmem:[#allocation2 + $0xc8] sm:$0xf] }
 0x3b9   : > { %v3692_v10 = vadd.bf16 %v3472_v61, %v3076_v14  ;;  %v4537_v22 = vshrl.u32 %v4244_v32, 16  ;;  %v4051_v15 = vadd.bf16 %v3948_v50, %v3691_v4  ;;  %v4540_v1 = vshll.u32 %v4244_v32, 16  ;;  %v2024_v50 = vld [vmem:[#allocation2 + $0xcc] sm:$0x1] }
 0x3ba   : > { %v4525_v25 = vrot.slane %v4523_v38, 4  ;;  %v4546_v49 = vshll.u32 %v4245_v17, 16  ;;  %v4528_v12 = vrot.slane %v4526_v8, 5  ;;  %v4534_v56 = vrot.slane %v4532_v54, 5 }
 0x3bb   : > { %v4052_v43 = vadd.bf16 %v3952_v16, %v3692_v10  ;;  %v4539_v7 = vrot.slane %v4537_v22, 4  ;;  %v4152_v41 = vadd.bf16 %v4120_v18, %v4051_v15  ;;  %v4542_v55 = vrot.slane %v4540_v1, 5  ;;  %v2645_v1 = vld [vmem:[#allocation2 + $0xc0] sm:$0xe] }
 0x3bc   : > { %v4548_v39 = vrot.slane %v4546_v49, 5  ;;  %v4858_v14 = vmul.bf16 %v7428_v57, %v4800_v48  ;;  %v4529_v36 = vor.u32 %v4528_v12, %v4525_v25  ;;  %v4859_v40 = vmul.bf16 %v7428_v57, %v4184_v20 }
 0x3bd   : > { %v4153_v58 = vadd.bf16 %v4121_v42, %v4052_v43  ;;  %v4860_v31 = vmul.bf16 %v7428_v57, %v4801_v19  ;;  %v4543_v59 = vor.u32 %v4542_v55, %v4539_v7  ;;  %v4861_v3 = vmul.bf16 %v7428_v57, %v4185_v60 }
 0x3be   : > { %v6091_v35 = vrot.slane %v4858_v14, 9  ;;  %v1991_v18 = vmul.bf16 %v7383_v6, %v8619_v13  ;;  %v4530_v21 = vrot.slane %v4529_v36, 4  ;;  %v5024_v37 = vrot.slane %v4859_v40, 5 }
 0x3bf   : > { %v6092_v34 = vrot.slane %v4860_v31, 9  ;;  %v1992_v42 = vmul.bf16 %v7383_v6, %v8622_v45  ;;  %v4544_v62 = vrot.slane %v4543_v59, 4  ;;  %v5028_v32 = vrot.slane %v4861_v3, 5 }
 0x3c0   : > { %v2086_v20 = vmul.bf16 %v7376_v51, %v8619_v13  ;;  %v2087_v17 = vmul.bf16 %v7376_v51, %v2023_v29  ;;  %v4535_v60 = vsel %vm7387_vm10, %v4530_v21, %v4534_v56  ;;  %v5025_v61 = vsel %vm7402_vm13, %v6091_v35, %v5024_v37  ;;  %v2646_v56 = vld [vmem:[#allocation2 + $0xc8] sm:$0xe] }
 0x3c1   : > { %v2088_v4 = vmul.bf16 %v7376_v51, %v8622_v45  ;;  %v2089_v16 = vmul.bf16 %v7376_v51, %v2024_v50  ;;  %v4549_v38 = vsel %vm7387_vm10, %v4544_v62, %v4548_v39  ;;  %v4768_v10 = vadd.bf16 %v4535_v60, %v4152_v41  ;;  %v3009_v35 = vld [vmem:[#allocation2 + $0xc8] sm:$0xf] }
 0x3c2   : > { %v5029_v8 = vsel %vm7402_vm13, %v6092_v34, %v5028_v32  ;;  %v2394_v54 = vshrl.u32 %v2086_v20, 16  ;;  %v4769_v22 = vadd.bf16 %v4549_v38, %v4153_v58  ;;  %v2397_v48 = vshll.u32 %v2086_v20, 16  ;;  %v3010_v32 = vld [vmem:[#allocation2 + $0xd0] sm:$0xf] }
 0x3c3   : > { %v2403_v15 = vshll.u32 %v2087_v17, 16  ;;  %v2408_v25 = vshrl.u32 %v2088_v4, 16  ;;  %v5128_v49 = vadd.bf16 %v5025_v61, %v4768_v10  ;;  %v2411_v43 = vshll.u32 %v2088_v4, 16  ;;  %v3109_v10 = vld [vmem:[#allocation2 + $0xcc] sm:$0x1] }
 0x3c4   : > { %v2396_v19 = vrot.slane %v2394_v54, 4  ;;  %v2417_v12 = vshll.u32 %v2089_v16, 16  ;;  %v5129_v7 = vadd.bf16 %v5029_v8, %v4769_v22  ;;  %v2399_v55 = vrot.slane %v2397_v48, 5  ;;  %v3110_v48 = vld [vmem:[#allocation2 + $0xd4] sm:$0x1] }
 0x3c5   : > { %v2405_v14 = vrot.slane %v2403_v15, 5  ;;  %v2410_v45 = vrot.slane %v2408_v25, 4  ;;  %v5160_v39 = vunpack.c.l.bf16 %v5128_v49  ;;  %v2413_v41 = vrot.slane %v2411_v43, 5  ;;  %v3725_v15 = vld [vmem:[#allocation2 + $0xc8] sm:$0xe] }
 0x3c6   : > { %v2419_v36 = vrot.slane %v2417_v12, 5  ;;  %v2705_v40 = vmul.bf16 %v7381_v5, %v2645_v1  ;;  %v5161_v31 = vunpack.c.l.bf16 %v5129_v7  ;;  %v2400_v58 = vor.u32 %v2399_v55, %v2396_v19 }
 0x3c7   : > { %v2706_v59 = vmul.bf16 %v7381_v5, %v2023_v29  ;;  %v2707_v3 = vmul.bf16 %v7381_v5, %v2646_v56  ;;  %v5199_v21 = vmul.f32 %v8578_v9, %v5160_v39  ;;  %v2414_v37 = vor.u32 %v2413_v41, %v2410_v45 }
 0x3c8   : > { %v2708_v34 = vmul.bf16 %v7381_v5, %v2024_v50  ;;  %v6025_v62 = vrot.slane %v2705_v40, 9  ;;  %v5200_v20 = vmul.f32 %v8578_v9, %v5161_v31  ;;  %v2401_v17 = vrot.slane %v2400_v58, 4 }
 0x3c9   : > { %v2878_v60 = vrot.slane %v2706_v59, 5  ;;  %v6026_v61 = vrot.slane %v2707_v3, 9  ;;  %v5238_v4 = vadd.f32 %v8582_v46, %v5199_v21  ;;  %v2415_v16 = vrot.slane %v2414_v37, 4 }
 0x3ca   : > { %v2882_v38 = vrot.slane %v2708_v34, 5  ;;  %v3045_v29 = vmul.bf16 %v7422_v52, %v3009_v35  ;;  %v5239_v8 = vadd.f32 %v8582_v46, %v5200_v20  ;;  %v2406_v54 = vsel %vm7387_vm10, %v2401_v17, %v2405_v14  ;;  %v4086_v34 = vld [vmem:[#allocation2 + $0xd0] sm:$0xf] }
 0x3cb   : > { %v2879_v50 = vsel %vm7402_vm13, %v6025_v62, %v2878_v60  ;;  %v3046_v22 = vmul.bf16 %v7422_v52, %v3010_v32  ;;  %v5270_v25 = vmax.f32 %v5238_v4, 0.0  ;;  %v2420_v1 = vsel %vm7387_vm10, %v2415_v16, %v2419_v36  ;;  %v4087_v60 = vld [vmem:[#allocation2 + $0xd8] sm:$0xf] }
 0x3cc   : > { %v2613_v49 = vadd.bf16 %v2406_v54, %v1991_v18  ;;  %v2883_v19 = vsel %vm7402_vm13, %v6026_v61, %v2882_v38  ;;  %v5271_v43 = vmax.f32 %v5239_v8, 0.0  ;;  %v2614_v12 = vadd.bf16 %v2420_v1, %v1992_v42  ;;  %v3726_v42 = vld [vmem:[#allocation2 + $0xd0] sm:$0xe] }
 0x3cd   : > { %v3169_v56 = vmul.bf16 %v7424_v53, %v3009_v35  ;;  %v3170_v7 = vmul.bf16 %v7424_v53, %v3109_v10  ;;  %v3171_v14 = vmul.bf16 %v7424_v53, %v3010_v32  ;;  %v3172_v45 = vmul.bf16 %v7424_v53, %v3110_v48 }
 0x3ce   : > { %v2976_v55 = vadd.bf16 %v2879_v50, %v2613_v49  ;;  %v3785_v39 = vmul.bf16 %v7418_v47, %v3725_v15  ;;  %v5293_v41 = vpack.c.bf16 %v5271_v43, %v5270_v25  ;;  %v2977_v36 = vadd.bf16 %v2883_v19, %v2614_v12  ;;  %v4187_v15 = vld [vmem:[#allocation2 + $0xdc] sm:$0x1] }
 0x3cf   : > { %v3474_v13 = vshrl.u32 %v3169_v56, 16  ;;  %v3477_v18 = vshll.u32 %v3169_v56, 16  ;;  %v3483_v31 = vshll.u32 %v3170_v7, 16  ;;  %v3488_v58 = vshrl.u32 %v3171_v14, 16 }
 0x3d0   : > { %v3077_v40 = vadd.bf16 %v3045_v29, %v2976_v55  ;;  %v3491_v59 = vshll.u32 %v3171_v14, 16  ;;  %6270 = vmatmul.mubr.bf16.gmra.mrb[12].mxu1 %v5293_v41  ;;  %v3078_v3 = vadd.bf16 %v3046_v22, %v2977_v36  ;;  %v3497_v37 = vshll.u32 %v3172_v45, 16  ;;  %v4186_v29 = vld [vmem:[#allocation2 + $0xd4] sm:$0x1] }
 0x3d1   : > { %v3476_v35 = vrot.slane %v3474_v13, 4  ;;  %v3479_v21 = vrot.slane %v3477_v18, 5  ;;  %v3485_v62 = vrot.slane %v3483_v31, 5  ;;  %v3490_v32 = vrot.slane %v3488_v58, 4 }
 0x3d2   : > { %v3493_v20 = vrot.slane %v3491_v59, 5  ;;  %v3786_v17 = vmul.bf16 %v7418_v47, %v3109_v10  ;;  %v3499_v4 = vrot.slane %v3497_v37, 5  ;;  %v3787_v16 = vmul.bf16 %v7418_v47, %v3726_v42  ;;  %v4802_v59 = vld [vmem:[#allocation2 + $0xd0] sm:$0xe] }
 0x3d3   : > { %v3480_v61 = vor.u32 %v3479_v21, %v3476_v35  ;;  %v3788_v38 = vmul.bf16 %v7418_v47, %v3110_v48  ;;  %v6059_v54 = vrot.slane %v3785_v39, 9  ;;  %v4122_v22 = vmul.bf16 %v7430_v63, %v4086_v34 }
 0x3d4   : > { %v3494_v8 = vor.u32 %v3493_v20, %v3490_v32  ;;  %v3955_v50 = vrot.slane %v3786_v17, 5  ;;  %v6060_v1 = vrot.slane %v3787_v16, 9  ;;  %v4123_v19 = vmul.bf16 %v7430_v63, %v4087_v60 }
 0x3d5   : > { %v3481_v25 = vrot.slane %v3480_v61, 4  ;;  %v3959_v49 = vrot.slane %v3788_v38, 5  ;;  %v4246_v12 = vmul.bf16 %v7432_v0, %v4086_v34  ;;  %v4247_v48 = vmul.bf16 %v7432_v0, %v4186_v29  ;;  %v4803_v34 = vld [vmem:[#allocation2 + $0xd8] sm:$0xe] }
 0x3d6   : > { %v3495_v10 = vrot.slane %v3494_v8, 4  ;;  %v3956_v43 = vsel %vm7402_vm13, %v6059_v54, %v3955_v50  ;;  %v4248_v55 = vmul.bf16 %v7432_v0, %v4087_v60  ;;  %v4249_v14 = vmul.bf16 %v7432_v0, %v4187_v15  ;;  %v1622_v60 = vld [vmem:[#allocation2 + $0xe8] sm:$0xf] }
 0x3d7   : > { %v3486_v56 = vsel %vm7387_vm10, %v3481_v25, %v3485_v62  ;;  %v3960_v7 = vsel %vm7402_vm13, %v6060_v1, %v3959_v49  ;;  %v4551_v41 = vshrl.u32 %v4246_v12, 16  ;;  %v4554_v36 = vshll.u32 %v4246_v12, 16  ;;  %v8691_v25 = vld [vmem:[#allocation2 + $0xd0] sm:$0xf]  ;;  %v8693_v1 = vld [vmem:[#allocation2 + $0xd8] sm:$0xf] }
 0x3d8   : > { %v3500_v45 = vsel %vm7387_vm10, %v3495_v10, %v3499_v4  ;;  %v3693_v39 = vadd.bf16 %v3486_v56, %v3077_v40  ;;  %v4560_v18 = vshll.u32 %v4247_v48, 16  ;;  %v4565_v31 = vshrl.u32 %v4248_v55, 16  ;;  %v2025_v56 = vld [vmem:[#allocation2 + $0xd4] sm:$0x1] }
 0x3d9   : > { %v3694_v13 = vadd.bf16 %v3500_v45, %v3078_v3  ;;  %v4568_v58 = vshll.u32 %v4248_v55, 16  ;;  %v4553_v35 = vrot.slane %v4551_v41, 4  ;;  %v4556_v21 = vrot.slane %v4554_v36, 5  ;;  %v1625_v3 = vld [vmem:[#allocation2 + $0xec] sm:$0x1] }
 0x3da   : > { %v4053_v42 = vadd.bf16 %v3956_v43, %v3693_v39  ;;  %v4574_v37 = vshll.u32 %v4249_v14, 16  ;;  %v4562_v32 = vrot.slane %v4560_v18, 5  ;;  %v4567_v20 = vrot.slane %v4565_v31, 4  ;;  %v2026_v45 = vld [vmem:[#allocation2 + $0xdc] sm:$0x1] }
 0x3db   : > { %v4054_v62 = vadd.bf16 %v3960_v7, %v3694_v13  ;;  %v4570_v17 = vrot.slane %v4568_v58, 5  ;;  %v4557_v4 = vor.u32 %v4556_v21, %v4553_v35  ;;  %v4862_v16 = vmul.bf16 %v7428_v57, %v4802_v59 }
 0x3dc   : > { %v4154_v61 = vadd.bf16 %v4122_v22, %v4053_v42  ;;  %v4576_v40 = vrot.slane %v4574_v37, 5  ;;  %v4863_v54 = vmul.bf16 %v7428_v57, %v4186_v29  ;;  %v4864_v50 = vmul.bf16 %v7428_v57, %v4803_v34 }
 0x3dd   : > { %v4155_v38 = vadd.bf16 %v4123_v19, %v4054_v62  ;;  %v4571_v8 = vor.u32 %v4570_v17, %v4567_v20  ;;  %v4558_v49 = vrot.slane %v4557_v4, 4  ;;  %v4865_v10 = vmul.bf16 %v7428_v57, %v4187_v15  ;;  %v2648_v17 = vld [vmem:[#allocation2 + $0xd8] sm:$0xe] }
 0x3de   : > { %v6093_v43 = vrot.slane %v4862_v16, 9  ;;  %v1623_v22 = vsel %vm7343_vm3, %v7347_v24, %v1622_v60  ;;  %v5032_v48 = vrot.slane %v4863_v54, 5  ;;  %v6094_v19 = vrot.slane %v4864_v50, 9  ;;  %v2647_v16 = vld [vmem:[#allocation2 + $0xd0] sm:$0xe] }
 0x3df   : > { %v4572_v12 = vrot.slane %v4571_v8, 4  ;;  %1624 = vst [vmem:[#allocation2 + $0xe8] sm:$0xf] %v1623_v22  ;;  %v1626_v29 = vsel %vm7352_vm6, %v7356_v28, %v1625_v3  ;;  %v4563_v7 = vsel %vm7387_vm10, %v4558_v49, %v4562_v32  ;;  %v5036_v55 = vrot.slane %v4865_v10, 5 }
 0x3e0   : > { %1627 = vst [vmem:[#allocation2 + $0xec] sm:$0x1] %v1626_v29  ;;  %v1993_v15 = vmul.bf16 %v7383_v6, %v8691_v25  ;;  %v1994_v14 = vmul.bf16 %v7383_v6, %v8693_v1  ;;  %v4770_v41 = vadd.bf16 %v4563_v7, %v4154_v61  ;;  %v5033_v36 = vsel %vm7402_vm13, %v6093_v43, %v5032_v48 }
 0x3e1   : > { %v4577_v39 = vsel %vm7387_vm10, %v4572_v12, %v4576_v40  ;;  %v2090_v13 = vmul.bf16 %v7376_v51, %v8691_v25  ;;  %v5037_v31 = vsel %vm7402_vm13, %v6094_v19, %v5036_v55  ;;  %v2091_v58 = vmul.bf16 %v7376_v51, %v2025_v56 }
 0x3e2   : > { %v4771_v18 = vadd.bf16 %v4577_v39, %v4155_v38  ;;  %v2092_v59 = vmul.bf16 %v7376_v51, %v8693_v1  ;;  %v5130_v42 = vadd.bf16 %v5033_v36, %v4770_v41  ;;  %v2093_v35 = vmul.bf16 %v7376_v51, %v2026_v45 }
 0x3e3   : > { %v2422_v21 = vshrl.u32 %v2090_v13, 16  ;;  %v2425_v37 = vshll.u32 %v2090_v13, 16  ;;  %v2431_v62 = vshll.u32 %v2091_v58, 16  ;;  %v2709_v19 = vmul.bf16 %v7381_v5, %v2647_v16  ;;  %v3012_v58 = vld [vmem:[#allocation2 + $0xe0] sm:$0xf] }
 0x3e4   : > { %v5131_v34 = vadd.bf16 %v5037_v31, %v4771_v18  ;;  %v2436_v32 = vshrl.u32 %v2092_v59, 16  ;;  %v2439_v20 = vshll.u32 %v2092_v59, 16  ;;  %v5162_v60 = vunpack.c.l.bf16 %v5130_v42  ;;  %v3011_v31 = vld [vmem:[#allocation2 + $0xd8] sm:$0xf] }
 0x3e5   : > { %v2424_v61 = vrot.slane %v2422_v21, 4  ;;  %v2427_v4 = vrot.slane %v2425_v37, 5  ;;  %v2445_v40 = vshll.u32 %v2093_v35, 16  ;;  %v2433_v8 = vrot.slane %v2431_v62, 5 }
 0x3e6   : > { %v5163_v3 = vunpack.c.l.bf16 %v5131_v34  ;;  %v1775_v38 = vld [vmem:[#allocation2 + $0xe8] sm:$0x1]  ;;  %v2438_v54 = vrot.slane %v2436_v32, 4  ;;  %v2441_v50 = vrot.slane %v2439_v20, 5  ;;  %v5201_v25 = vmul.f32 %v8578_v9, %v5162_v60  ;;  %v3111_v32 = vld [vmem:[#allocation2 + $0xdc] sm:$0x1] }
 0x3e7   : > { %v1776_v1 = vsel %vm7352_vm6, 0, %v1775_v38  ;;  %v1896_v49 = vld [vmem:[#allocation2 + $0xec] sm:$0x1]  ;;  %v2428_v10 = vor.u32 %v2427_v4, %v2424_v61  ;;  %v2447_v43 = vrot.slane %v2445_v40, 5  ;;  %v2710_v55 = vmul.bf16 %v7381_v5, %v2025_v56  ;;  %v3112_v20 = vld [vmem:[#allocation2 + $0xe4] sm:$0x1] }
 0x3e8   : > { %v5202_v22 = vmul.f32 %v8578_v9, %v5163_v3  ;;  %1777 = vst [vmem:[#allocation2 + $0xe8] sm:$0x1] %v1776_v1  ;;  %v1897_v12 = vsel %vm7364_vm7, 0, %v1896_v49  ;;  %v2442_v48 = vor.u32 %v2441_v50, %v2438_v54  ;;  %v5240_v29 = vadd.f32 %v8582_v46, %v5201_v25  ;;  %v3727_v4 = vld [vmem:[#allocation2 + $0xd8] sm:$0xe] }
 0x3e9   : > { %1898 = vst [vmem:[#allocation2 + $0xec] sm:$0x1] %v1897_v12  ;;  %v2429_v7 = vrot.slane %v2428_v10, 4  ;;  %v2711_v39 = vmul.bf16 %v7381_v5, %v2648_v17  ;;  %v2712_v13 = vmul.bf16 %v7381_v5, %v2026_v45  ;;  %v6027_v18 = vrot.slane %v2709_v19, 9  ;;  %v3728_v49 = vld [vmem:[#allocation2 + $0xe0] sm:$0xe] }
 0x3ea   : > { %v5241_v41 = vadd.f32 %v8582_v46, %v5202_v22  ;;  %v2443_v36 = vrot.slane %v2442_v48, 4  ;;  %v5272_v59 = vmax.f32 %v5240_v29, 0.0  ;;  %v2886_v35 = vrot.slane %v2710_v55, 5 }
 0x3eb   : > { %v2434_v42 = vsel %vm7387_vm10, %v2429_v7, %v2433_v8  ;;  %v6028_v21 = vrot.slane %v2711_v39, 9  ;;  %v2890_v62 = vrot.slane %v2712_v13, 5  ;;  %v3047_v60 = vmul.bf16 %v7422_v52, %v3011_v31  ;;  %v4088_v39 = vld [vmem:[#allocation2 + $0xe0] sm:$0xf] }
 0x3ec   : > { %v5273_v37 = vmax.f32 %v5241_v41, 0.0  ;;  %v2448_v56 = vsel %vm7387_vm10, %v2443_v36, %v2447_v43  ;;  %v2615_v34 = vadd.bf16 %v2434_v42, %v1993_v15  ;;  %v2887_v45 = vsel %vm7402_vm13, %v6027_v18, %v2886_v35 }
 0x3ed   : > { %v2616_v17 = vadd.bf16 %v2448_v56, %v1994_v14  ;;  %v3048_v61 = vmul.bf16 %v7422_v52, %v3012_v58  ;;  %v2891_v16 = vsel %vm7402_vm13, %v6028_v21, %v2890_v62  ;;  %v3173_v38 = vmul.bf16 %v7424_v53, %v3011_v31  ;;  %v4188_v21 = vld [vmem:[#allocation2 + $0xe4] sm:$0x1] }
 0x3ee   : > { %v5294_v40 = vpack.c.bf16 %v5273_v37, %v5272_v59  ;;  %v2978_v3 = vadd.bf16 %v2887_v45, %v2615_v34  ;;  %v3174_v8 = vmul.bf16 %v7424_v53, %v3111_v32  ;;  %v3175_v14 = vmul.bf16 %v7424_v53, %v3012_v58 }
 0x3ef   : > { %v2979_v15 = vadd.bf16 %v2891_v16, %v2616_v17  ;;  %v3176_v54 = vmul.bf16 %v7424_v53, %v3112_v20  ;;  %v3502_v25 = vshrl.u32 %v3173_v38, 16  ;;  %v3505_v1 = vshll.u32 %v3173_v38, 16  ;;  %v4089_v35 = vld [vmem:[#allocation2 + $0xe8] sm:$0xf] }
 0x3f0   : > { %6273 = vmatprep.mubr.bf16.mxu1 %v5294_v40  ;;  %v3079_v50 = vadd.bf16 %v3047_v60, %v2978_v3  ;;  %v3789_v10 = vmul.bf16 %v7418_v47, %v3727_v4  ;;  %v3511_v22 = vshll.u32 %v3174_v8, 16  ;;  %v3516_v12 = vshrl.u32 %v3175_v14, 16  ;;  %v4189_v17 = vld [vmem:[#allocation2 + $0xec] sm:$0x1] }
 0x3f1   : > { %v3080_v43 = vadd.bf16 %v3048_v61, %v2979_v15  ;;  %v3519_v48 = vshll.u32 %v3175_v14, 16  ;;  %v3504_v19 = vrot.slane %v3502_v25, 4  ;;  %v3507_v29 = vrot.slane %v3505_v1, 5 }
 0x3f2   : > { %v3525_v7 = vshll.u32 %v3176_v54, 16  ;;  %v3790_v55 = vmul.bf16 %v7418_v47, %v3111_v32  ;;  %v3513_v41 = vrot.slane %v3511_v22, 5  ;;  %v3518_v36 = vrot.slane %v3516_v12, 4 }
 0x3f3   : > { %v3521_v13 = vrot.slane %v3519_v48, 5  ;;  %v3791_v18 = vmul.bf16 %v7418_v47, %v3728_v49  ;;  %v3508_v31 = vor.u32 %v3507_v29, %v3504_v19  ;;  %v3792_v59 = vmul.bf16 %v7418_v47, %v3112_v20  ;;  %v4804_v49 = vld [vmem:[#allocation2 + $0xe0] sm:$0xe] }
 0x3f4   : > { %v3527_v58 = vrot.slane %v3525_v7, 5  ;;  %v6061_v42 = vrot.slane %v3789_v10, 9  ;;  %v3963_v56 = vrot.slane %v3790_v55, 5  ;;  %v4124_v62 = vmul.bf16 %v7430_v63, %v4088_v39 }
 0x3f5   : > { %v3522_v37 = vor.u32 %v3521_v13, %v3518_v36  ;;  %v6062_v34 = vrot.slane %v3791_v18, 9  ;;  %v3509_v32 = vrot.slane %v3508_v31, 4  ;;  %v3967_v45 = vrot.slane %v3792_v59, 5  ;;  %v1628_v31 = vld [vmem:[#allocation2 + $0xf0] sm:$0xf] }
 0x3f6   : > { %v4125_v60 = vmul.bf16 %v7430_v63, %v4089_v35  ;;  %v4250_v61 = vmul.bf16 %v7432_v0, %v4088_v39  ;;  %v3964_v40 = vsel %vm7402_vm13, %v6061_v42, %v3963_v56  ;;  %v4251_v20 = vmul.bf16 %v7432_v0, %v4188_v21  ;;  %v4805_v39 = vld [vmem:[#allocation2 + $0xe8] sm:$0xe] }
 0x3f7   : > { %v3523_v4 = vrot.slane %v3522_v37, 4  ;;  %v4252_v16 = vmul.bf16 %v7432_v0, %v4089_v35  ;;  %v3514_v3 = vsel %vm7387_vm10, %v3509_v32, %v3513_v41  ;;  %v3968_v38 = vsel %vm7402_vm13, %v6062_v34, %v3967_v45  ;;  %v8768_v32 = vld [vmem:[#allocation2 + $0xf8] sm:$0xf] }
 0x3f8   : > { %v4253_v15 = vmul.bf16 %v7432_v0, %v4189_v17  ;;  %v4579_v8 = vshrl.u32 %v4250_v61, 16  ;;  %v3695_v54 = vadd.bf16 %v3514_v3, %v3079_v50  ;;  %v4582_v25 = vshll.u32 %v4250_v61, 16  ;;  %v2650_v3 = vld [vmem:[#allocation2 + $0xf8] sm:$0xe] }
 0x3f9   : > { %v3528_v14 = vsel %vm7387_vm10, %v3523_v4, %v3527_v58  ;;  %v4588_v1 = vshll.u32 %v4251_v20, 16  ;;  %v4593_v12 = vshrl.u32 %v4252_v16, 16  ;;  %v4596_v48 = vshll.u32 %v4252_v16, 16 }
 0x3fa   : > { %v3696_v10 = vadd.bf16 %v3528_v14, %v3080_v43  ;;  %v4581_v22 = vrot.slane %v4579_v8, 4  ;;  %v4055_v19 = vadd.bf16 %v3964_v40, %v3695_v54  ;;  %v4584_v29 = vrot.slane %v4582_v25, 5  ;;  %v1631_v43 = vld [vmem:[#allocation2 + $0xf4] sm:$0x1]  ;;  %v2028_v40 = vld [vmem:[#allocation2 + $0xfc] sm:$0x1] }
 0x3fb   : > { %v4590_v7 = vrot.slane %v4588_v1, 5  ;;  %v4602_v55 = vshll.u32 %v4253_v15, 16  ;;  %v4595_v36 = vrot.slane %v4593_v12, 4  ;;  %v4598_v13 = vrot.slane %v4596_v48, 5  ;;  %v8784_v14 = vld [vmem:[#allocation2 + $0xf8] sm:$0xf] }
 0x3fc   : > { %v4056_v41 = vadd.bf16 %v3968_v38, %v3696_v10  ;;  %v4866_v18 = vmul.bf16 %v7428_v57, %v4804_v49  ;;  %v4156_v58 = vadd.bf16 %v4124_v62, %v4055_v19  ;;  %v4585_v50 = vor.u32 %v4584_v29, %v4581_v22  ;;  %v3014_v19 = vld [vmem:[#allocation2 + $0x100] sm:$0xf] }
 0x3fd   : > { %v4604_v59 = vrot.slane %v4602_v55, 5  ;;  %v4867_v42 = vmul.bf16 %v7428_v57, %v4188_v21  ;;  %v4599_v37 = vor.u32 %v4598_v13, %v4595_v36  ;;  %v4868_v56 = vmul.bf16 %v7428_v57, %v4805_v39 }
 0x3fe   : > { %v4157_v35 = vadd.bf16 %v4125_v60, %v4056_v41  ;;  %v4869_v34 = vmul.bf16 %v7428_v57, %v4189_v17  ;;  %v4586_v45 = vrot.slane %v4585_v50, 4  ;;  %v6095_v61 = vrot.slane %v4866_v18, 9  ;;  %v8795_v41 = vld [vmem:[#allocation2 + $0xfc] sm:$0x1] }
 0x3ff   : > { %v5040_v4 = vrot.slane %v4867_v42, 5  ;;  %v1629_v62 = vsel %vm7343_vm3, %v7347_v24, %v1628_v31  ;;  %v4600_v20 = vrot.slane %v4599_v37, 4  ;;  %v6096_v16 = vrot.slane %v4868_v56, 9 }
 0x400   : > { %v5044_v21 = vrot.slane %v4869_v34, 5  ;;  %1630 = vst [vmem:[#allocation2 + $0xf0] sm:$0xf] %v1629_v62  ;;  %v1632_v60 = vsel %vm7352_vm6, %v7356_v28, %v1631_v43  ;;  %v4591_v17 = vsel %vm7387_vm10, %v4586_v45, %v4590_v7  ;;  %v1996_v15 = vmul.bf16 %v7383_v6, %v8768_v32  ;;  %v8798_v34 = vld [vmem:[#allocation2 + $0x104] sm:$0x1] }
 0x401   : > { %v5041_v38 = vsel %vm7402_vm13, %v6095_v61, %v5040_v4  ;;  %1633 = vst [vmem:[#allocation2 + $0xf4] sm:$0x1] %v1632_v60  ;;  %v2096_v8 = vmul.bf16 %v7376_v51, %v8768_v32  ;;  %v4605_v54 = vsel %vm7387_vm10, %v4600_v20, %v4604_v59  ;;  %v4772_v25 = vadd.bf16 %v4591_v17, %v4156_v58 }
 0x402   : > { %v5045_v1 = vsel %vm7402_vm13, %v6096_v16, %v5044_v21  ;;  %v2097_v49 = vmul.bf16 %v7376_v51, %v2028_v40  ;;  %v4773_v10 = vadd.bf16 %v4605_v54, %v4157_v35  ;;  %v2715_v48 = vmul.bf16 %v7381_v5, %v2650_v3 }
 0x403   : > { %v2464_v22 = vshrl.u32 %v2096_v8, 16  ;;  %v2467_v12 = vshll.u32 %v2096_v8, 16  ;;  %v5132_v29 = vadd.bf16 %v5041_v38, %v4772_v25  ;;  %v2716_v55 = vmul.bf16 %v7381_v5, %v2028_v40 }
 0x404   : > { %v2473_v7 = vshll.u32 %v2097_v49, 16  ;;  %v3049_v39 = vmul.bf16 %v7422_v52, %v8784_v14  ;;  %v5133_v36 = vadd.bf16 %v5045_v1, %v4773_v10  ;;  %v6030_v31 = vrot.slane %v2715_v48, 9  ;;  %v3729_v10 = vld [vmem:[#allocation2 + $0xf8] sm:$0xe] }
 0x405   : > { %v2466_v13 = vrot.slane %v2464_v22, 4  ;;  %v2469_v18 = vrot.slane %v2467_v12, 5  ;;  %v5164_v58 = vunpack.c.l.bf16 %v5132_v29  ;;  %v2898_v59 = vrot.slane %v2716_v55, 5 }
 0x406   : > { %v2475_v50 = vrot.slane %v2473_v7, 5  ;;  %v3050_v42 = vmul.bf16 %v7422_v52, %v3014_v19  ;;  %v5165_v43 = vunpack.c.l.bf16 %v5133_v36  ;;  %v3177_v32 = vmul.bf16 %v7424_v53, %v8784_v14 }
 0x407   : > { %v1778_v35 = vld [vmem:[#allocation2 + $0xf0] sm:$0x1]  ;;  %v2470_v37 = vor.u32 %v2469_v18, %v2466_v13  ;;  %v2649_v56 = vld [vmem:[#allocation2 + $0xf0] sm:$0xe]  ;;  %v3178_v45 = vmul.bf16 %v7424_v53, %v8795_v41  ;;  %v5203_v61 = vmul.f32 %v8578_v9, %v5164_v58  ;;  %v2899_v20 = vsel %vm7402_vm13, %v6030_v31, %v2898_v59  ;;  %v3730_v13 = vld [vmem:[#allocation2 + $0x100] sm:$0xe] }
 0x408   : > { %v1779_v4 = vsel %vm7352_vm6, 0, %v1778_v35  ;;  %v1899_v62 = vld [vmem:[#allocation2 + $0xf4] sm:$0x1]  ;;  %v2713_v40 = vmul.bf16 %v7381_v5, %v2649_v56  ;;  %v5204_v16 = vmul.f32 %v8578_v9, %v5165_v43  ;;  %v3179_v3 = vmul.bf16 %v7424_v53, %v3014_v19 }
 0x409   : > { %1780 = vst [vmem:[#allocation2 + $0xf0] sm:$0x1] %v1779_v4  ;;  %v1900_v21 = vsel %vm7364_vm7, 0, %v1899_v62  ;;  %v2471_v60 = vrot.slane %v2470_v37, 4  ;;  %v5242_v17 = vadd.f32 %v8582_v46, %v5203_v61  ;;  %v3180_v8 = vmul.bf16 %v7424_v53, %v8798_v34 }
 0x40a   : > { %1901 = vst [vmem:[#allocation2 + $0xf4] sm:$0x1] %v1900_v21  ;;  %v8815_v38 = vrot.slane %v2713_v40, 9  ;;  %v3530_v54 = vshrl.u32 %v3177_v32, 16  ;;  %v5243_v25 = vadd.f32 %v8582_v46, %v5204_v16  ;;  %v3533_v1 = vshll.u32 %v3177_v32, 16 }
 0x40b   : > { %v2476_v9 = vsel %vm7387_vm10, %v2471_v60, %v2475_v50  ;;  %v3539_v49 = vshll.u32 %v3178_v45, 16  ;;  %v5274_v22 = vmax.f32 %v5242_v17, 0.0  ;;  %v3544_v19 = vshrl.u32 %v3179_v3, 16  ;;  %v8840_v60 = vld [vmem:[#allocation2 + $0x100] sm:$0xf] }
 0x40c   : > { %v2618_v12 = vadd.bf16 %v2476_v9, %v1996_v15  ;;  %v3532_v48 = vrot.slane %v3530_v54, 4  ;;  %v5275_v29 = vmax.f32 %v5243_v25, 0.0  ;;  %v3535_v7 = vrot.slane %v3533_v1, 5  ;;  %v4190_v9 = vld [vmem:[#allocation2 + $0x104] sm:$0x1] }
 0x40d   : > { %v3541_v55 = vrot.slane %v3539_v49, 5  ;;  %v3547_v36 = vshll.u32 %v3179_v3, 16  ;;  %v3546_v31 = vrot.slane %v3544_v19, 4  ;;  %v3553_v58 = vshll.u32 %v3180_v8, 16  ;;  %v8842_v3 = vpop.f32.mrb[32].mxu0 }
 0x40e   : > { %v2981_v18 = vadd.bf16 %v2899_v20, %v2618_v12  ;;  %v3793_v46 = vmul.bf16 %v7418_v47, %v3729_v10  ;;  %v5295_v59 = vpack.c.bf16 %v5275_v29, %v5274_v22  ;;  %v3536_v43 = vor.u32 %v3535_v7, %v3532_v48  ;;  %v8848_v1 = vld [vmem:[#allocation2 + $0x10c] sm:$0x1]  ;;  %v8850_v49 = vpop.f32.mrb[33].mxu0  ;;  %v8858_v29 = vpop.f32.mrb[0].mxu1 }
 0x40f   : > { %v3549_v50 = vrot.slane %v3547_v36, 5  ;;  %v3794_v35 = vmul.bf16 %v7418_v47, %v8795_v41  ;;  %v3555_v56 = vrot.slane %v3553_v58, 5  ;;  %v3795_v32 = vmul.bf16 %v7418_v47, %v3730_v13  ;;  %v8856_v19 = vpop.f32.mrb[34].mxu0 }
 0x410   : > { %v8825_v37 = vld [vmem:[#allocation2 + $0xf0] sm:$0xf]  ;;  %v3082_v15 = vadd.bf16 %v3050_v42, %v2981_v18  ;;  %v3796_v45 = vmul.bf16 %v7418_v47, %v8798_v34  ;;  %6274 = vmatmul.mubr.bf16.gmra.mrb[16].mxu1 %v5295_v59  ;;  %v3537_v40 = vrot.slane %v3536_v43, 4  ;;  %v8836_v16 = vrot.slane %v3793_v46, 9  ;;  %v4091_v34 = vld [vmem:[#allocation2 + $0x108] sm:$0xf] }
 0x411   : > { %v1995_v61 = vmul.bf16 %v7383_v6, %v8825_v37  ;;  %v2027_v4 = vld [vmem:[#allocation2 + $0xf4] sm:$0x1]  ;;  %v2094_v62 = vmul.bf16 %v7376_v51, %v8825_v37  ;;  %v3550_v20 = vor.u32 %v3549_v50, %v3546_v31  ;;  %v8838_v21 = vrot.slane %v3794_v35, 5  ;;  %v8862_v18 = vpop.f32.mrb[35].mxu0  ;;  %v8864_v31 = vpop.f32.mrb[1].mxu1 }
 0x412   : > { %v2095_v41 = vmul.bf16 %v7376_v51, %v2027_v4  ;;  %v2714_v42 = vmul.bf16 %v7381_v5, %v2027_v4  ;;  %v8846_v54 = vsel %vm7387_vm10, %v3537_v40, %v3541_v55  ;;  %v6064_v48 = vrot.slane %v3795_v32, 9  ;;  %v4806_v50 = vld [vmem:[#allocation2 + $0x100] sm:$0xe]  ;;  %v8871_v35 = vpop.f32.mrb[2].mxu1 }
 0x413   : > { %v2450_v17 = vshrl.u32 %v2094_v62, 16  ;;  %v2453_v8 = vshll.u32 %v2094_v62, 16  ;;  %v3551_v25 = vrot.slane %v3550_v20, 4  ;;  %v3972_v12 = vsel %vm7402_vm13, %v8836_v16, %v8838_v21  ;;  %v8878_v4 = vpop.f32.mrb[3].mxu1 }
 0x414   : > { %v2459_v10 = vshll.u32 %v2095_v41, 16  ;;  %v2894_v22 = vrot.slane %v2714_v42, 5  ;;  %v3975_v13 = vrot.slane %v3796_v45, 5  ;;  %v4126_v43 = vmul.bf16 %v7430_v63, %v8840_v60 }
 0x415   : > { %v2452_v7 = vrot.slane %v2450_v17, 4  ;;  %v2455_v55 = vrot.slane %v2453_v8, 5  ;;  %v3556_v36 = vsel %vm7387_vm10, %v3551_v25, %v3555_v56  ;;  %v4127_v32 = vmul.bf16 %v7430_v63, %v4091_v34 }
 0x416   : > { %v2461_v58 = vrot.slane %v2459_v10, 5  ;;  %v2895_v46 = vsel %vm7402_vm13, %v8815_v38, %v2894_v22  ;;  %v3698_v59 = vadd.bf16 %v3556_v36, %v3082_v15  ;;  %v3976_v56 = vsel %vm7402_vm13, %v6064_v48, %v3975_v13  ;;  %v4807_v48 = vld [vmem:[#allocation2 + $0x108] sm:$0xe] }
 0x417   : > { %v2456_v37 = vor.u32 %v2455_v55, %v2452_v7  ;;  %v4254_v45 = vmul.bf16 %v7432_v0, %v8840_v60  ;;  %v4255_v38 = vmul.bf16 %v7432_v0, %v4190_v9  ;;  %v4256_v15 = vmul.bf16 %v7432_v0, %v4091_v34 }
 0x418   : > { %v4058_v62 = vadd.bf16 %v3976_v56, %v3698_v59  ;;  %v4257_v40 = vmul.bf16 %v7432_v0, %v8848_v1  ;;  %v4870_v17 = vmul.bf16 %v7428_v57, %v4806_v50  ;;  %v4871_v50 = vmul.bf16 %v7428_v57, %v4190_v9 }
 0x419   : > { %v2457_v20 = vrot.slane %v2456_v37, 4  ;;  %v4607_v41 = vshrl.u32 %v4254_v45, 16  ;;  %v4610_v42 = vshll.u32 %v4254_v45, 16  ;;  %v4616_v25 = vshll.u32 %v4255_v38, 16  ;;  %v8887_v37 = vld [vmem:[#allocation2 + $0x100] sm:$0xf] }
 0x41a   : > { %v4159_v8 = vadd.bf16 %v4127_v32, %v4058_v62  ;;  %v4621_v10 = vshrl.u32 %v4256_v15, 16  ;;  %v4624_v22 = vshll.u32 %v4256_v15, 16  ;;  %v4630_v13 = vshll.u32 %v4257_v40, 16  ;;  %v8891_v62 = vld [vmem:[#allocation2 + $0x108] sm:$0xf] }
 0x41b   : > { %v2462_v7 = vsel %vm7387_vm10, %v2457_v20, %v2461_v58  ;;  %v4609_v55 = vrot.slane %v4607_v41, 4  ;;  %v4612_v36 = vrot.slane %v4610_v42, 5  ;;  %v4618_v59 = vrot.slane %v4616_v25, 5 }
 0x41c   : > { %v2617_v34 = vadd.bf16 %v2462_v7, %v1995_v61  ;;  %v4623_v56 = vrot.slane %v4621_v10, 4  ;;  %v4626_v44 = vrot.slane %v4624_v22, 5  ;;  %v4632_v30 = vrot.slane %v4630_v13, 5  ;;  %v2029_v61 = vld [vmem:[#allocation2 + $0x104] sm:$0x1] }
 0x41d   : > { %v4613_v45 = vor.u32 %v4612_v36, %v4609_v55  ;;  %v4872_v32 = vmul.bf16 %v7428_v57, %v4807_v48  ;;  %v4873_v58 = vmul.bf16 %v7428_v57, %v8848_v1  ;;  %v6097_v40 = vrot.slane %v4870_v17, 9 }
 0x41e   : > { %v2980_v38 = vadd.bf16 %v2895_v46, %v2617_v34  ;;  %v4627_v15 = vor.u32 %v4626_v44, %v4623_v56  ;;  %v5048_v41 = vrot.slane %v4871_v50, 5  ;;  %v1997_v25 = vmul.bf16 %v7383_v6, %v8887_v37  ;;  %v2030_v46 = vld [vmem:[#allocation2 + $0x10c] sm:$0x1] }
 0x41f   : > { %v4614_v20 = vrot.slane %v4613_v45, 4  ;;  %v6098_v42 = vrot.slane %v4872_v32, 9  ;;  %v5052_v22 = vrot.slane %v4873_v58, 5  ;;  %v1998_v44 = vmul.bf16 %v7383_v6, %v8891_v62 }
 0x420   : > { %v3081_v9 = vadd.bf16 %v3049_v39, %v2980_v38  ;;  %v4628_v10 = vrot.slane %v4627_v15, 4  ;;  %v5049_v17 = vsel %vm7402_vm13, %v6097_v40, %v5048_v41  ;;  %v2098_v48 = vmul.bf16 %v7376_v51, %v8887_v37  ;;  %v2651_v38 = vld [vmem:[#allocation2 + $0x100] sm:$0xe]  ;;  %v2652_v41 = vld [vmem:[#allocation2 + $0x108] sm:$0xe] }
 0x421   : > { %v4619_v1 = vsel %vm7387_vm10, %v4614_v20, %v4618_v59  ;;  %v2099_v7 = vmul.bf16 %v7376_v51, %v2029_v61  ;;  %v5053_v55 = vsel %vm7402_vm13, %v6098_v42, %v5052_v22  ;;  %v2100_v36 = vmul.bf16 %v7376_v51, %v8891_v62 }
 0x422   : > { %v3697_v14 = vadd.bf16 %v8846_v54, %v3081_v9  ;;  %v4633_v39 = vsel %vm7387_vm10, %v4628_v10, %v4632_v30  ;;  %v2101_v34 = vmul.bf16 %v7376_v51, %v2030_v46  ;;  %v2478_v59 = vshrl.u32 %v2098_v48, 16  ;;  %v8917_v45 = vpop.f32.mrb[4].mxu1 }
 0x423   : > { %v4775_v13 = vadd.bf16 %v4633_v39, %v4159_v8  ;;  %v2481_v56 = vshll.u32 %v2098_v48, 16  ;;  %v2487_v30 = vshll.u32 %v2099_v7, 16  ;;  %v2492_v50 = vshrl.u32 %v2100_v36, 16  ;;  %v8924_v15 = vpop.f32.mrb[5].mxu1 }
 0x424   : > { %v4057_v54 = vadd.bf16 %v3972_v12, %v3697_v14  ;;  %v2495_v32 = vshll.u32 %v2100_v36, 16  ;;  %v2480_v8 = vrot.slane %v2478_v59, 4  ;;  %v2501_v20 = vshll.u32 %v2101_v34, 16  ;;  %v8926_v42 = vpop.f32.mrb[6].mxu1  ;;  %v3015_v34 = vld [vmem:[#allocation2 + $0x108] sm:$0xf] }
 0x425   : > { %v5135_v58 = vadd.bf16 %v5053_v55, %v4775_v13  ;;  %v2483_v40 = vrot.slane %v2481_v56, 5  ;;  %9432 = vst [vmem:[#allocation29_spill] sm:$0xff] %v8926_v42  ;;  %v2489_v10 = vrot.slane %v2487_v30, 5  ;;  %v2494_v16 = vrot.slane %v2492_v50, 4  ;;  %v8931_v12 = vpop.f32.mrb[7].mxu1 }
 0x426   : > { %v4158_v9 = vadd.bf16 %v4126_v43, %v4057_v54  ;;  %v2497_v21 = vrot.slane %v2495_v32, 5  ;;  %9433 = vst [vmem:[#allocation30_spill] sm:$0xff] %v8931_v12  ;;  %v2503_v7 = vrot.slane %v2501_v20, 5  ;;  %v2717_v14 = vmul.bf16 %v7381_v5, %v2651_v38  ;;  %v8936_v59 = vld [vmem:[#allocation12] ss:$0 sm:$0xff] }
 0x427   : > { %v5167_v22 = vunpack.c.l.bf16 %v5135_v58  ;;  %v2484_v48 = vor.u32 %v2483_v40, %v2480_v8  ;;  %v2718_v36 = vmul.bf16 %v7381_v5, %v2029_v61  ;;  %v2719_v13 = vmul.bf16 %v7381_v5, %v2652_v41  ;;  %v3016_v38 = vld [vmem:[#allocation2 + $0x110] sm:$0xf]  ;;  %v3115_v41 = vld [vmem:[#allocation2 + $0x10c] sm:$0x1] }
 0x428   : > { %v4774_v39 = vadd.bf16 %v4619_v1, %v4158_v9  ;;  %v2498_v55 = vor.u32 %v2497_v21, %v2494_v16  ;;  %v2720_v56 = vmul.bf16 %v7381_v5, %v2030_v46  ;;  %v6031_v54 = vrot.slane %v2717_v14, 9  ;;  %v8940_v1 = vld [vmem:[#allocation14] ss:$0 sm:$0xff]  ;;  %v3116_v21 = vld [vmem:[#allocation2 + $0x114] sm:$0x1] }
 0x429   : > { %v5206_v60 = vmul.f32 %v8936_v59, %v5167_v22  ;;  %v2485_v43 = vrot.slane %v2484_v48, 4  ;;  %v2902_v32 = vrot.slane %v2718_v36, 5  ;;  %v6032_v58 = vrot.slane %v2719_v13, 9  ;;  %v3731_v22 = vld [vmem:[#allocation2 + $0x108] sm:$0xe] }
 0x42a   : > { %v5134_v30 = vadd.bf16 %v5049_v17, %v4774_v39  ;;  %v2499_v50 = vrot.slane %v2498_v55, 4  ;;  %v2906_v40 = vrot.slane %v2720_v56, 5  ;;  %v3051_v20 = vmul.bf16 %v7422_v52, %v3015_v34 }
 0x42b   : > { %v5245_v61 = vadd.f32 %v8940_v1, %v5206_v60  ;;  %v2490_v8 = vsel %vm7387_vm10, %v2485_v43, %v2489_v10  ;;  %v2903_v16 = vsel %vm7402_vm13, %v6031_v54, %v2902_v32  ;;  %v3052_v39 = vmul.bf16 %v7422_v52, %v3016_v38 }
 0x42c   : > { %v5166_v9 = vunpack.c.l.bf16 %v5134_v30  ;;  %v2504_v46 = vsel %vm7387_vm10, %v2499_v50, %v2503_v7  ;;  %v2619_v17 = vadd.bf16 %v2490_v8, %v1997_v25  ;;  %v2907_v14 = vsel %vm7402_vm13, %v6032_v58, %v2906_v40 }
 0x42d   : > { %v5277_v48 = vmax.f32 %v5245_v61, 0.0  ;;  %v2620_v10 = vadd.bf16 %v2504_v46, %v1998_v44  ;;  %v3181_v37 = vmul.bf16 %v7424_v53, %v3015_v34  ;;  %v3182_v25 = vmul.bf16 %v7424_v53, %v3115_v41  ;;  %v3732_v61 = vld [vmem:[#allocation2 + $0x110] sm:$0xe] }
 0x42e   : > { %v5205_v7 = vmul.f32 %v8936_v59, %v5166_v9  ;;  %v2982_v55 = vadd.bf16 %v2903_v16, %v2619_v17  ;;  %v3183_v13 = vmul.bf16 %v7424_v53, %v3016_v38  ;;  %v3184_v60 = vmul.bf16 %v7424_v53, %v3116_v21  ;;  %v4092_v46 = vld [vmem:[#allocation2 + $0x110] sm:$0xf] }
 0x42f   : > { %v2983_v36 = vadd.bf16 %v2907_v14, %v2620_v10  ;;  %v3797_v62 = vmul.bf16 %v7418_v47, %v3731_v22  ;;  %v3558_v56 = vshrl.u32 %v3181_v37, 16  ;;  %v3561_v54 = vshll.u32 %v3181_v37, 16  ;;  %v4093_v10 = vld [vmem:[#allocation2 + $0x118] sm:$0xf] }
 0x430   : > { %v5244_v44 = vadd.f32 %v8940_v1, %v5205_v7  ;;  %v3083_v43 = vadd.bf16 %v3051_v20, %v2982_v55  ;;  %v3567_v50 = vshll.u32 %v3182_v25, 16  ;;  %v3572_v32 = vshrl.u32 %v3183_v13, 16 }
 0x431   : > { %v3084_v30 = vadd.bf16 %v3052_v39, %v2983_v36  ;;  %v3575_v58 = vshll.u32 %v3183_v13, 16  ;;  %v3560_v8 = vrot.slane %v3558_v56, 4  ;;  %v3563_v40 = vrot.slane %v3561_v54, 5  ;;  %v4192_v13 = vld [vmem:[#allocation2 + $0x114] sm:$0x1] }
 0x432   : > { %v5276_v34 = vmax.f32 %v5244_v44, 0.0  ;;  %v3581_v9 = vshll.u32 %v3184_v60, 16  ;;  %v3569_v38 = vrot.slane %v3567_v50, 5  ;;  %v3574_v17 = vrot.slane %v3572_v32, 4  ;;  %v4193_v44 = vld [vmem:[#allocation2 + $0x11c] sm:$0x1] }
 0x433   : > { %v3577_v16 = vrot.slane %v3575_v58, 5  ;;  %v3798_v22 = vmul.bf16 %v7418_v47, %v3115_v41  ;;  %v3564_v20 = vor.u32 %v3563_v40, %v3560_v8  ;;  %v3799_v39 = vmul.bf16 %v7418_v47, %v3732_v61 }
 0x434   : > { %v5296_v14 = vpack.c.bf16 %v5277_v48, %v5276_v34  ;;  %v3583_v7 = vrot.slane %v3581_v9, 5  ;;  %v3800_v37 = vmul.bf16 %v7418_v47, %v3116_v21  ;;  %v6065_v25 = vrot.slane %v3797_v62, 9 }
 0x435   : > { %v3578_v55 = vor.u32 %v3577_v16, %v3574_v17  ;;  %v3979_v36 = vrot.slane %v3798_v22, 5  ;;  %v3565_v60 = vrot.slane %v3564_v20, 4  ;;  %v6066_v56 = vrot.slane %v3799_v39, 9  ;;  %v4808_v20 = vld [vmem:[#allocation2 + $0x110] sm:$0xe] }
 0x436   : > { %6277 = vmatprep.mubr.bf16.mxu1 %v5296_v14  ;;  %v4128_v54 = vmul.bf16 %v7430_v63, %v4092_v46  ;;  %v4129_v41 = vmul.bf16 %v7430_v63, %v4093_v10  ;;  %v3983_v32 = vrot.slane %v3800_v37, 5  ;;  %v4258_v58 = vmul.bf16 %v7432_v0, %v4092_v46 }
 0x437   : > { %v3579_v50 = vrot.slane %v3578_v55, 4  ;;  %v3980_v48 = vsel %vm7402_vm13, %v6065_v25, %v3979_v36  ;;  %v3570_v21 = vsel %vm7387_vm10, %v3565_v60, %v3569_v38  ;;  %v4259_v62 = vmul.bf16 %v7432_v0, %v4192_v13 }
 0x438   : > { %v4260_v61 = vmul.bf16 %v7432_v0, %v4093_v10  ;;  %v4261_v34 = vmul.bf16 %v7432_v0, %v4193_v44  ;;  %v3699_v40 = vadd.bf16 %v3570_v21, %v3083_v43  ;;  %v3984_v9 = vsel %vm7402_vm13, %v6066_v56, %v3983_v32  ;;  %v4809_v10 = vld [vmem:[#allocation2 + $0x118] sm:$0xe] }
 0x439   : > { %v3584_v8 = vsel %vm7387_vm10, %v3579_v50, %v3583_v7  ;;  %v4635_v17 = vshrl.u32 %v4258_v58, 16  ;;  %v4638_v22 = vshll.u32 %v4258_v58, 16  ;;  %v4644_v46 = vshll.u32 %v4259_v62, 16  ;;  %v8983_v7 = vld [vmem:[#allocation2 + $0x110] sm:$0xf] }
 0x43a   : > { %v3700_v16 = vadd.bf16 %v3584_v8, %v3084_v30  ;;  %v4649_v14 = vshrl.u32 %v4260_v61, 16  ;;  %v4059_v38 = vadd.bf16 %v3980_v48, %v3699_v40  ;;  %v4652_v55 = vshll.u32 %v4260_v61, 16  ;;  %v8986_v32 = vld [vmem:[#allocation2 + $0x118] sm:$0xf]  ;;  %v2031_v61 = vld [vmem:[#allocation2 + $0x114] sm:$0x1] }
 0x43b   : > { %v4637_v39 = vrot.slane %v4635_v17, 4  ;;  %v4658_v37 = vshll.u32 %v4261_v34, 16  ;;  %v4640_v36 = vrot.slane %v4638_v22, 5  ;;  %v4646_v60 = vrot.slane %v4644_v46, 5 }
 0x43c   : > { %v4060_v25 = vadd.bf16 %v3984_v9, %v3700_v16  ;;  %v4651_v12 = vrot.slane %v4649_v14, 4  ;;  %v4160_v43 = vadd.bf16 %v4128_v54, %v4059_v38  ;;  %v4654_v50 = vrot.slane %v4652_v55, 5  ;;  %v2032_v9 = vld [vmem:[#allocation2 + $0x11c] sm:$0x1] }
 0x43d   : > { %v4660_v56 = vrot.slane %v4658_v37, 5  ;;  %v4874_v30 = vmul.bf16 %v7428_v57, %v4808_v20  ;;  %v4641_v21 = vor.u32 %v4640_v36, %v4637_v39  ;;  %v4875_v48 = vmul.bf16 %v7428_v57, %v4192_v13 }
 0x43e   : > { %v4161_v58 = vadd.bf16 %v4129_v41, %v4060_v25  ;;  %v4876_v62 = vmul.bf16 %v7428_v57, %v4809_v10  ;;  %v4655_v34 = vor.u32 %v4654_v50, %v4651_v12  ;;  %v4877_v8 = vmul.bf16 %v7428_v57, %v4193_v44 }
 0x43f   : > { %v6099_v40 = vrot.slane %v4874_v30, 9  ;;  %v4642_v17 = vrot.slane %v4641_v21, 4  ;;  %v5056_v16 = vrot.slane %v4875_v48, 5  ;;  %v2000_v41 = vmul.bf16 %v7383_v6, %v8986_v32  ;;  %v2653_v21 = vld [vmem:[#allocation2 + $0x110] sm:$0xe] }
 0x440   : > { %v6100_v22 = vrot.slane %v4876_v62, 9  ;;  %v4656_v46 = vrot.slane %v4655_v34, 4  ;;  %v5060_v14 = vrot.slane %v4877_v8, 5  ;;  %v2102_v13 = vmul.bf16 %v7376_v51, %v8983_v7 }
 0x441   : > { %v2103_v12 = vmul.bf16 %v7376_v51, %v2031_v61  ;;  %v4647_v44 = vsel %vm7387_vm10, %v4642_v17, %v4646_v60  ;;  %v5057_v20 = vsel %vm7402_vm13, %v6099_v40, %v5056_v16  ;;  %v2104_v38 = vmul.bf16 %v7376_v51, %v8986_v32  ;;  %v2654_v32 = vld [vmem:[#allocation2 + $0x118] sm:$0xe] }
 0x442   : > { %v2105_v39 = vmul.bf16 %v7376_v51, %v2032_v9  ;;  %v4661_v55 = vsel %vm7387_vm10, %v4656_v46, %v4660_v56  ;;  %v4776_v37 = vadd.bf16 %v4647_v44, %v4160_v43  ;;  %v5061_v10 = vsel %vm7402_vm13, %v6100_v22, %v5060_v14  ;;  %v3017_v44 = vld [vmem:[#allocation2 + $0x118] sm:$0xf] }
 0x443   : > { %v2506_v25 = vshrl.u32 %v2102_v13, 16  ;;  %v4777_v36 = vadd.bf16 %v4661_v55, %v4161_v58  ;;  %v2509_v50 = vshll.u32 %v2102_v13, 16  ;;  %v2515_v30 = vshll.u32 %v2103_v12, 16 }
 0x444   : > { %v2520_v60 = vshrl.u32 %v2104_v38, 16  ;;  %v5136_v48 = vadd.bf16 %v5057_v20, %v4776_v37  ;;  %v2523_v34 = vshll.u32 %v2104_v38, 16  ;;  %v2529_v8 = vshll.u32 %v2105_v39, 16  ;;  %v3018_v37 = vld [vmem:[#allocation2 + $0x120] sm:$0xf] }
 0x445   : > { %v2508_v62 = vrot.slane %v2506_v25, 4  ;;  %v5137_v40 = vadd.bf16 %v5061_v10, %v4777_v36  ;;  %v2511_v17 = vrot.slane %v2509_v50, 5  ;;  %v2517_v16 = vrot.slane %v2515_v30, 5 }
 0x446   : > { %v2522_v54 = vrot.slane %v2520_v60, 4  ;;  %v5168_v56 = vunpack.c.l.bf16 %v5136_v48  ;;  %v2525_v43 = vrot.slane %v2523_v34, 5  ;;  %v2531_v46 = vrot.slane %v2529_v8, 5  ;;  %v3117_v48 = vld [vmem:[#allocation2 + $0x11c] sm:$0x1] }
 0x447   : > { %v2721_v22 = vmul.bf16 %v7381_v5, %v2653_v21  ;;  %v5169_v14 = vunpack.c.l.bf16 %v5137_v40  ;;  %v2512_v58 = vor.u32 %v2511_v17, %v2508_v62  ;;  %v2722_v13 = vmul.bf16 %v7381_v5, %v2031_v61  ;;  %v3118_v8 = vld [vmem:[#allocation2 + $0x124] sm:$0x1] }
 0x448   : > { %v2723_v12 = vmul.bf16 %v7381_v5, %v2654_v32  ;;  %v5207_v20 = vmul.f32 %v8936_v59, %v5168_v56  ;;  %v2526_v38 = vor.u32 %v2525_v43, %v2522_v54  ;;  %v2724_v39 = vmul.bf16 %v7381_v5, %v2032_v9  ;;  %v3733_v32 = vld [vmem:[#allocation2 + $0x118] sm:$0xe] }
 0x449   : > { %v6033_v55 = vrot.slane %v2721_v22, 9  ;;  %v5208_v10 = vmul.f32 %v8936_v59, %v5169_v14  ;;  %v2513_v25 = vrot.slane %v2512_v58, 4  ;;  %v2910_v36 = vrot.slane %v2722_v13, 5 }
 0x44a   : > { %v6034_v50 = vrot.slane %v2723_v12, 9  ;;  %v5246_v30 = vadd.f32 %v8940_v1, %v5207_v20  ;;  %v2527_v60 = vrot.slane %v2526_v38, 4  ;;  %v2914_v21 = vrot.slane %v2724_v39, 5 }
 0x44b   : > { %v3053_v61 = vmul.bf16 %v7422_v52, %v3017_v44  ;;  %v5247_v62 = vadd.f32 %v8940_v1, %v5208_v10  ;;  %v2518_v54 = vsel %vm7387_vm10, %v2513_v25, %v2517_v16  ;;  %v2911_v9 = vsel %vm7402_vm13, %v6033_v55, %v2910_v36 }
 0x44c   : > { %v3054_v34 = vmul.bf16 %v7422_v52, %v3018_v37  ;;  %v5278_v40 = vmax.f32 %v5246_v30, 0.0  ;;  %v2532_v17 = vsel %vm7387_vm10, %v2527_v60, %v2531_v46  ;;  %v9434_v56 = vmul.bf16 %v7383_v6, %v8983_v7 }
 0x44d   : > { %v2915_v22 = vsel %vm7402_vm13, %v6034_v50, %v2914_v21  ;;  %v5279_v14 = vmax.f32 %v5247_v62, 0.0  ;;  %v2622_v16 = vadd.bf16 %v2532_v17, %v2000_v41  ;;  %v3185_v58 = vmul.bf16 %v7424_v53, %v3017_v44  ;;  %v3734_v41 = vld [vmem:[#allocation2 + $0x120] sm:$0xe] }
 0x44e   : > { %v2621_v43 = vadd.bf16 %v2518_v54, %v9434_v56  ;;  %v3186_v13 = vmul.bf16 %v7424_v53, %v3117_v48  ;;  %v3187_v20 = vmul.bf16 %v7424_v53, %v3018_v37  ;;  %v3188_v38 = vmul.bf16 %v7424_v53, %v3118_v8  ;;  %v4094_v54 = vld [vmem:[#allocation2 + $0x120] sm:$0xf] }
 0x44f   : > { %v3801_v46 = vmul.bf16 %v7418_v47, %v3733_v32  ;;  %v5297_v39 = vpack.c.bf16 %v5279_v14, %v5278_v40  ;;  %v2985_v55 = vadd.bf16 %v2915_v22, %v2622_v16  ;;  %v3586_v7 = vshrl.u32 %v3185_v58, 16  ;;  %v4095_v40 = vld [vmem:[#allocation2 + $0x128] sm:$0xf]  ;;  %v4194_v14 = vld [vmem:[#allocation2 + $0x124] sm:$0x1] }
 0x450   : > { %v2984_v12 = vadd.bf16 %v2911_v9, %v2621_v43  ;;  %v3589_v10 = vshll.u32 %v3185_v58, 16  ;;  %v3595_v36 = vshll.u32 %v3186_v13, 16  ;;  %v3600_v50 = vshrl.u32 %v3187_v20, 16 }
 0x451   : > { %v3603_v30 = vshll.u32 %v3187_v20, 16  ;;  %6278 = vmatmul.mubr.bf16.gmra.mrb[20].mxu1 %v5297_v39  ;;  %v3086_v44 = vadd.bf16 %v3054_v34, %v2985_v55  ;;  %v3588_v60 = vrot.slane %v3586_v7, 4  ;;  %v3609_v62 = vshll.u32 %v3188_v38, 16 }
 0x452   : > { %v3085_v25 = vadd.bf16 %v3053_v61, %v2984_v12  ;;  %v3591_v21 = vrot.slane %v3589_v10, 5  ;;  %v3597_v37 = vrot.slane %v3595_v36, 5  ;;  %v3602_v9 = vrot.slane %v3600_v50, 4  ;;  %v4195_v12 = vld [vmem:[#allocation2 + $0x12c] sm:$0x1] }
 0x453   : > { %v3605_v17 = vrot.slane %v3603_v30, 5  ;;  %v3802_v32 = vmul.bf16 %v7418_v47, %v3117_v48  ;;  %v3611_v43 = vrot.slane %v3609_v62, 5  ;;  %v3803_v61 = vmul.bf16 %v7418_v47, %v3734_v41 }
 0x454   : > { %v3592_v56 = vor.u32 %v3591_v21, %v3588_v60  ;;  %v3804_v22 = vmul.bf16 %v7418_v47, %v3118_v8  ;;  %v6067_v58 = vrot.slane %v3801_v46, 9  ;;  %v4130_v13 = vmul.bf16 %v7430_v63, %v4094_v54 }
 0x455   : > { %v3606_v16 = vor.u32 %v3605_v17, %v3602_v9  ;;  %v3987_v34 = vrot.slane %v3802_v32, 5  ;;  %v6068_v38 = vrot.slane %v3803_v61, 9  ;;  %v4131_v55 = vmul.bf16 %v7430_v63, %v4095_v40 }
 0x456   : > { %v3593_v20 = vrot.slane %v3592_v56, 4  ;;  %v3991_v39 = vrot.slane %v3804_v22, 5  ;;  %v4262_v10 = vmul.bf16 %v7432_v0, %v4094_v54  ;;  %v4263_v8 = vmul.bf16 %v7432_v0, %v4194_v14  ;;  %v4810_v56 = vld [vmem:[#allocation2 + $0x120] sm:$0xe] }
 0x457   : > { %v3607_v48 = vrot.slane %v3606_v16, 4  ;;  %v3988_v7 = vsel %vm7402_vm13, %v6067_v58, %v3987_v34  ;;  %v4264_v50 = vmul.bf16 %v7432_v0, %v4095_v40  ;;  %v4265_v30 = vmul.bf16 %v7432_v0, %v4195_v12  ;;  %v4811_v58 = vld [vmem:[#allocation2 + $0x128] sm:$0xe] }
 0x458   : > { %v3598_v46 = vsel %vm7387_vm10, %v3593_v20, %v3597_v37  ;;  %v3992_v36 = vsel %vm7402_vm13, %v6068_v38, %v3991_v39  ;;  %v4663_v21 = vshrl.u32 %v4262_v10, 16  ;;  %v4666_v62 = vshll.u32 %v4262_v10, 16  ;;  %v1682_v39 = vld [vmem:[#allocation2 + $0x138] sm:$0xf] }
 0x459   : > { %v3612_v41 = vsel %vm7387_vm10, %v3607_v48, %v3611_v43  ;;  %v3701_v60 = vadd.bf16 %v3598_v46, %v3085_v25  ;;  %v4672_v54 = vshll.u32 %v4263_v8, 16  ;;  %v4677_v17 = vshrl.u32 %v4264_v50, 16 }
 0x45a   : > { %v3702_v9 = vadd.bf16 %v3612_v41, %v3086_v44  ;;  %v4680_v32 = vshll.u32 %v4264_v50, 16  ;;  %v4665_v37 = vrot.slane %v4663_v21, 4  ;;  %v4668_v22 = vrot.slane %v4666_v62, 5  ;;  %v1685_v44 = vld [vmem:[#allocation2 + $0x13c] sm:$0x1] }
 0x45b   : > { %v4061_v61 = vadd.bf16 %v3988_v7, %v3701_v60  ;;  %v4686_v16 = vshll.u32 %v4265_v30, 16  ;;  %v4674_v40 = vrot.slane %v4672_v54, 5  ;;  %v4679_v20 = vrot.slane %v4677_v17, 4  ;;  %v9055_v50 = vld [vmem:[#allocation2 + $0x120] sm:$0xf] }
 0x45c   : > { %v4062_v34 = vadd.bf16 %v3992_v36, %v3702_v9  ;;  %v4682_v38 = vrot.slane %v4680_v32, 5  ;;  %v4669_v43 = vor.u32 %v4668_v22, %v4665_v37  ;;  %v4878_v48 = vmul.bf16 %v7428_v57, %v4810_v56  ;;  %v9057_v30 = vld [vmem:[#allocation2 + $0x128] sm:$0xf]  ;;  %v2033_v9 = vld [vmem:[#allocation2 + $0x124] sm:$0x1] }
 0x45d   : > { %v4162_v42 = vadd.bf16 %v4130_v13, %v4061_v61  ;;  %v4688_v25 = vrot.slane %v4686_v16, 5  ;;  %v4879_v46 = vmul.bf16 %v7428_v57, %v4194_v14  ;;  %v4880_v7 = vmul.bf16 %v7428_v57, %v4811_v58 }
 0x45e   : > { %v4163_v10 = vadd.bf16 %v4131_v55, %v4062_v34  ;;  %v4683_v8 = vor.u32 %v4682_v38, %v4679_v20  ;;  %v4670_v36 = vrot.slane %v4669_v43, 4  ;;  %v4881_v41 = vmul.bf16 %v7428_v57, %v4195_v12 }
 0x45f   : > { %v6101_v60 = vrot.slane %v4878_v48, 9  ;;  %v1683_v13 = vsel %vm7343_vm3, %v7347_v24, %v1682_v39  ;;  %v5064_v62 = vrot.slane %v4879_v46, 5  ;;  %v6102_v55 = vrot.slane %v4880_v7, 9  ;;  %v2034_v24 = vld [vmem:[#allocation2 + $0x12c] sm:$0x1] }
 0x460   : > { %v4684_v21 = vrot.slane %v4683_v8, 4  ;;  %1684 = vst [vmem:[#allocation2 + $0x138] sm:$0xf] %v1683_v13  ;;  %v1686_v14 = vsel %vm7352_vm6, %v7356_v28, %v1685_v44  ;;  %v4675_v54 = vsel %vm7387_vm10, %v4670_v36, %v4674_v40  ;;  %v5068_v17 = vrot.slane %v4881_v41, 5  ;;  %v2655_v41 = vld [vmem:[#allocation2 + $0x120] sm:$0xe] }
 0x461   : > { %1687 = vst [vmem:[#allocation2 + $0x13c] sm:$0x1] %v1686_v14  ;;  %v2001_v12 = vmul.bf16 %v7383_v6, %v9055_v50  ;;  %v2002_v23 = vmul.bf16 %v7383_v6, %v9057_v30  ;;  %v4778_v56 = vadd.bf16 %v4675_v54, %v4162_v42  ;;  %v5065_v28 = vsel %vm7402_vm13, %v6101_v60, %v5064_v62 }
 0x462   : > { %v4689_v32 = vsel %vm7387_vm10, %v4684_v21, %v4688_v25  ;;  %v2106_v61 = vmul.bf16 %v7376_v51, %v9055_v50  ;;  %v5069_v22 = vsel %vm7402_vm13, %v6102_v55, %v5068_v17  ;;  %v2107_v16 = vmul.bf16 %v7376_v51, %v2033_v9  ;;  %v9083_v34 = vpop.f32.mrb[8].mxu1 }
 0x463   : > { %v4779_v37 = vadd.bf16 %v4689_v32, %v4163_v10  ;;  %v2108_v58 = vmul.bf16 %v7376_v51, %v9057_v30  ;;  %v5138_v40 = vadd.bf16 %v5065_v28, %v4778_v56  ;;  %v2109_v42 = vmul.bf16 %v7376_v51, %v2034_v24  ;;  %v9086_v39 = vpop.f32.mrb[9].mxu1  ;;  %v2656_v10 = vld [vmem:[#allocation2 + $0x128] sm:$0xe] }
 0x464   : > { %v2534_v20 = vshrl.u32 %v2106_v61, 16  ;;  %v2537_v38 = vshll.u32 %v2106_v61, 16  ;;  %v2543_v25 = vshll.u32 %v2107_v16, 16  ;;  %v9088_v8 = vpop.f32.mrb[10].mxu1  ;;  %v2727_v27 = vmul.bf16 %v7381_v5, %v2656_v10 }
 0x465   : > { %v5139_v43 = vadd.bf16 %v5069_v22, %v4779_v37  ;;  %v2548_v48 = vshrl.u32 %v2108_v58, 16  ;;  %v2551_v44 = vshll.u32 %v2108_v58, 16  ;;  %v5170_v46 = vunpack.c.l.bf16 %v5138_v40  ;;  %v9090_v60 = vpop.f32.mrb[11].mxu1 }
 0x466   : > { %v2536_v7 = vrot.slane %v2534_v20, 4  ;;  %v2539_v50 = vrot.slane %v2537_v38, 5  ;;  %v2557_v36 = vshll.u32 %v2109_v42, 16  ;;  %v2545_v21 = vrot.slane %v2543_v25, 5  ;;  %v3019_v25 = vld [vmem:[#allocation2 + $0x128] sm:$0xf] }
 0x467   : > { %v5171_v13 = vunpack.c.l.bf16 %v5139_v43  ;;  %v1805_v51 = vld [vmem:[#allocation2 + $0x138] sm:$0x1]  ;;  %v2550_v62 = vrot.slane %v2548_v48, 4  ;;  %v2553_v55 = vrot.slane %v2551_v44, 5  ;;  %v5209_v14 = vmul.f32 %v8936_v59, %v5170_v46 }
 0x468   : > { %v1806_v54 = vsel %vm7352_vm6, 0, %v1805_v51  ;;  %v1926_v17 = vld [vmem:[#allocation2 + $0x13c] sm:$0x1]  ;;  %v2540_v32 = vor.u32 %v2539_v50, %v2536_v7  ;;  %v2559_v56 = vrot.slane %v2557_v36, 5  ;;  %v2725_v22 = vmul.bf16 %v7381_v5, %v2655_v41  ;;  %v3119_v41 = vld [vmem:[#allocation2 + $0x12c] sm:$0x1] }
 0x469   : > { %v5210_v28 = vmul.f32 %v8936_v59, %v5171_v13  ;;  %1807 = vst [vmem:[#allocation2 + $0x138] sm:$0x1] %v1806_v54  ;;  %v1927_v61 = vsel %vm7364_vm7, 0, %v1926_v17  ;;  %v2554_v37 = vor.u32 %v2553_v55, %v2550_v62  ;;  %v5248_v16 = vadd.f32 %v8940_v1, %v5209_v14  ;;  %v3120_v13 = vld [vmem:[#allocation2 + $0x134] sm:$0x1] }
 0x46a   : > { %1928 = vst [vmem:[#allocation2 + $0x13c] sm:$0x1] %v1927_v61  ;;  %v2541_v58 = vrot.slane %v2540_v32, 4  ;;  %v2726_v40 = vmul.bf16 %v7381_v5, %v2033_v9  ;;  %v2728_v38 = vmul.bf16 %v7381_v5, %v2034_v24  ;;  %v6035_v43 = vrot.slane %v2725_v22, 9  ;;  %v3735_v62 = vld [vmem:[#allocation2 + $0x128] sm:$0xe] }
 0x46b   : > { %v5249_v42 = vadd.f32 %v8940_v1, %v5210_v28  ;;  %v2555_v20 = vrot.slane %v2554_v37, 4  ;;  %v5280_v48 = vmax.f32 %v5248_v16, 0.0  ;;  %v6036_v7 = vrot.slane %v2727_v27, 9 }
 0x46c   : > { %v2546_v44 = vsel %vm7387_vm10, %v2541_v58, %v2545_v21  ;;  %v2918_v46 = vrot.slane %v2726_v40, 5  ;;  %v2922_v10 = vrot.slane %v2728_v38, 5  ;;  %v3055_v51 = vmul.bf16 %v7422_v52, %v3019_v25  ;;  %v4096_v38 = vld [vmem:[#allocation2 + $0x130] sm:$0xf] }
 0x46d   : > { %v5281_v50 = vmax.f32 %v5249_v42, 0.0  ;;  %v2560_v9 = vsel %vm7387_vm10, %v2555_v20, %v2559_v56  ;;  %v2623_v36 = vadd.bf16 %v2546_v44, %v2001_v12  ;;  %v3056_v21 = vmul.bf16 %v7422_v52, %v3020_v33  ;;  %v3736_v52 = vld [vmem:[#allocation2 + $0x130] sm:$0xe] }
 0x46e   : > { %v2624_v5 = vadd.bf16 %v2560_v9, %v2002_v23  ;;  %v2919_v24 = vsel %vm7402_vm13, %v6035_v43, %v2918_v46  ;;  %v2923_v14 = vsel %vm7402_vm13, %v6036_v7, %v2922_v10  ;;  %v3189_v54 = vmul.bf16 %v7424_v53, %v3019_v25  ;;  %v4196_v9 = vld [vmem:[#allocation2 + $0x134] sm:$0x1] }
 0x46f   : > { %v5298_v55 = vpack.c.bf16 %v5281_v50, %v5280_v48  ;;  %v2986_v12 = vadd.bf16 %v2919_v24, %v2623_v36  ;;  %v3190_v32 = vmul.bf16 %v7424_v53, %v3119_v41  ;;  %v3191_v6 = vmul.bf16 %v7424_v53, %v3020_v33 }
 0x470   : > { %v2987_v17 = vadd.bf16 %v2923_v14, %v2624_v5  ;;  %v3192_v30 = vmul.bf16 %v7424_v53, %v3120_v13  ;;  %v3614_v56 = vshrl.u32 %v3189_v54, 16  ;;  %v3617_v28 = vshll.u32 %v3189_v54, 16  ;;  %v4097_v50 = vld [vmem:[#allocation2 + $0x138] sm:$0xf] }
 0x471   : > { %6281 = vmatprep.mubr.bf16.mxu1 %v5298_v55  ;;  %v3087_v23 = vadd.bf16 %v3055_v51, %v2986_v12  ;;  %v3805_v61 = vmul.bf16 %v7418_v47, %v3735_v62  ;;  %v3623_v22 = vshll.u32 %v3190_v32, 16  ;;  %v3628_v16 = vshrl.u32 %v3191_v6, 16  ;;  %v4197_v51 = vld [vmem:[#allocation2 + $0x13c] sm:$0x1] }
 0x472   : > { %v3088_v37 = vadd.bf16 %v3056_v21, %v2987_v17  ;;  %v3631_v58 = vshll.u32 %v3191_v6, 16  ;;  %v3616_v40 = vrot.slane %v3614_v56, 4  ;;  %v3619_v27 = vrot.slane %v3617_v28, 5 }
 0x473   : > { %v3637_v42 = vshll.u32 %v3192_v30, 16  ;;  %v3806_v20 = vmul.bf16 %v7418_v47, %v3119_v41  ;;  %v3625_v43 = vrot.slane %v3623_v22, 5  ;;  %v3630_v25 = vrot.slane %v3628_v16, 4 }
 0x474   : > { %v3633_v53 = vrot.slane %v3631_v58, 5  ;;  %v3807_v33 = vmul.bf16 %v7418_v47, %v3736_v52  ;;  %v3620_v48 = vor.u32 %v3619_v27, %v3616_v40  ;;  %v3808_v46 = vmul.bf16 %v7418_v47, %v3120_v13  ;;  %v4812_v52 = vld [vmem:[#allocation2 + $0x130] sm:$0xe] }
 0x475   : > { %v3639_v44 = vrot.slane %v3637_v42, 5  ;;  %v6069_v7 = vrot.slane %v3805_v61, 9  ;;  %v3995_v10 = vrot.slane %v3806_v20, 5  ;;  %v4132_v24 = vmul.bf16 %v7430_v63, %v4096_v38 }
 0x476   : > { %v3634_v36 = vor.u32 %v3633_v53, %v3630_v25  ;;  %v6070_v5 = vrot.slane %v3807_v33, 9  ;;  %v3621_v41 = vrot.slane %v3620_v48, 4  ;;  %v3999_v21 = vrot.slane %v3808_v46, 5 }
 0x477   : > { %v4133_v62 = vmul.bf16 %v7430_v63, %v4097_v50  ;;  %v4266_v55 = vmul.bf16 %v7432_v0, %v4096_v38  ;;  %v3996_v12 = vsel %vm7402_vm13, %v6069_v7, %v3995_v10  ;;  %v4267_v47 = vmul.bf16 %v7432_v0, %v4196_v9  ;;  %v4813_v38 = vld [vmem:[#allocation2 + $0x138] sm:$0xe] }
 0x478   : > { %v3635_v14 = vrot.slane %v3634_v36, 4  ;;  %v4268_v13 = vmul.bf16 %v7432_v0, %v4097_v50  ;;  %v3626_v54 = vsel %vm7387_vm10, %v3621_v41, %v3625_v43  ;;  %v4000_v17 = vsel %vm7402_vm13, %v6070_v5, %v3999_v21  ;;  %v6495_v21 = vld [vmem:[%s7281_s11 + $0x8] sm:$0xff]  }
 0x479   : > { %v4269_v32 = vmul.bf16 %v7432_v0, %v4197_v51  ;;  %v4691_v6 = vshrl.u32 %v4266_v55, 16  ;;  %v3703_v30 = vadd.bf16 %v3626_v54, %v3087_v23  ;;  %v4694_v56 = vshll.u32 %v4266_v55, 16 }
 0x47a   : > { %v3640_v63 = vsel %vm7387_vm10, %v3635_v14, %v3639_v44  ;;  %v4700_v28 = vshll.u32 %v4267_v47, 16  ;;  %v4705_v16 = vshrl.u32 %v4268_v13, 16  ;;  %v4708_v58 = vshll.u32 %v4268_v13, 16  ;;  %v9146_v14 = vld [vmem:[#allocation18] ss:$0 sm:$0xff] }
 0x47b   : > { %v3704_v61 = vadd.bf16 %v3640_v63, %v3088_v37  ;;  %v4693_v22 = vrot.slane %v4691_v6, 4  ;;  %v4063_v40 = vadd.bf16 %v3996_v12, %v3703_v30  ;;  %v4696_v27 = vrot.slane %v4694_v56, 5  ;;  %v9141_v37 = vld [vmem:[#allocation17] ss:$0 sm:$0xff] }
 0x47c   : > { %v4702_v42 = vrot.slane %v4700_v28, 5  ;;  %v4714_v20 = vshll.u32 %v4269_v32, 16  ;;  %v4707_v0 = vrot.slane %v4705_v16, 4  ;;  %v4710_v25 = vrot.slane %v4708_v58, 5 }
 0x47d   : > { %v4064_v43 = vadd.bf16 %v4000_v17, %v3704_v61  ;;  %v4882_v53 = vmul.bf16 %v7428_v57, %v4812_v52  ;;  %v4164_v33 = vadd.bf16 %v4132_v24, %v4063_v40  ;;  %v4697_v23 = vor.u32 %v4696_v27, %v4693_v22 }
 0x47e   : > { %v4716_v48 = vrot.slane %v4714_v20, 5  ;;  %v4883_v44 = vmul.bf16 %v7428_v57, %v4196_v9  ;;  %v4711_v7 = vor.u32 %v4710_v25, %v4707_v0  ;;  %v4884_v50 = vmul.bf16 %v7428_v57, %v4813_v38 }
 0x47f   : > { %v4165_v46 = vadd.bf16 %v4133_v62, %v4064_v43  ;;  %v4885_v36 = vmul.bf16 %v7428_v57, %v4197_v51  ;;  %v4698_v10 = vrot.slane %v4697_v23, 4  ;;  %v6103_v5 = vrot.slane %v4882_v53, 9 }
 0x480   : > { %v5072_v41 = vrot.slane %v4883_v44, 5  ;;  %v535_v55 = vunpack.c.l.bf16 %v6495_v21  ;;  %v4712_v24 = vrot.slane %v4711_v7, 4  ;;  %v6104_v12 = vrot.slane %v4884_v50, 9 }
 0x481   : > { %v5076_v47 = vrot.slane %v4885_v36, 5  ;;  %v5534_v9 = vmul.f32 %v8842_v3, %v9141_v37  ;;  %v4703_v62 = vsel %vm7387_vm10, %v4698_v10, %v4702_v42  ;;  %v5532_v51 = vmul.f32 %v9141_v37, %v8850_v49  ;;  %v6496_v49 = vld [vmem:[%s7281_s11 + $0x18] sm:$0xff]   ;;  %v6497_v42 = vld [vmem:[%s7281_s11 + $0x10] sm:$0xff]  }
 0x482   : > { %v5073_v57 = vsel %vm7402_vm13, %v6103_v5, %v5072_v41  ;;  %v4717_v13 = vsel %vm7387_vm10, %v4712_v24, %v4716_v48  ;;  %v4780_v54 = vadd.bf16 %v4703_v62, %v4164_v33  ;;  %v536_v63 = vunpack.c.h.bf16 %v6495_v21 }
 0x483   : > { %v5077_v17 = vsel %vm7402_vm13, %v6104_v12, %v5076_v47  ;;  %v5573_v3 = vadd.f32 %v9146_v14, %v5534_v9  ;;  %v4781_v32 = vadd.bf16 %v4717_v13, %v4165_v46  ;;  %v5571_v6 = vadd.f32 %v9146_v14, %v5532_v51  ;;  %v6498_v51 = vld [vmem:[%s7281_s11 + $0x28] sm:$0xff]  }
 0x484   : > { %v5535_v30 = vmul.f32 %v8856_v19, %v9141_v37  ;;  %v5140_v56 = vadd.bf16 %v5073_v57, %v4780_v54  ;;  %v5533_v11 = vmul.f32 %v9141_v37, %v8862_v18  ;;  %v539_v52 = vunpack.c.l.bf16 %v6496_v49  ;;  %v6499_v54 = vld [vmem:[%s7281_s11 + $0x20] sm:$0xff]  }
 0x485   : > { %v5605_v28 = vadd.f32 %v5573_v3, %v535_v55  ;;  %v5141_v61 = vadd.bf16 %v5077_v17, %v4781_v32  ;;  %v5603_v22 = vadd.f32 %v5571_v6, %v9435_v26  ;;  %v5538_v58 = vmul.f32 %v8858_v29, %v9141_v37 }
 0x486   : > { %v5574_v16 = vadd.f32 %v9146_v14, %v5535_v30  ;;  %v5172_v40 = vunpack.c.l.bf16 %v5140_v56  ;;  %v5572_v19 = vadd.f32 %v9146_v14, %v5533_v11  ;;  %v537_v20 = vunpack.c.l.bf16 %v6497_v42 }
 0x487   : > { %v5637_v27 = vmax.f32 %v5605_v28, 0.0  ;;  %v5173_v38 = vunpack.c.l.bf16 %v5141_v61  ;;  %v5635_v18 = vmax.f32 %v5603_v22, 0.0  ;;  %v5577_v0 = vadd.f32 %v9146_v14, %v5538_v58  ;;  %v9437_v28 = vld [vmem:[#allocation29_spill] sm:$0xff]  ;;  %v9438_v22 = vld [vmem:[#allocation30_spill] sm:$0xff] }
 0x488   : > { %v5606_v43 = vadd.f32 %v5574_v16, %v536_v63  ;;  %v5211_v25 = vmul.f32 %v8936_v59, %v5172_v40  ;;  %v9436_v33 = vunpack.c.h.bf16 %v7308_v2  ;;  %v5536_v29 = vmul.f32 %v9141_v37, %v8864_v31  ;;  %v6500_v58 = vld [vmem:[%s7281_s11 + $0x38] sm:$0xff]  }
 0x489   : > { %v5669_v53 = vpack.c.bf16 %v5637_v27, %v5637_v27  ;;  %v5212_v48 = vmul.f32 %v8936_v59, %v5173_v38  ;;  %v5667_v44 = vpack.c.bf16 %v5635_v18, %v5635_v18  ;;  %v5609_v7 = vadd.f32 %v5577_v0, %v539_v52  ;;  %v6501_v0 = vld [vmem:[%s7281_s11 + $0x30] sm:$0xff]  }
 0x48a   : > { %v5604_v23 = vadd.f32 %v5572_v19, %v9436_v33  ;;  %v5638_v46 = vmax.f32 %v5606_v43, 0.0  ;;  %v5250_v50 = vadd.f32 %v8940_v1, %v5211_v25  ;;  %v5575_v36 = vadd.f32 %v9146_v14, %v5536_v29 }
 0x48b   : > { %5702 = vst.msk [vmem:[%s9184_s20 + $0x8] sm:$0xf] %vm5699_vm14, %v5669_v53  ;;  %v540_v31 = vunpack.c.h.bf16 %v6496_v49  ;;  %v5251_v59 = vadd.f32 %v8940_v1, %v5212_v48  ;;  %5700 = vst.msk [vmem:[%s9184_s20] sm:$0xf] %vm5699_vm14, %v5667_v44  ;;  %v5641_v5 = vmax.f32 %v5609_v7, 0.0  ;;  %v5539_v41 = vmul.f32 %v8871_v35, %v9141_v37 }
 0x48c   : > { %v5636_v2 = vmax.f32 %v5604_v23, 0.0  ;;  %v5670_v10 = vpack.c.bf16 %v5638_v46, %v5638_v46  ;;  %v5282_v21 = vmax.f32 %v5250_v50, 0.0  ;;  %v5607_v24 = vadd.f32 %v5575_v36, %v537_v20 }
 0x48d   : > { %v538_v12 = vunpack.c.h.bf16 %v6497_v42  ;;  %v5283_v47 = vmax.f32 %v5251_v59, 0.0  ;;  %v5673_v9 = vpack.c.bf16 %v5641_v5, %v5641_v5  ;;  %v5578_v1 = vadd.f32 %v9146_v14, %v5539_v41 }
 0x48e   : > { %v5668_v55 = vpack.c.bf16 %v5636_v2, %v5636_v2  ;;  %5703 = vst.msk [vmem:[%s9184_s20 + $0xc] sm:$0xf] %vm5699_vm14, %v5670_v10  ;;  %v5537_v62 = vmul.f32 %v9141_v37, %v8878_v4  ;;  %v5639_v57 = vmax.f32 %v5607_v24, 0.0  ;;  %v543_v13 = vunpack.c.l.bf16 %v6498_v51 }
 0x48f   : > { %v5542_v35 = vmul.f32 %v8917_v45, %v9141_v37  ;;  %v541_v17 = vunpack.c.l.bf16 %v6499_v54  ;;  %v5299_v3 = vpack.c.bf16 %v5283_v47, %v5282_v21  ;;  %5706 = vst.msk [vmem:[%s9184_s20 + $0x18] sm:$0xf] %vm5699_vm14, %v5673_v9  ;;  %v5610_v32 = vadd.f32 %v5578_v1, %v540_v31 }
 0x490   : > { %5701 = vst.msk [vmem:[%s9184_s20 + $0x4] sm:$0xf] %vm5699_vm14, %v5668_v55  ;;  %v5576_v6 = vadd.f32 %v9146_v14, %v5537_v62  ;;  %v5540_v4 = vmul.f32 %v9141_v37, %v8924_v15  ;;  %v5671_v63 = vpack.c.bf16 %v5639_v57, %v5639_v57  ;;  %v544_v56 = vunpack.c.h.bf16 %v6498_v51 }
 0x491   : > { %v5581_v30 = vadd.f32 %v9146_v14, %v5542_v35  ;;  %v5543_v45 = vmul.f32 %v9437_v28, %v9141_v37  ;;  %6282 = vmatmul.mubr.bf16.gmra.mrb[24].mxu1 %v5299_v3  ;;  %v5642_v11 = vmax.f32 %v5610_v32, 0.0  ;;  %v542_v61 = vunpack.c.h.bf16 %v6499_v54  ;;  %v6502_v35 = vld [vmem:[%s7281_s11 + $0x48] sm:$0xff]   ;;  %v6503_v32 = vld [vmem:[%s7281_s11 + $0x40] sm:$0xff]  }
 0x492   : > { %v5608_v49 = vadd.f32 %v5576_v6, %v538_v12  ;;  %v5579_v52 = vadd.f32 %v9146_v14, %v5540_v4  ;;  %5704 = vst.msk [vmem:[%s9184_s20 + $0x10] sm:$0xf] %vm5699_vm14, %v5671_v63  ;;  %v5541_v16 = vmul.f32 %v9141_v37, %v9438_v22  ;;  %v547_v40 = vunpack.c.l.bf16 %v6500_v58 }
 0x493   : > { %v5613_v26 = vadd.f32 %v5581_v30, %v543_v13  ;;  %v5582_v15 = vadd.f32 %v9146_v14, %v5543_v45  ;;  %v5674_v27 = vpack.c.bf16 %v5642_v11, %v5642_v11  ;;  %v5546_v20 = vmul.f32 %v9083_v34, %v9141_v37 }
 0x494   : > { %v5640_v19 = vmax.f32 %v5608_v49, 0.0  ;;  %v5611_v42 = vadd.f32 %v5579_v52, %v541_v17  ;;  %v5580_v43 = vadd.f32 %v9146_v14, %v5541_v16  ;;  %v545_v25 = vunpack.c.l.bf16 %v6501_v0 }
 0x495   : > { %v5645_v38 = vmax.f32 %v5613_v26, 0.0  ;;  %v5614_v18 = vadd.f32 %v5582_v15, %v544_v56  ;;  %5707 = vst.msk [vmem:[%s9184_s20 + $0x1c] sm:$0xf] %vm5699_vm14, %v5674_v27  ;;  %v5585_v23 = vadd.f32 %v9146_v14, %v5546_v20  ;;  %v5544_v29 = vmul.f32 %v9141_v37, %v9086_v39 }
 0x496   : > { %v5672_v53 = vpack.c.bf16 %v5640_v19, %v5640_v19  ;;  %v5643_v33 = vmax.f32 %v5611_v42, 0.0  ;;  %v5612_v34 = vadd.f32 %v5580_v43, %v542_v61  ;;  %v548_v46 = vunpack.c.h.bf16 %v6500_v58 }
 0x497   : > { %v5677_v48 = vpack.c.bf16 %v5645_v38, %v5645_v38  ;;  %v5646_v44 = vmax.f32 %v5614_v18, 0.0  ;;  %v5617_v50 = vadd.f32 %v5585_v23, %v547_v40  ;;  %v5583_v2 = vadd.f32 %v9146_v14, %v5544_v29  ;;  %v6505_v29 = vld [vmem:[%s7281_s11 + $0x50] sm:$0xff]  }
 0x498   : > { %5705 = vst.msk [vmem:[%s9184_s20 + $0x14] sm:$0xf] %vm5699_vm14, %v5672_v53  ;;  %v5675_v7 = vpack.c.bf16 %v5643_v33, %v5643_v33  ;;  %v5547_v36 = vmul.f32 %v9088_v8, %v9141_v37  ;;  %v5644_v39 = vmax.f32 %v5612_v34, 0.0  ;;  %v546_v59 = vunpack.c.h.bf16 %v6501_v0 }
 0x499   : > { %5710 = vst.msk [vmem:[%s9184_s20 + $0x28] sm:$0xf] %vm5699_vm14, %v5677_v48  ;;  %v5678_v31 = vpack.c.bf16 %v5646_v44, %v5646_v44  ;;  %v5545_v10 = vmul.f32 %v9141_v37, %v9090_v60  ;;  %v5649_v5 = vmax.f32 %v5617_v50, 0.0  ;;  %v5615_v41 = vadd.f32 %v5583_v2, %v545_v25  ;;  %v6504_v25 = vld [vmem:[%s7281_s11 + $0x58] sm:$0xff]  }
 0x49a   : > { %5708 = vst.msk [vmem:[%s9184_s20 + $0x20] sm:$0xf] %vm5699_vm14, %v5675_v7  ;;  %v5586_v21 = vadd.f32 %v9146_v14, %v5547_v36  ;;  %v5676_v8 = vpack.c.bf16 %v5644_v39, %v5644_v39  ;;  %v551_v54 = vunpack.c.l.bf16 %v6502_v35  ;;  %v549_v6 = vunpack.c.l.bf16 %v6503_v32 }
 0x49b   : > { %5711 = vst.msk [vmem:[%s9184_s20 + $0x2c] sm:$0xf] %vm5699_vm14, %v5678_v31  ;;  %v5584_v55 = vadd.f32 %v9146_v14, %v5545_v10  ;;  %v5681_v24 = vpack.c.bf16 %v5649_v5, %v5649_v5  ;;  %v5647_v12 = vmax.f32 %v5615_v41, 0.0  ;;  %v552_v56 = vunpack.c.h.bf16 %v6502_v35 }
 0x49c   : > { %v5618_v47 = vadd.f32 %v5586_v21, %v548_v46  ;;  %5709 = vst.msk [vmem:[%s9184_s20 + $0x24] sm:$0xf] %vm5699_vm14, %v5676_v8  ;;  %v550_v49 = vunpack.c.h.bf16 %v6503_v32  ;;  %v555_v53 = vunpack.c.l.bf16 %v6504_v25  ;;  %v553_v48 = vunpack.c.l.bf16 %v6505_v29 }
 0x49d   : > { %v5616_v60 = vadd.f32 %v5584_v55, %v546_v59  ;;  %5714 = vst.msk [vmem:[%s9184_s20 + $0x38] sm:$0xf] %vm5699_vm14, %v5681_v24  ;;  %v5679_v9 = vpack.c.bf16 %v5647_v12, %v5647_v12  ;;  %v556_v7 = vunpack.c.h.bf16 %v6504_v25  ;;  %v554_v31 = vunpack.c.h.bf16 %v6505_v29 }
 0x49e   : > { %v5650_v1 = vmax.f32 %v5618_v47, 0.0 }
 0x49f   : > { %v5648_v62 = vmax.f32 %v5616_v60, 0.0  ;;  %5712 = vst.msk [vmem:[%s9184_s20 + $0x30] sm:$0xf] %vm5699_vm14, %v5679_v9 }
 0x4a0   : > { %v5682_v57 = vpack.c.bf16 %v5650_v1, %v5650_v1 }
 0x4a1   : > { %v5680_v51 = vpack.c.bf16 %v5648_v62, %v5648_v62 }
 0x4a2   : > { %5715 = vst.msk [vmem:[%s9184_s20 + $0x3c] sm:$0xf] %vm5699_vm14, %v5682_v57 }
 0x4a3   : > { %5713 = vst.msk [vmem:[%s9184_s20 + $0x34] sm:$0xf] %vm5699_vm14, %v5680_v51  ;;  %v6271_v13 = vpop.f32.mrb[12].mxu1  ;;  %v6506_v51 = vld [vmem:[%s7281_s11 + $0x68] sm:$0xff]  }
 0x4a4   : > { %v5550_v17 = vmul.f32 %v6271_v13, %v9141_v37  ;;  %v5462_v3 = vpop.f32.mrb[13].mxu1  ;;  %v559_v13 = vunpack.c.l.bf16 %v6506_v51 }
 0x4a5   : > { %v5548_v4 = vmul.f32 %v9141_v37, %v5462_v3  ;;  %v6272_v63 = vpop.f32.mrb[14].mxu1 }
 0x4a6   : > { %v5589_v30 = vadd.f32 %v9146_v14, %v5550_v17  ;;  %v5551_v28 = vmul.f32 %v6272_v63, %v9141_v37  ;;  %v5465_v45 = vpop.f32.mrb[15].mxu1  ;;  %v6507_v17 = vld [vmem:[%s7281_s11 + $0x60] sm:$0xff]   ;;  %v560_v63 = vunpack.c.h.bf16 %v6506_v51 }
 0x4a7   : > { %v5587_v11 = vadd.f32 %v9146_v14, %v5548_v4  ;;  %v5549_v52 = vmul.f32 %v9141_v37, %v5465_v45  ;;  %v557_v3 = vunpack.c.l.bf16 %v6507_v17  ;;  %v558_v45 = vunpack.c.h.bf16 %v6507_v17 }
 0x4a8   : > { %v5621_v61 = vadd.f32 %v5589_v30, %v551_v54  ;;  %v5590_v26 = vadd.f32 %v9146_v14, %v5551_v28 }
 0x4a9   : > { %v5619_v15 = vadd.f32 %v5587_v11, %v549_v6  ;;  %v5588_v22 = vadd.f32 %v9146_v14, %v5549_v52 }
 0x4aa   : > { %v5653_v16 = vmax.f32 %v5621_v61, 0.0  ;;  %v5622_v58 = vadd.f32 %v5590_v26, %v552_v56 }
 0x4ab   : > { %v5651_v40 = vmax.f32 %v5619_v15, 0.0  ;;  %v5620_v27 = vadd.f32 %v5588_v22, %v550_v49 }
 0x4ac   : > { %v5685_v19 = vpack.c.bf16 %v5653_v16, %v5653_v16  ;;  %v5654_v42 = vmax.f32 %v5622_v58, 0.0 }
 0x4ad   : > { %v5683_v20 = vpack.c.bf16 %v5651_v40, %v5651_v40  ;;  %v5652_v38 = vmax.f32 %v5620_v27, 0.0 }
 0x4ae   : > { %5718 = vst.msk [vmem:[%s9184_s20 + $0x48] sm:$0xf] %vm5699_vm14, %v5685_v19  ;;  %v5686_v18 = vpack.c.bf16 %v5654_v42, %v5654_v42 }
 0x4af   : > { %5716 = vst.msk [vmem:[%s9184_s20 + $0x40] sm:$0xf] %vm5699_vm14, %v5683_v20  ;;  %v5684_v43 = vpack.c.bf16 %v5652_v38, %v5652_v38 }
 0x4b0   : > { %5719 = vst.msk [vmem:[%s9184_s20 + $0x4c] sm:$0xf] %vm5699_vm14, %v5686_v18 }
 0x4b1   : > { %5717 = vst.msk [vmem:[%s9184_s20 + $0x44] sm:$0xf] %vm5699_vm14, %v5684_v43  ;;  %v6508_v43 = vld [vmem:[%s7281_s11 + $0x78] sm:$0xff]  }
 0x4e3   : > { %v6275_v0 = vpop.f32.mrb[16].mxu1 }
 0x4e4   : > { %v5554_v33 = vmul.f32 %v6275_v0, %v9141_v37  ;;  %v5478_v23 = vpop.f32.mrb[17].mxu1  ;;  %v563_v0 = vunpack.c.l.bf16 %v6508_v43 }
 0x4e5   : > { %v5552_v44 = vmul.f32 %v9141_v37, %v5478_v23  ;;  %v6276_v34 = vpop.f32.mrb[18].mxu1 }
 0x4e6   : > { %v5593_v46 = vadd.f32 %v9146_v14, %v5554_v33  ;;  %v5555_v50 = vmul.f32 %v6276_v34, %v9141_v37  ;;  %v5481_v2 = vpop.f32.mrb[19].mxu1  ;;  %v6509_v33 = vld [vmem:[%s7281_s11 + $0x70] sm:$0xff]   ;;  %v564_v34 = vunpack.c.h.bf16 %v6508_v43 }
 0x4e7   : > { %v5591_v36 = vadd.f32 %v9146_v14, %v5552_v44  ;;  %v5553_v39 = vmul.f32 %v9141_v37, %v5481_v2  ;;  %v561_v23 = vunpack.c.l.bf16 %v6509_v33  ;;  %v562_v2 = vunpack.c.h.bf16 %v6509_v33 }
 0x4e8   : > { %v5625_v59 = vadd.f32 %v5593_v46, %v555_v53  ;;  %v5594_v10 = vadd.f32 %v9146_v14, %v5555_v50 }
 0x4e9   : > { %v5623_v5 = vadd.f32 %v5591_v36, %v553_v48  ;;  %v5592_v41 = vadd.f32 %v9146_v14, %v5553_v39 }
 0x4ea   : > { %v5657_v21 = vmax.f32 %v5625_v59, 0.0  ;;  %v5626_v8 = vadd.f32 %v5594_v10, %v556_v7 }
 0x4eb   : > { %v5655_v55 = vmax.f32 %v5623_v5, 0.0  ;;  %v5624_v24 = vadd.f32 %v5592_v41, %v554_v31 }
 0x4ec   : > { %v5689_v12 = vpack.c.bf16 %v5657_v21, %v5657_v21  ;;  %v5658_v47 = vmax.f32 %v5626_v8, 0.0 }
 0x4ed   : > { %v5687_v60 = vpack.c.bf16 %v5655_v55, %v5655_v55  ;;  %v5656_v9 = vmax.f32 %v5624_v24, 0.0 }
 0x4ee   : > { %5722 = vst.msk [vmem:[%s9184_s20 + $0x58] sm:$0xf] %vm5699_vm14, %v5689_v12  ;;  %v5690_v1 = vpack.c.bf16 %v5658_v47, %v5658_v47 }
 0x4ef   : > { %5720 = vst.msk [vmem:[%s9184_s20 + $0x50] sm:$0xf] %vm5699_vm14, %v5687_v60  ;;  %v5688_v62 = vpack.c.bf16 %v5656_v9, %v5656_v9 }
 0x4f0   : > { %5723 = vst.msk [vmem:[%s9184_s20 + $0x5c] sm:$0xf] %vm5699_vm14, %v5690_v1 }
 0x4f1   : > { %5721 = vst.msk [vmem:[%s9184_s20 + $0x54] sm:$0xf] %vm5699_vm14, %v5688_v62 }
 0x524   : > { %v6279_v57 = vpop.f32.mrb[20].mxu1 }
 0x525   : > { %v5558_v35 = vmul.f32 %v6279_v57, %v9141_v37  ;;  %v5494_v54 = vpop.f32.mrb[21].mxu1 }
 0x526   : > { %v5556_v32 = vmul.f32 %v9141_v37, %v5494_v54  ;;  %v6280_v6 = vpop.f32.mrb[22].mxu1 }
 0x527   : > { %v5597_v4 = vadd.f32 %v9146_v14, %v5558_v35  ;;  %v5559_v30 = vmul.f32 %v6280_v6, %v9141_v37  ;;  %v5497_v56 = vpop.f32.mrb[23].mxu1 }
 0x528   : > { %v5595_v28 = vadd.f32 %v9146_v14, %v5556_v32  ;;  %v5557_v11 = vmul.f32 %v9141_v37, %v5497_v56 }
 0x529   : > { %v5629_v49 = vadd.f32 %v5597_v4, %v559_v13  ;;  %v5598_v52 = vadd.f32 %v9146_v14, %v5559_v30 }
 0x52a   : > { %v5627_v61 = vadd.f32 %v5595_v28, %v557_v3  ;;  %v5596_v26 = vadd.f32 %v9146_v14, %v5557_v11 }
 0x52b   : > { %v5661_v15 = vmax.f32 %v5629_v49, 0.0  ;;  %v5630_v22 = vadd.f32 %v5598_v52, %v560_v63 }
 0x52c   : > { %v5659_v16 = vmax.f32 %v5627_v61, 0.0  ;;  %v5628_v58 = vadd.f32 %v5596_v26, %v558_v45 }
 0x52d   : > { %v5693_v40 = vpack.c.bf16 %v5661_v15, %v5661_v15  ;;  %v5662_v27 = vmax.f32 %v5630_v22, 0.0 }
 0x52e   : > { %v5691_v19 = vpack.c.bf16 %v5659_v16, %v5659_v16  ;;  %v5660_v42 = vmax.f32 %v5628_v58, 0.0 }
 0x52f   : > { %5726 = vst.msk [vmem:[%s9184_s20 + $0x68] sm:$0xf] %vm5699_vm14, %v5693_v40  ;;  %v5694_v20 = vpack.c.bf16 %v5662_v27, %v5662_v27 }
 0x530   : > { %5724 = vst.msk [vmem:[%s9184_s20 + $0x60] sm:$0xf] %vm5699_vm14, %v5691_v19  ;;  %v5692_v38 = vpack.c.bf16 %v5660_v42, %v5660_v42 }
 0x531   : > { %5727 = vst.msk [vmem:[%s9184_s20 + $0x6c] sm:$0xf] %vm5699_vm14, %v5694_v20 }
 0x532   : > { %5725 = vst.msk [vmem:[%s9184_s20 + $0x64] sm:$0xf] %vm5699_vm14, %v5692_v38 }
 0x564   : > { %v6283_v18 = vpop.f32.mrb[24].mxu1 }
 0x565   : > { %v5562_v25 = vmul.f32 %v6283_v18, %v9141_v37  ;;  %v5510_v53 = vpop.f32.mrb[25].mxu1 }
 0x566   : > { %v5560_v29 = vmul.f32 %v9141_v37, %v5510_v53  ;;  %v6284_v48 = vpop.f32.mrb[26].mxu1 }
 0x567   : > { %v5601_v44 = vadd.f32 %v9146_v14, %v5562_v25  ;;  %v5563_v46 = vmul.f32 %v6284_v48, %v9141_v37  ;;  %v5513_v7 = vpop.f32.mrb[27].mxu1 }
 0x568   : > { %v5599_v50 = vadd.f32 %v9146_v14, %v5560_v29  ;;  %v5561_v36 = vmul.f32 %v9141_v37, %v5513_v7 }
 0x569   : > { %v5633_v31 = vadd.f32 %v5601_v44, %v563_v0  ;;  %v5602_v39 = vadd.f32 %v9146_v14, %v5563_v46 }
 0x56a   : > { %v5631_v59 = vadd.f32 %v5599_v50, %v561_v23  ;;  %v5600_v10 = vadd.f32 %v9146_v14, %v5561_v36 }
 0x56b   : > { %v5665_v5 = vmax.f32 %v5633_v31, 0.0  ;;  %v5634_v41 = vadd.f32 %v5602_v39, %v564_v34 }
 0x56c   : > { %v5663_v21 = vmax.f32 %v5631_v59, 0.0  ;;  %v5632_v8 = vadd.f32 %v5600_v10, %v562_v2 }
 0x56d   : > { %v5697_v55 = vpack.c.bf16 %v5665_v5, %v5665_v5  ;;  %v5666_v24 = vmax.f32 %v5634_v41, 0.0 }
 0x56e   : > { %v5695_v37 = vpack.c.bf16 %v5663_v21, %v5663_v21  ;;  %v5664_v12 = vmax.f32 %v5632_v8, 0.0 }
 0x56f   : > { %5730 = vst.msk [vmem:[%s9184_s20 + $0x78] sm:$0xf] %vm5699_vm14, %v5697_v55  ;;  %v5698_v47 = vpack.c.bf16 %v5666_v24, %v5666_v24 }
 0x570   : > { %5728 = vst.msk [vmem:[%s9184_s20 + $0x70] sm:$0xf] %vm5699_vm14, %v5695_v37  ;;  %v5696_v14 = vpack.c.bf16 %v5664_v12, %v5664_v12 }
 0x571   : > { %5731 = vst.msk [vmem:[%s9184_s20 + $0x7c] sm:$0xf] %vm5699_vm14, %v5698_v47 }
 0x572   : > { %5729 = vst.msk [vmem:[%s9184_s20 + $0x74] sm:$0xf] %vm5699_vm14, %v5696_v14 }
 0x573   : > { %6805 = shalt.err (!%p6802_p3)
}
 0x574   : > { %s6806_s11 = scalar_lea.hbm %s9325_s10, 2048  ;;  %s6810_s24 = scalar_lea.hbm %s9439_s12, 4096 }
 0x575   : > { %p6807_p5 = scmp.ne.s32.totalorder %s9325_s10, %s6806_s11  ;;  %p6811_p4 = scmp.lt.u32.totalorder %s9325_s10, %s9439_s12 }
 0x576   : > { %p6812_p12 = scmp.lt.u32.totalorder %s6810_s24, %s6806_s11  ;;  %p6814_p13 = scmp.lt.u32.totalorder %s6806_s11, %s9325_s10 }
 0x577   : > { %p6808_p9 = pnand %p6807_p5, %p9440_p0 }
 0x578   : > { %p6813_p1 = por %p6812_p12, %p6811_p4 }
 0x579   : > { %p6809_p7 = pneg %p6808_p9 }
 0x57a   : > { %p6815_p2 = por %p6814_p13, %p6813_p1 }
 0x57c   : > { %p6816_p8 = pnand %p6815_p2, %p6809_p7 }
 0x57e   : > { %6819 = shalt.err (!%p6816_p8)
}
 0x57f   : > { %s6896_s1 = smov 64   ;;  %s6897_s27 = smov 4  }
 0x580   : > { %6339 = dma.vmem_to_hbm [thread:$0]  (%p9440_p0), %s9327_s22, 2048, %s9325_s10, %s5733_s19, %s6896_s1, %s6896_s1, %s6897_s27  }
 0x581 PF: > { %s5762_s29 = sand.u32 1, %s6866_s13   ;;  %p9441_p6 = scmp.ne.s32.totalorder %s9407_s25, 0 }
 0x582   : > { %p9442_p10 = scmp.ge.s32.totalorder %s6878_s16, 2  ;;  %s5763_s11 = scalar_lea.sflag [#allocation5], %s5762_s29 }
 0x584   : > { %p6374_p11 = pnand %p9442_p10, %p9441_p6 }
 0x586   : > { %6861 = dma.done.wait (!%p6374_p11), %s5763_s11, 2048  }
 0x587   : > { %6863 = vsyncadd (!%p6374_p11), %s5763_s11, 4294965248  ;;  %p28_p3 = scmp.ge.s32.totalorder %s7199_s23, 4   ;;  %s9443_s13 = smov %s6870_s14 }
 0x588   : > { %s9444_s14 = smov %s6874_s15  ;;  %s9445_s15 = smov %s7211_s21 }
 0x589   : > { %s9446_s16 = smov %s7199_s23  ;;  %30 = sbr.rel (!%p28_p3) target bundleno = 13 (0xd), region = 143 }
 0x590   :  { %5768 = vsyncpa [#allocation4], 1 }
 0x591   :  { %5770 = vsyncpa [#allocation4 + $0x1], 1 }
 0x592   :  { %5771 = vsyncpa [#allocation7], 1 }
 0x593   :  { %5772 = vsyncpa [#allocation10], 1 }
 0x594   :  { %5773 = vsyncpa [#allocation13], 1 }
 0x595   :  { %5774 = vsyncpa [#allocation16], 1 }
 0x596   :  { %5775 = vsyncpa [#allocation19], 1 }
 0x597   :  { %5776 = vsyncpa [#allocation5], 1 }
 0x598   :  { %5778 = vsyncpa [#allocation5 + $0x1], 1 }

</bundles_post_ra>
